<compile_context>
chip_gen: v7x
topology: tpu7x:2x2x1
jax: 0.10.0
libtpu: 0.0.40
codegen_flags: <defaults>
</compile_context>

<pallas_src>
import functools

import jax
import jax.numpy as jnp
import numpy as np
from jax.experimental import pallas as pl
from jax.experimental.pallas import tpu as pltpu


# ---------------------------------------------------------------------------
# Fused BiLSTM forward kernel (single invocation, everything VMEM-resident).
#   refs = (x_flat, masks_flat, [w_ih, w_hh, bias] * num_layers, fc_w, fc_b, out)
# ---------------------------------------------------------------------------
def _bilstm_fused_kernel(*refs, num_layers, hidden, seq_len, batch):
    H, S, B = hidden, seq_len, batch
    x_ref, m_ref = refs[0], refs[1]
    w_refs = refs[2:2 + 3 * num_layers]
    fcw_ref = refs[2 + 3 * num_layers]
    fcb_ref = refs[3 + 3 * num_layers]
    out_ref = refs[4 + 3 * num_layers]

    m_all = m_ref[...]                                   # (S*B, 1)  f32
    x_flat = x_ref[...]                                  # (S*B, D)  f32 layer input
    att = None

    for layer in range(num_layers):
        wih_ref, whh_ref, b_ref = w_refs[3 * layer:3 * layer + 3]
        # Hoisted, loop-invariant weight/bias loads (once per layer).
        w_ih = wih_ref[...]                              # (Din, 8H) f32
        w_hh = whh_ref[...]                              # (2H, 8H)  f32 block-diag fwd/bwd
        bias = b_ref[...]                                # (1, 8H)   f32

        # ---- Input projection for ALL timesteps & both directions: one matmul,
        #      fully hoisted out of the recurrence. ----------------------------
        gx = jnp.dot(x_flat, w_ih, preferred_element_type=jnp.float32) + bias   # (S*B, 8H)

        # Pre-combine fwd(t) / bwd(S-1-t) halves so the time loop only slices.
        gx_b_rev = jnp.concatenate(
            [gx[(S - 1 - t) * B:(S - t) * B, 4 * H:8 * H] for t in range(S)], axis=0)
        gi_all = jnp.concatenate([gx[:, 0:4 * H], gx_b_rev], axis=-1)            # (S*B, 8H)

        h = jnp.zeros((B, 2 * H), jnp.float32)           # [h_fwd | h_bwd]
        c_f = jnp.zeros((B, H), jnp.float32)
        c_b = jnp.zeros((B, H), jnp.float32)

        last = layer == num_layers - 1
        if last:
            att_f = jnp.zeros((B, H), jnp.float32)       # fused masked temporal sum
            att_b = jnp.zeros((B, H), jnp.float32)
        else:
            hs = []                                      # per-step outputs kept in vregs

        for t in range(S):                               # fully unrolled (S is small)
            # One fused recurrent matmul for both directions per step.
            gates = gi_all[t * B:(t + 1) * B, :] + jnp.dot(
                h, w_hh, preferred_element_type=jnp.float32)                     # (B, 8H)
            # Single full-width EUP pass; g-gate columns were pre-scaled by 2 in
            # the wrapper, so tanh(z) is recovered as 2*sigmoid(2z)-1 below.
            sig = jax.nn.sigmoid(gates)
            c_f = sig[:, 1 * H:2 * H] * c_f + sig[:, 0 * H:1 * H] * (
                2.0 * sig[:, 2 * H:3 * H] - 1.0)
            c_b = sig[:, 5 * H:6 * H] * c_b + sig[:, 4 * H:5 * H] * (
                2.0 * sig[:, 6 * H:7 * H] - 1.0)
            tc = jnp.tanh(jnp.concatenate([c_f, c_b], axis=-1))                  # one tanh
            o_cat = jnp.concatenate([sig[:, 3 * H:4 * H], sig[:, 7 * H:8 * H]], axis=-1)
            h = o_cat * tc                               # (B, 2H): [h_f(t) | h_b(S-1-t)]

            if last:
                # Masked sum over time fused into the recurrence (no activation
                # stores / reload for the final layer).
                att_f = att_f + m_all[t * B:(t + 1) * B, :] * h[:, 0:H]
                att_b = att_b + m_all[(S - 1 - t) * B:(S - t) * B, :] * h[:, H:2 * H]
            else:
                hs.append(h)

        if last:
            att = jnp.concatenate([att_f, att_b], axis=-1)                       # (B, 2H)
        else:
            # Next layer's input slab, assembled in registers: row-block t is
            # [h_f(t) | h_b(t)] (backward half re-ordered back to ascending time).
            fwd_rows = jnp.concatenate([hs[t][:, 0:H] for t in range(S)], axis=0)
            bwd_rows = jnp.concatenate(
                [hs[S - 1 - t][:, H:2 * H] for t in range(S)], axis=0)
            x_flat = jnp.concatenate([fwd_rows, bwd_rows], axis=-1)              # (S*B, 2H)
        # TODO(synk): nn.LSTM inter-layer dropout is train-mode only; eval forward omits it.

    out_ref[...] = (
        jnp.dot(att, fcw_ref[...], preferred_element_type=jnp.float32) + fcb_ref[...]
    ).astype(out_ref.dtype)


# ---------------------------------------------------------------------------
# Wrapper: fuses fwd/bwd weights, pre-scales g-gate columns, calls the kernel.
# ---------------------------------------------------------------------------
def _fuse_direction_weights(fwd, bwd):
    w_ih_f, w_hh_f, b_ih_f, b_hh_f = fwd
    w_ih_b, w_hh_b, b_ih_b, b_hh_b = bwd
    H = w_hh_f.shape[1]
    f32 = jnp.float32

    w_ih = jnp.concatenate([w_ih_f.T, w_ih_b.T], axis=1).astype(f32)       # (Din, 8H)
    zeros = jnp.zeros((H, 4 * H), f32)
    w_hh = jnp.concatenate([
        jnp.concatenate([w_hh_f.T.astype(f32), zeros], axis=1),            # rows 0:H  (h_f)
        jnp.concatenate([zeros, w_hh_b.T.astype(f32)], axis=1),            # rows H:2H (h_b)
    ], axis=0)                                                             # (2H, 8H)
    bias = jnp.concatenate(
        [b_ih_f + b_hh_f, b_ih_b + b_hh_b]).astype(f32).reshape(1, 8 * H)  # (1, 8H)

    # Pre-scale g-gate columns by 2 so the kernel's single sigmoid pass gives
    # tanh(z) = 2*sigmoid(2z)-1.
    scale = jnp.ones((8 * H,), f32).at[2 * H:3 * H].set(2.0).at[6 * H:7 * H].set(2.0)
    return w_ih * scale, w_hh * scale, bias * scale


def bilstm_forward(tokens_features, masks, params):
    # tokens_features: (B, S, D) batch_first (PyTorch);  masks: (B, S)
    B, S, D = tokens_features.shape
    num_layers = len(params["lstm"])
    H = params["lstm"][0][0][1].shape[1]          # w_hh: (4H, H)
    O = params["fc_w"].shape[0]

    # Flatten to time-major rows: row t*B+b  <->  (time t, batch b).
    x_flat = jnp.transpose(tokens_features, (1, 0, 2)).reshape(S * B, D).astype(jnp.float32)
    m_flat = jnp.transpose(masks, (1, 0)).reshape(S * B, 1).astype(jnp.float32)

    inputs = [x_flat, m_flat]
    flops, transc = 0, 0
    din = D
    for fwd, bwd in params["lstm"]:
        inputs += list(_fuse_direction_weights(fwd, bwd))
        flops += 2 * S * B * din * 8 * H          # hoisted input projection
        flops += 2 * S * B * (2 * H) * 8 * H      # recurrent (block-diag) matmuls
        transc += S * B * (8 * H + 2 * H)         # sigmoid + tanh per step
        din = 2 * H
    inputs += [
        jnp.asarray(params["fc_w"].T, jnp.float32),                # (2H, O)
        params["fc_b"].reshape(1, O).astype(jnp.float32),
    ]
    flops += 2 * B * 2 * H * O
    bytes_accessed = int(
        sum(int(np.prod(a.shape)) * a.dtype.itemsize for a in inputs) + B * O * 4)

    kernel = functools.partial(
        _bilstm_fused_kernel, num_layers=num_layers, hidden=H, seq_len=S, batch=B)

    n_in = len(inputs)
    # Single invocation (no grid): whole arrays resident in VMEM, no pipelining
    # or double-buffer allocation.  v7x: for B >= 128 add a leading batch grid
    # axis marked "parallel" to split the batch across the two TensorCores.
    return pl.pallas_call(
        kernel,
        out_shape=jax.ShapeDtypeStruct((B, O), jnp.float32),
        in_specs=[pl.BlockSpec(memory_space=pltpu.MemorySpace.VMEM)] * n_in,
        out_specs=pl.BlockSpec(memory_space=pltpu.MemorySpace.VMEM),
        cost_estimate=pl.CostEstimate(
            flops=int(flops),
            transcendentals=int(transc),
            bytes_accessed=bytes_accessed,
        ),
    )(*inputs)


# ---------------------------------------------------------------------------
# Pure-JAX reference (f32, lax.scan) for correctness checking.
# ---------------------------------------------------------------------------
def _lstm_dir_ref(x_sbd, w_ih, w_hh, b_ih, b_hh):
    B = x_sbd.shape[1]
    H = w_hh.shape[1]
    b = b_ih + b_hh

    def step(carry, x_t):
        h, c = carry
        gates = x_t @ w_ih.T + h @ w_hh.T + b
        i, f, g, o = jnp.split(gates, 4, axis=-1)
        i, f, o = jax.nn.sigmoid(i), jax.nn.sigmoid(f), jax.nn.sigmoid(o)
        g = jnp.tanh(g)
        c = f * c + i * g
        h = o * jnp.tanh(c)
        return (h, c), h

    init = (jnp.zeros((B, H), jnp.float32), jnp.zeros((B, H), jnp.float32))
    _, hs = jax.lax.scan(step, init, x_sbd)
    return hs


def bilstm_ref(tokens_features, masks, params):
    x = jnp.transpose(tokens_features, (1, 0, 2)).astype(jnp.float32)
    for fwd, bwd in params["lstm"]:
        hf = _lstm_dir_ref(x, *fwd)
        hb = _lstm_dir_ref(x[::-1], *bwd)[::-1]
        x = jnp.concatenate([hf, hb], axis=-1)
    att = jnp.sum(jnp.transpose(masks, (1, 0))[:, :, None] * x, axis=0)  # (B, 2H)
    return att @ params["fc_w"].T + params["fc_b"]


# ---------------------------------------------------------------------------
# Deterministic parameter init (PyTorch-style uniform(-1/sqrt(H), 1/sqrt(H))).
# ---------------------------------------------------------------------------
def init_params(key, input_dim, hidden, num_layers, out_dim):
    k = 1.0 / np.sqrt(hidden)
    keys = iter(jax.random.split(key, num_layers * 8 + 2))
    params = {"lstm": []}
    in_dim = input_dim
    for _ in range(num_layers):
        dirs = []
        for _ in range(2):  # forward, backward
            w_ih = jax.random.uniform(next(keys), (4 * hidden, in_dim), jnp.float32, -k, k)
            w_hh = jax.random.uniform(next(keys), (4 * hidden, hidden), jnp.float32, -k, k)
            b_ih = jax.random.uniform(next(keys), (4 * hidden,), jnp.float32, -k, k)
            b_hh = jax.random.uniform(next(keys), (4 * hidden,), jnp.float32, -k, k)
            dirs.append((w_ih, w_hh, b_ih, b_hh))
        params["lstm"].append(tuple(dirs))
        in_dim = 2 * hidden
    params["fc_w"] = jax.random.uniform(next(keys), (out_dim, 2 * hidden), jnp.float32, -k, k)
    params["fc_b"] = jax.random.uniform(next(keys), (out_dim,), jnp.float32, -k, k)
    return params


if __name__ == "__main__":
    # args: bilstm_input_dim=16, bilstm_hidden_dim=32, bilstm_num_layer=2,
    #       bilstm_input_max_sequence_length=8, output_dim_of_pattern_based_model=8
    B, S, D, H, LAYERS, OUT = 2, 8, 16, 32, 2, 8

    key = jax.random.PRNGKey(0)
    k_feat, k_mask, k_param = jax.random.split(key, 3)

    tokens_features = jax.random.normal(k_feat, (B, S, D), jnp.float32)
    masks = jax.random.bernoulli(k_mask, 0.7, (B, S)).astype(jnp.float32)
    params = init_params(k_param, D, H, LAYERS, OUT)

    out = jax.block_until_ready(bilstm_forward(tokens_features, masks, params))
    with jax.default_matmul_precision("float32"):
        ref = jax.block_until_ready(bilstm_ref(tokens_features, masks, params))

    # Tightened from the previous 2e-2: the kernel no longer re-quantizes the
    # recurrent state / weights to bf16 (f32 operands and f32 accumulation
    # throughout).  The remaining budget covers default-precision MXU operand
    # rounding inside the kernel vs. the float32-precision XLA reference.
    np.testing.assert_allclose(np.asarray(out), np.asarray(ref), atol=1e-2, rtol=1e-2)

    print("KERNEL_OK")
</pallas_src>

<mosaic_0001>
module attributes {stable_mosaic.version = 11 : i64} {
  func.func @_bilstm_fused_kernel(%arg0: memref<16x16xf32, #tpu.memory_space<vmem>>, %arg1: memref<16x1xf32, #tpu.memory_space<vmem>>, %arg2: memref<16x256xf32, #tpu.memory_space<vmem>>, %arg3: memref<64x256xf32, #tpu.memory_space<vmem>>, %arg4: memref<1x256xf32, #tpu.memory_space<vmem>>, %arg5: memref<64x256xf32, #tpu.memory_space<vmem>>, %arg6: memref<64x256xf32, #tpu.memory_space<vmem>>, %arg7: memref<1x256xf32, #tpu.memory_space<vmem>>, %arg8: memref<64x8xf32, #tpu.memory_space<vmem>>, %arg9: memref<1x8xf32, #tpu.memory_space<vmem>>, %arg10: memref<2x8xf32, #tpu.memory_space<vmem>>) attributes {dimension_semantics = [], scalar_prefetch = 0 : i64, scratch_operands = 0 : i64, tpu.core_type = #tpu.core_type<tc>} {
    %c0 = arith.constant 0 : index
    %c0_0 = arith.constant 0 : index
    %0 = vector.load %arg1[%c0, %c0_0] : memref<16x1xf32, #tpu.memory_space<vmem>>, vector<16x1xf32>
    %c0_1 = arith.constant 0 : index
    %c0_2 = arith.constant 0 : index
    %1 = vector.load %arg0[%c0_1, %c0_2] : memref<16x16xf32, #tpu.memory_space<vmem>>, vector<16x16xf32>
    %c0_3 = arith.constant 0 : index
    %c0_4 = arith.constant 0 : index
    %2 = vector.load %arg2[%c0_3, %c0_4] : memref<16x256xf32, #tpu.memory_space<vmem>>, vector<16x256xf32>
    %c0_5 = arith.constant 0 : index
    %c0_6 = arith.constant 0 : index
    %3 = vector.load %arg3[%c0_5, %c0_6] : memref<64x256xf32, #tpu.memory_space<vmem>>, vector<64x256xf32>
    %c0_7 = arith.constant 0 : index
    %c0_8 = arith.constant 0 : index
    %4 = vector.load %arg4[%c0_7, %c0_8] : memref<1x256xf32, #tpu.memory_space<vmem>>, vector<1x256xf32>
    %cst = arith.constant dense<0.000000e+00> : vector<16x256xf32>
    %5 = tpu.matmul %1, %2, %cst {dimension_numbers = #tpu.dot_dimension_numbers<[1], [0], [0], [1], [0, 0, 1, 1], [], []>} : vector<16x16xf32>, vector<16x256xf32>, vector<16x256xf32> -> vector<16x256xf32>
    %6 = vector.broadcast %4 : vector<1x256xf32> to vector<16x256xf32>
    %7 = arith.addf %5, %6 : vector<16x256xf32>
    %8 = vector.extract_strided_slice %7 {offsets = [14, 128], sizes = [2, 128], strides = [1, 1]} : vector<16x256xf32> to vector<2x128xf32>
    %9 = vector.extract_strided_slice %7 {offsets = [12, 128], sizes = [2, 128], strides = [1, 1]} : vector<16x256xf32> to vector<2x128xf32>
    %10 = vector.extract_strided_slice %7 {offsets = [10, 128], sizes = [2, 128], strides = [1, 1]} : vector<16x256xf32> to vector<2x128xf32>
    %11 = vector.extract_strided_slice %7 {offsets = [8, 128], sizes = [2, 128], strides = [1, 1]} : vector<16x256xf32> to vector<2x128xf32>
    %12 = vector.extract_strided_slice %7 {offsets = [6, 128], sizes = [2, 128], strides = [1, 1]} : vector<16x256xf32> to vector<2x128xf32>
    %13 = vector.extract_strided_slice %7 {offsets = [4, 128], sizes = [2, 128], strides = [1, 1]} : vector<16x256xf32> to vector<2x128xf32>
    %14 = vector.extract_strided_slice %7 {offsets = [2, 128], sizes = [2, 128], strides = [1, 1]} : vector<16x256xf32> to vector<2x128xf32>
    %15 = vector.extract_strided_slice %7 {offsets = [0, 128], sizes = [2, 128], strides = [1, 1]} : vector<16x256xf32> to vector<2x128xf32>
    %16 = tpu.concatenate %8, %9, %10, %11, %12, %13, %14, %15 in 0 : vector<2x128xf32>, vector<2x128xf32>, vector<2x128xf32>, vector<2x128xf32>, vector<2x128xf32>, vector<2x128xf32>, vector<2x128xf32>, vector<2x128xf32> -> vector<16x128xf32>
    %17 = vector.extract_strided_slice %7 {offsets = [0, 0], sizes = [16, 128], strides = [1, 1]} : vector<16x256xf32> to vector<16x128xf32>
    %18 = tpu.concatenate %17, %16 in 1 : vector<16x128xf32>, vector<16x128xf32> -> vector<16x256xf32>
    %cst_9 = arith.constant 0.000000e+00 : f32
    %19 = vector.broadcast %cst_9 : f32 to vector<2x64xf32>
    %cst_10 = arith.constant 0.000000e+00 : f32
    %20 = vector.broadcast %cst_10 : f32 to vector<2x32xf32>
    %cst_11 = arith.constant 0.000000e+00 : f32
    %21 = vector.broadcast %cst_11 : f32 to vector<2x32xf32>
    %22 = vector.extract_strided_slice %18 {offsets = [0, 0], sizes = [2, 256], strides = [1, 1]} : vector<16x256xf32> to vector<2x256xf32>
    %cst_12 = arith.constant dense<0.000000e+00> : vector<2x256xf32>
    %23 = tpu.matmul %19, %3, %cst_12 {dimension_numbers = #tpu.dot_dimension_numbers<[1], [0], [0], [1], [0, 0, 1, 1], [], []>} : vector<2x64xf32>, vector<64x256xf32>, vector<2x256xf32> -> vector<2x256xf32>
    %24 = arith.addf %22, %23 : vector<2x256xf32>
    %25 = arith.negf %24 : vector<2x256xf32>
    %26 = math.exp %25 : vector<2x256xf32>
    %cst_13 = arith.constant 1.000000e+00 : f32
    %27 = vector.broadcast %cst_13 : f32 to vector<2x256xf32>
    %28 = arith.addf %27, %26 : vector<2x256xf32>
    %29 = arith.divf %27, %28 : vector<2x256xf32>
    %30 = vector.extract_strided_slice %29 {offsets = [0, 32], sizes = [2, 32], strides = [1, 1]} : vector<2x256xf32> to vector<2x32xf32>
    %31 = arith.mulf %30, %20 : vector<2x32xf32>
    %32 = vector.extract_strided_slice %29 {offsets = [0, 0], sizes = [2, 32], strides = [1, 1]} : vector<2x256xf32> to vector<2x32xf32>
    %33 = vector.extract_strided_slice %29 {offsets = [0, 64], sizes = [2, 32], strides = [1, 1]} : vector<2x256xf32> to vector<2x32xf32>
    %cst_14 = arith.constant 2.000000e+00 : f32
    %34 = vector.broadcast %cst_14 : f32 to vector<2x32xf32>
    %35 = arith.mulf %34, %33 : vector<2x32xf32>
    %cst_15 = arith.constant 1.000000e+00 : f32
    %36 = vector.broadcast %cst_15 : f32 to vector<2x32xf32>
    %37 = arith.subf %35, %36 : vector<2x32xf32>
    %38 = arith.mulf %32, %37 : vector<2x32xf32>
    %39 = arith.addf %31, %38 : vector<2x32xf32>
    %40 = vector.extract_strided_slice %29 {offsets = [0, 160], sizes = [2, 32], strides = [1, 1]} : vector<2x256xf32> to vector<2x32xf32>
    %41 = arith.mulf %40, %21 : vector<2x32xf32>
    %42 = vector.extract_strided_slice %29 {offsets = [0, 128], sizes = [2, 32], strides = [1, 1]} : vector<2x256xf32> to vector<2x32xf32>
    %43 = vector.extract_strided_slice %29 {offsets = [0, 192], sizes = [2, 32], strides = [1, 1]} : vector<2x256xf32> to vector<2x32xf32>
    %cst_16 = arith.constant 2.000000e+00 : f32
    %44 = vector.broadcast %cst_16 : f32 to vector<2x32xf32>
    %45 = arith.mulf %44, %43 : vector<2x32xf32>
    %cst_17 = arith.constant 1.000000e+00 : f32
    %46 = vector.broadcast %cst_17 : f32 to vector<2x32xf32>
    %47 = arith.subf %45, %46 : vector<2x32xf32>
    %48 = arith.mulf %42, %47 : vector<2x32xf32>
    %49 = arith.addf %41, %48 : vector<2x32xf32>
    %50 = tpu.concatenate %39, %49 in 1 : vector<2x32xf32>, vector<2x32xf32> -> vector<2x64xf32>
    %51 = math.tanh %50 : vector<2x64xf32>
    %52 = vector.extract_strided_slice %29 {offsets = [0, 96], sizes = [2, 32], strides = [1, 1]} : vector<2x256xf32> to vector<2x32xf32>
    %53 = vector.extract_strided_slice %29 {offsets = [0, 224], sizes = [2, 32], strides = [1, 1]} : vector<2x256xf32> to vector<2x32xf32>
    %54 = tpu.concatenate %52, %53 in 1 : vector<2x32xf32>, vector<2x32xf32> -> vector<2x64xf32>
    %55 = arith.mulf %54, %51 : vector<2x64xf32>
    %56 = vector.extract_strided_slice %18 {offsets = [2, 0], sizes = [2, 256], strides = [1, 1]} : vector<16x256xf32> to vector<2x256xf32>
    %cst_18 = arith.constant dense<0.000000e+00> : vector<2x256xf32>
    %57 = tpu.matmul %55, %3, %cst_18 {dimension_numbers = #tpu.dot_dimension_numbers<[1], [0], [0], [1], [0, 0, 1, 1], [], []>} : vector<2x64xf32>, vector<64x256xf32>, vector<2x256xf32> -> vector<2x256xf32>
    %58 = arith.addf %56, %57 : vector<2x256xf32>
    %59 = arith.negf %58 : vector<2x256xf32>
    %60 = math.exp %59 : vector<2x256xf32>
    %cst_19 = arith.constant 1.000000e+00 : f32
    %61 = vector.broadcast %cst_19 : f32 to vector<2x256xf32>
    %62 = arith.addf %61, %60 : vector<2x256xf32>
    %63 = arith.divf %61, %62 : vector<2x256xf32>
    %64 = vector.extract_strided_slice %63 {offsets = [0, 32], sizes = [2, 32], strides = [1, 1]} : vector<2x256xf32> to vector<2x32xf32>
    %65 = arith.mulf %64, %39 : vector<2x32xf32>
    %66 = vector.extract_strided_slice %63 {offsets = [0, 0], sizes = [2, 32], strides = [1, 1]} : vector<2x256xf32> to vector<2x32xf32>
    %67 = vector.extract_strided_slice %63 {offsets = [0, 64], sizes = [2, 32], strides = [1, 1]} : vector<2x256xf32> to vector<2x32xf32>
    %cst_20 = arith.constant 2.000000e+00 : f32
    %68 = vector.broadcast %cst_20 : f32 to vector<2x32xf32>
    %69 = arith.mulf %68, %67 : vector<2x32xf32>
    %cst_21 = arith.constant 1.000000e+00 : f32
    %70 = vector.broadcast %cst_21 : f32 to vector<2x32xf32>
    %71 = arith.subf %69, %70 : vector<2x32xf32>
    %72 = arith.mulf %66, %71 : vector<2x32xf32>
    %73 = arith.addf %65, %72 : vector<2x32xf32>
    %74 = vector.extract_strided_slice %63 {offsets = [0, 160], sizes = [2, 32], strides = [1, 1]} : vector<2x256xf32> to vector<2x32xf32>
    %75 = arith.mulf %74, %49 : vector<2x32xf32>
    %76 = vector.extract_strided_slice %63 {offsets = [0, 128], sizes = [2, 32], strides = [1, 1]} : vector<2x256xf32> to vector<2x32xf32>
    %77 = vector.extract_strided_slice %63 {offsets = [0, 192], sizes = [2, 32], strides = [1, 1]} : vector<2x256xf32> to vector<2x32xf32>
    %cst_22 = arith.constant 2.000000e+00 : f32
    %78 = vector.broadcast %cst_22 : f32 to vector<2x32xf32>
    %79 = arith.mulf %78, %77 : vector<2x32xf32>
    %cst_23 = arith.constant 1.000000e+00 : f32
    %80 = vector.broadcast %cst_23 : f32 to vector<2x32xf32>
    %81 = arith.subf %79, %80 : vector<2x32xf32>
    %82 = arith.mulf %76, %81 : vector<2x32xf32>
    %83 = arith.addf %75, %82 : vector<2x32xf32>
    %84 = tpu.concatenate %73, %83 in 1 : vector<2x32xf32>, vector<2x32xf32> -> vector<2x64xf32>
    %85 = math.tanh %84 : vector<2x64xf32>
    %86 = vector.extract_strided_slice %63 {offsets = [0, 96], sizes = [2, 32], strides = [1, 1]} : vector<2x256xf32> to vector<2x32xf32>
    %87 = vector.extract_strided_slice %63 {offsets = [0, 224], sizes = [2, 32], strides = [1, 1]} : vector<2x256xf32> to vector<2x32xf32>
    %88 = tpu.concatenate %86, %87 in 1 : vector<2x32xf32>, vector<2x32xf32> -> vector<2x64xf32>
    %89 = arith.mulf %88, %85 : vector<2x64xf32>
    %90 = vector.extract_strided_slice %18 {offsets = [4, 0], sizes = [2, 256], strides = [1, 1]} : vector<16x256xf32> to vector<2x256xf32>
    %cst_24 = arith.constant dense<0.000000e+00> : vector<2x256xf32>
    %91 = tpu.matmul %89, %3, %cst_24 {dimension_numbers = #tpu.dot_dimension_numbers<[1], [0], [0], [1], [0, 0, 1, 1], [], []>} : vector<2x64xf32>, vector<64x256xf32>, vector<2x256xf32> -> vector<2x256xf32>
    %92 = arith.addf %90, %91 : vector<2x256xf32>
    %93 = arith.negf %92 : vector<2x256xf32>
    %94 = math.exp %93 : vector<2x256xf32>
    %cst_25 = arith.constant 1.000000e+00 : f32
    %95 = vector.broadcast %cst_25 : f32 to vector<2x256xf32>
    %96 = arith.addf %95, %94 : vector<2x256xf32>
    %97 = arith.divf %95, %96 : vector<2x256xf32>
    %98 = vector.extract_strided_slice %97 {offsets = [0, 32], sizes = [2, 32], strides = [1, 1]} : vector<2x256xf32> to vector<2x32xf32>
    %99 = arith.mulf %98, %73 : vector<2x32xf32>
    %100 = vector.extract_strided_slice %97 {offsets = [0, 0], sizes = [2, 32], strides = [1, 1]} : vector<2x256xf32> to vector<2x32xf32>
    %101 = vector.extract_strided_slice %97 {offsets = [0, 64], sizes = [2, 32], strides = [1, 1]} : vector<2x256xf32> to vector<2x32xf32>
    %cst_26 = arith.constant 2.000000e+00 : f32
    %102 = vector.broadcast %cst_26 : f32 to vector<2x32xf32>
    %103 = arith.mulf %102, %101 : vector<2x32xf32>
    %cst_27 = arith.constant 1.000000e+00 : f32
    %104 = vector.broadcast %cst_27 : f32 to vector<2x32xf32>
    %105 = arith.subf %103, %104 : vector<2x32xf32>
    %106 = arith.mulf %100, %105 : vector<2x32xf32>
    %107 = arith.addf %99, %106 : vector<2x32xf32>
    %108 = vector.extract_strided_slice %97 {offsets = [0, 160], sizes = [2, 32], strides = [1, 1]} : vector<2x256xf32> to vector<2x32xf32>
    %109 = arith.mulf %108, %83 : vector<2x32xf32>
    %110 = vector.extract_strided_slice %97 {offsets = [0, 128], sizes = [2, 32], strides = [1, 1]} : vector<2x256xf32> to vector<2x32xf32>
    %111 = vector.extract_strided_slice %97 {offsets = [0, 192], sizes = [2, 32], strides = [1, 1]} : vector<2x256xf32> to vector<2x32xf32>
    %cst_28 = arith.constant 2.000000e+00 : f32
    %112 = vector.broadcast %cst_28 : f32 to vector<2x32xf32>
    %113 = arith.mulf %112, %111 : vector<2x32xf32>
    %cst_29 = arith.constant 1.000000e+00 : f32
    %114 = vector.broadcast %cst_29 : f32 to vector<2x32xf32>
    %115 = arith.subf %113, %114 : vector<2x32xf32>
    %116 = arith.mulf %110, %115 : vector<2x32xf32>
    %117 = arith.addf %109, %116 : vector<2x32xf32>
    %118 = tpu.concatenate %107, %117 in 1 : vector<2x32xf32>, vector<2x32xf32> -> vector<2x64xf32>
    %119 = math.tanh %118 : vector<2x64xf32>
    %120 = vector.extract_strided_slice %97 {offsets = [0, 96], sizes = [2, 32], strides = [1, 1]} : vector<2x256xf32> to vector<2x32xf32>
    %121 = vector.extract_strided_slice %97 {offsets = [0, 224], sizes = [2, 32], strides = [1, 1]} : vector<2x256xf32> to vector<2x32xf32>
    %122 = tpu.concatenate %120, %121 in 1 : vector<2x32xf32>, vector<2x32xf32> -> vector<2x64xf32>
    %123 = arith.mulf %122, %119 : vector<2x64xf32>
    %124 = vector.extract_strided_slice %18 {offsets = [6, 0], sizes = [2, 256], strides = [1, 1]} : vector<16x256xf32> to vector<2x256xf32>
    %cst_30 = arith.constant dense<0.000000e+00> : vector<2x256xf32>
    %125 = tpu.matmul %123, %3, %cst_30 {dimension_numbers = #tpu.dot_dimension_numbers<[1], [0], [0], [1], [0, 0, 1, 1], [], []>} : vector<2x64xf32>, vector<64x256xf32>, vector<2x256xf32> -> vector<2x256xf32>
    %126 = arith.addf %124, %125 : vector<2x256xf32>
    %127 = arith.negf %126 : vector<2x256xf32>
    %128 = math.exp %127 : vector<2x256xf32>
    %cst_31 = arith.constant 1.000000e+00 : f32
    %129 = vector.broadcast %cst_31 : f32 to vector<2x256xf32>
    %130 = arith.addf %129, %128 : vector<2x256xf32>
    %131 = arith.divf %129, %130 : vector<2x256xf32>
    %132 = vector.extract_strided_slice %131 {offsets = [0, 32], sizes = [2, 32], strides = [1, 1]} : vector<2x256xf32> to vector<2x32xf32>
    %133 = arith.mulf %132, %107 : vector<2x32xf32>
    %134 = vector.extract_strided_slice %131 {offsets = [0, 0], sizes = [2, 32], strides = [1, 1]} : vector<2x256xf32> to vector<2x32xf32>
    %135 = vector.extract_strided_slice %131 {offsets = [0, 64], sizes = [2, 32], strides = [1, 1]} : vector<2x256xf32> to vector<2x32xf32>
    %cst_32 = arith.constant 2.000000e+00 : f32
    %136 = vector.broadcast %cst_32 : f32 to vector<2x32xf32>
    %137 = arith.mulf %136, %135 : vector<2x32xf32>
    %cst_33 = arith.constant 1.000000e+00 : f32
    %138 = vector.broadcast %cst_33 : f32 to vector<2x32xf32>
    %139 = arith.subf %137, %138 : vector<2x32xf32>
    %140 = arith.mulf %134, %139 : vector<2x32xf32>
    %141 = arith.addf %133, %140 : vector<2x32xf32>
    %142 = vector.extract_strided_slice %131 {offsets = [0, 160], sizes = [2, 32], strides = [1, 1]} : vector<2x256xf32> to vector<2x32xf32>
    %143 = arith.mulf %142, %117 : vector<2x32xf32>
    %144 = vector.extract_strided_slice %131 {offsets = [0, 128], sizes = [2, 32], strides = [1, 1]} : vector<2x256xf32> to vector<2x32xf32>
    %145 = vector.extract_strided_slice %131 {offsets = [0, 192], sizes = [2, 32], strides = [1, 1]} : vector<2x256xf32> to vector<2x32xf32>
    %cst_34 = arith.constant 2.000000e+00 : f32
    %146 = vector.broadcast %cst_34 : f32 to vector<2x32xf32>
    %147 = arith.mulf %146, %145 : vector<2x32xf32>
    %cst_35 = arith.constant 1.000000e+00 : f32
    %148 = vector.broadcast %cst_35 : f32 to vector<2x32xf32>
    %149 = arith.subf %147, %148 : vector<2x32xf32>
    %150 = arith.mulf %144, %149 : vector<2x32xf32>
    %151 = arith.addf %143, %150 : vector<2x32xf32>
    %152 = tpu.concatenate %141, %151 in 1 : vector<2x32xf32>, vector<2x32xf32> -> vector<2x64xf32>
    %153 = math.tanh %152 : vector<2x64xf32>
    %154 = vector.extract_strided_slice %131 {offsets = [0, 96], sizes = [2, 32], strides = [1, 1]} : vector<2x256xf32> to vector<2x32xf32>
    %155 = vector.extract_strided_slice %131 {offsets = [0, 224], sizes = [2, 32], strides = [1, 1]} : vector<2x256xf32> to vector<2x32xf32>
    %156 = tpu.concatenate %154, %155 in 1 : vector<2x32xf32>, vector<2x32xf32> -> vector<2x64xf32>
    %157 = arith.mulf %156, %153 : vector<2x64xf32>
    %158 = vector.extract_strided_slice %18 {offsets = [8, 0], sizes = [2, 256], strides = [1, 1]} : vector<16x256xf32> to vector<2x256xf32>
    %cst_36 = arith.constant dense<0.000000e+00> : vector<2x256xf32>
    %159 = tpu.matmul %157, %3, %cst_36 {dimension_numbers = #tpu.dot_dimension_numbers<[1], [0], [0], [1], [0, 0, 1, 1], [], []>} : vector<2x64xf32>, vector<64x256xf32>, vector<2x256xf32> -> vector<2x256xf32>
    %160 = arith.addf %158, %159 : vector<2x256xf32>
    %161 = arith.negf %160 : vector<2x256xf32>
    %162 = math.exp %161 : vector<2x256xf32>
    %cst_37 = arith.constant 1.000000e+00 : f32
    %163 = vector.broadcast %cst_37 : f32 to vector<2x256xf32>
    %164 = arith.addf %163, %162 : vector<2x256xf32>
    %165 = arith.divf %163, %164 : vector<2x256xf32>
    %166 = vector.extract_strided_slice %165 {offsets = [0, 32], sizes = [2, 32], strides = [1, 1]} : vector<2x256xf32> to vector<2x32xf32>
    %167 = arith.mulf %166, %141 : vector<2x32xf32>
    %168 = vector.extract_strided_slice %165 {offsets = [0, 0], sizes = [2, 32], strides = [1, 1]} : vector<2x256xf32> to vector<2x32xf32>
    %169 = vector.extract_strided_slice %165 {offsets = [0, 64], sizes = [2, 32], strides = [1, 1]} : vector<2x256xf32> to vector<2x32xf32>
    %cst_38 = arith.constant 2.000000e+00 : f32
    %170 = vector.broadcast %cst_38 : f32 to vector<2x32xf32>
    %171 = arith.mulf %170, %169 : vector<2x32xf32>
    %cst_39 = arith.constant 1.000000e+00 : f32
    %172 = vector.broadcast %cst_39 : f32 to vector<2x32xf32>
    %173 = arith.subf %171, %172 : vector<2x32xf32>
    %174 = arith.mulf %168, %173 : vector<2x32xf32>
    %175 = arith.addf %167, %174 : vector<2x32xf32>
    %176 = vector.extract_strided_slice %165 {offsets = [0, 160], sizes = [2, 32], strides = [1, 1]} : vector<2x256xf32> to vector<2x32xf32>
    %177 = arith.mulf %176, %151 : vector<2x32xf32>
    %178 = vector.extract_strided_slice %165 {offsets = [0, 128], sizes = [2, 32], strides = [1, 1]} : vector<2x256xf32> to vector<2x32xf32>
    %179 = vector.extract_strided_slice %165 {offsets = [0, 192], sizes = [2, 32], strides = [1, 1]} : vector<2x256xf32> to vector<2x32xf32>
    %cst_40 = arith.constant 2.000000e+00 : f32
    %180 = vector.broadcast %cst_40 : f32 to vector<2x32xf32>
    %181 = arith.mulf %180, %179 : vector<2x32xf32>
    %cst_41 = arith.constant 1.000000e+00 : f32
    %182 = vector.broadcast %cst_41 : f32 to vector<2x32xf32>
    %183 = arith.subf %181, %182 : vector<2x32xf32>
    %184 = arith.mulf %178, %183 : vector<2x32xf32>
    %185 = arith.addf %177, %184 : vector<2x32xf32>
    %186 = tpu.concatenate %175, %185 in 1 : vector<2x32xf32>, vector<2x32xf32> -> vector<2x64xf32>
    %187 = math.tanh %186 : vector<2x64xf32>
    %188 = vector.extract_strided_slice %165 {offsets = [0, 96], sizes = [2, 32], strides = [1, 1]} : vector<2x256xf32> to vector<2x32xf32>
    %189 = vector.extract_strided_slice %165 {offsets = [0, 224], sizes = [2, 32], strides = [1, 1]} : vector<2x256xf32> to vector<2x32xf32>
    %190 = tpu.concatenate %188, %189 in 1 : vector<2x32xf32>, vector<2x32xf32> -> vector<2x64xf32>
    %191 = arith.mulf %190, %187 : vector<2x64xf32>
    %192 = vector.extract_strided_slice %18 {offsets = [10, 0], sizes = [2, 256], strides = [1, 1]} : vector<16x256xf32> to vector<2x256xf32>
    %cst_42 = arith.constant dense<0.000000e+00> : vector<2x256xf32>
    %193 = tpu.matmul %191, %3, %cst_42 {dimension_numbers = #tpu.dot_dimension_numbers<[1], [0], [0], [1], [0, 0, 1, 1], [], []>} : vector<2x64xf32>, vector<64x256xf32>, vector<2x256xf32> -> vector<2x256xf32>
    %194 = arith.addf %192, %193 : vector<2x256xf32>
    %195 = arith.negf %194 : vector<2x256xf32>
    %196 = math.exp %195 : vector<2x256xf32>
    %cst_43 = arith.constant 1.000000e+00 : f32
    %197 = vector.broadcast %cst_43 : f32 to vector<2x256xf32>
    %198 = arith.addf %197, %196 : vector<2x256xf32>
    %199 = arith.divf %197, %198 : vector<2x256xf32>
    %200 = vector.extract_strided_slice %199 {offsets = [0, 32], sizes = [2, 32], strides = [1, 1]} : vector<2x256xf32> to vector<2x32xf32>
    %201 = arith.mulf %200, %175 : vector<2x32xf32>
    %202 = vector.extract_strided_slice %199 {offsets = [0, 0], sizes = [2, 32], strides = [1, 1]} : vector<2x256xf32> to vector<2x32xf32>
    %203 = vector.extract_strided_slice %199 {offsets = [0, 64], sizes = [2, 32], strides = [1, 1]} : vector<2x256xf32> to vector<2x32xf32>
    %cst_44 = arith.constant 2.000000e+00 : f32
    %204 = vector.broadcast %cst_44 : f32 to vector<2x32xf32>
    %205 = arith.mulf %204, %203 : vector<2x32xf32>
    %cst_45 = arith.constant 1.000000e+00 : f32
    %206 = vector.broadcast %cst_45 : f32 to vector<2x32xf32>
    %207 = arith.subf %205, %206 : vector<2x32xf32>
    %208 = arith.mulf %202, %207 : vector<2x32xf32>
    %209 = arith.addf %201, %208 : vector<2x32xf32>
    %210 = vector.extract_strided_slice %199 {offsets = [0, 160], sizes = [2, 32], strides = [1, 1]} : vector<2x256xf32> to vector<2x32xf32>
    %211 = arith.mulf %210, %185 : vector<2x32xf32>
    %212 = vector.extract_strided_slice %199 {offsets = [0, 128], sizes = [2, 32], strides = [1, 1]} : vector<2x256xf32> to vector<2x32xf32>
    %213 = vector.extract_strided_slice %199 {offsets = [0, 192], sizes = [2, 32], strides = [1, 1]} : vector<2x256xf32> to vector<2x32xf32>
    %cst_46 = arith.constant 2.000000e+00 : f32
    %214 = vector.broadcast %cst_46 : f32 to vector<2x32xf32>
    %215 = arith.mulf %214, %213 : vector<2x32xf32>
    %cst_47 = arith.constant 1.000000e+00 : f32
    %216 = vector.broadcast %cst_47 : f32 to vector<2x32xf32>
    %217 = arith.subf %215, %216 : vector<2x32xf32>
    %218 = arith.mulf %212, %217 : vector<2x32xf32>
    %219 = arith.addf %211, %218 : vector<2x32xf32>
    %220 = tpu.concatenate %209, %219 in 1 : vector<2x32xf32>, vector<2x32xf32> -> vector<2x64xf32>
    %221 = math.tanh %220 : vector<2x64xf32>
    %222 = vector.extract_strided_slice %199 {offsets = [0, 96], sizes = [2, 32], strides = [1, 1]} : vector<2x256xf32> to vector<2x32xf32>
    %223 = vector.extract_strided_slice %199 {offsets = [0, 224], sizes = [2, 32], strides = [1, 1]} : vector<2x256xf32> to vector<2x32xf32>
    %224 = tpu.concatenate %222, %223 in 1 : vector<2x32xf32>, vector<2x32xf32> -> vector<2x64xf32>
    %225 = arith.mulf %224, %221 : vector<2x64xf32>
    %226 = vector.extract_strided_slice %18 {offsets = [12, 0], sizes = [2, 256], strides = [1, 1]} : vector<16x256xf32> to vector<2x256xf32>
    %cst_48 = arith.constant dense<0.000000e+00> : vector<2x256xf32>
    %227 = tpu.matmul %225, %3, %cst_48 {dimension_numbers = #tpu.dot_dimension_numbers<[1], [0], [0], [1], [0, 0, 1, 1], [], []>} : vector<2x64xf32>, vector<64x256xf32>, vector<2x256xf32> -> vector<2x256xf32>
    %228 = arith.addf %226, %227 : vector<2x256xf32>
    %229 = arith.negf %228 : vector<2x256xf32>
    %230 = math.exp %229 : vector<2x256xf32>
    %cst_49 = arith.constant 1.000000e+00 : f32
    %231 = vector.broadcast %cst_49 : f32 to vector<2x256xf32>
    %232 = arith.addf %231, %230 : vector<2x256xf32>
    %233 = arith.divf %231, %232 : vector<2x256xf32>
    %234 = vector.extract_strided_slice %233 {offsets = [0, 32], sizes = [2, 32], strides = [1, 1]} : vector<2x256xf32> to vector<2x32xf32>
    %235 = arith.mulf %234, %209 : vector<2x32xf32>
    %236 = vector.extract_strided_slice %233 {offsets = [0, 0], sizes = [2, 32], strides = [1, 1]} : vector<2x256xf32> to vector<2x32xf32>
    %237 = vector.extract_strided_slice %233 {offsets = [0, 64], sizes = [2, 32], strides = [1, 1]} : vector<2x256xf32> to vector<2x32xf32>
    %cst_50 = arith.constant 2.000000e+00 : f32
    %238 = vector.broadcast %cst_50 : f32 to vector<2x32xf32>
    %239 = arith.mulf %238, %237 : vector<2x32xf32>
    %cst_51 = arith.constant 1.000000e+00 : f32
    %240 = vector.broadcast %cst_51 : f32 to vector<2x32xf32>
    %241 = arith.subf %239, %240 : vector<2x32xf32>
    %242 = arith.mulf %236, %241 : vector<2x32xf32>
    %243 = arith.addf %235, %242 : vector<2x32xf32>
    %244 = vector.extract_strided_slice %233 {offsets = [0, 160], sizes = [2, 32], strides = [1, 1]} : vector<2x256xf32> to vector<2x32xf32>
    %245 = arith.mulf %244, %219 : vector<2x32xf32>
    %246 = vector.extract_strided_slice %233 {offsets = [0, 128], sizes = [2, 32], strides = [1, 1]} : vector<2x256xf32> to vector<2x32xf32>
    %247 = vector.extract_strided_slice %233 {offsets = [0, 192], sizes = [2, 32], strides = [1, 1]} : vector<2x256xf32> to vector<2x32xf32>
    %cst_52 = arith.constant 2.000000e+00 : f32
    %248 = vector.broadcast %cst_52 : f32 to vector<2x32xf32>
    %249 = arith.mulf %248, %247 : vector<2x32xf32>
    %cst_53 = arith.constant 1.000000e+00 : f32
    %250 = vector.broadcast %cst_53 : f32 to vector<2x32xf32>
    %251 = arith.subf %249, %250 : vector<2x32xf32>
    %252 = arith.mulf %246, %251 : vector<2x32xf32>
    %253 = arith.addf %245, %252 : vector<2x32xf32>
    %254 = tpu.concatenate %243, %253 in 1 : vector<2x32xf32>, vector<2x32xf32> -> vector<2x64xf32>
    %255 = math.tanh %254 : vector<2x64xf32>
    %256 = vector.extract_strided_slice %233 {offsets = [0, 96], sizes = [2, 32], strides = [1, 1]} : vector<2x256xf32> to vector<2x32xf32>
    %257 = vector.extract_strided_slice %233 {offsets = [0, 224], sizes = [2, 32], strides = [1, 1]} : vector<2x256xf32> to vector<2x32xf32>
    %258 = tpu.concatenate %256, %257 in 1 : vector<2x32xf32>, vector<2x32xf32> -> vector<2x64xf32>
    %259 = arith.mulf %258, %255 : vector<2x64xf32>
    %260 = vector.extract_strided_slice %18 {offsets = [14, 0], sizes = [2, 256], strides = [1, 1]} : vector<16x256xf32> to vector<2x256xf32>
    %cst_54 = arith.constant dense<0.000000e+00> : vector<2x256xf32>
    %261 = tpu.matmul %259, %3, %cst_54 {dimension_numbers = #tpu.dot_dimension_numbers<[1], [0], [0], [1], [0, 0, 1, 1], [], []>} : vector<2x64xf32>, vector<64x256xf32>, vector<2x256xf32> -> vector<2x256xf32>
    %262 = arith.addf %260, %261 : vector<2x256xf32>
    %263 = arith.negf %262 : vector<2x256xf32>
    %264 = math.exp %263 : vector<2x256xf32>
    %cst_55 = arith.constant 1.000000e+00 : f32
    %265 = vector.broadcast %cst_55 : f32 to vector<2x256xf32>
    %266 = arith.addf %265, %264 : vector<2x256xf32>
    %267 = arith.divf %265, %266 : vector<2x256xf32>
    %268 = vector.extract_strided_slice %267 {offsets = [0, 32], sizes = [2, 32], strides = [1, 1]} : vector<2x256xf32> to vector<2x32xf32>
    %269 = arith.mulf %268, %243 : vector<2x32xf32>
    %270 = vector.extract_strided_slice %267 {offsets = [0, 0], sizes = [2, 32], strides = [1, 1]} : vector<2x256xf32> to vector<2x32xf32>
    %271 = vector.extract_strided_slice %267 {offsets = [0, 64], sizes = [2, 32], strides = [1, 1]} : vector<2x256xf32> to vector<2x32xf32>
    %cst_56 = arith.constant 2.000000e+00 : f32
    %272 = vector.broadcast %cst_56 : f32 to vector<2x32xf32>
    %273 = arith.mulf %272, %271 : vector<2x32xf32>
    %cst_57 = arith.constant 1.000000e+00 : f32
    %274 = vector.broadcast %cst_57 : f32 to vector<2x32xf32>
    %275 = arith.subf %273, %274 : vector<2x32xf32>
    %276 = arith.mulf %270, %275 : vector<2x32xf32>
    %277 = arith.addf %269, %276 : vector<2x32xf32>
    %278 = vector.extract_strided_slice %267 {offsets = [0, 160], sizes = [2, 32], strides = [1, 1]} : vector<2x256xf32> to vector<2x32xf32>
    %279 = arith.mulf %278, %253 : vector<2x32xf32>
    %280 = vector.extract_strided_slice %267 {offsets = [0, 128], sizes = [2, 32], strides = [1, 1]} : vector<2x256xf32> to vector<2x32xf32>
    %281 = vector.extract_strided_slice %267 {offsets = [0, 192], sizes = [2, 32], strides = [1, 1]} : vector<2x256xf32> to vector<2x32xf32>
    %cst_58 = arith.constant 2.000000e+00 : f32
    %282 = vector.broadcast %cst_58 : f32 to vector<2x32xf32>
    %283 = arith.mulf %282, %281 : vector<2x32xf32>
    %cst_59 = arith.constant 1.000000e+00 : f32
    %284 = vector.broadcast %cst_59 : f32 to vector<2x32xf32>
    %285 = arith.subf %283, %284 : vector<2x32xf32>
    %286 = arith.mulf %280, %285 : vector<2x32xf32>
    %287 = arith.addf %279, %286 : vector<2x32xf32>
    %288 = tpu.concatenate %277, %287 in 1 : vector<2x32xf32>, vector<2x32xf32> -> vector<2x64xf32>
    %289 = math.tanh %288 : vector<2x64xf32>
    %290 = vector.extract_strided_slice %267 {offsets = [0, 96], sizes = [2, 32], strides = [1, 1]} : vector<2x256xf32> to vector<2x32xf32>
    %291 = vector.extract_strided_slice %267 {offsets = [0, 224], sizes = [2, 32], strides = [1, 1]} : vector<2x256xf32> to vector<2x32xf32>
    %292 = tpu.concatenate %290, %291 in 1 : vector<2x32xf32>, vector<2x32xf32> -> vector<2x64xf32>
    %293 = arith.mulf %292, %289 : vector<2x64xf32>
    %294 = vector.extract_strided_slice %55 {offsets = [0, 0], sizes = [2, 32], strides = [1, 1]} : vector<2x64xf32> to vector<2x32xf32>
    %295 = vector.extract_strided_slice %89 {offsets = [0, 0], sizes = [2, 32], strides = [1, 1]} : vector<2x64xf32> to vector<2x32xf32>
    %296 = vector.extract_strided_slice %123 {offsets = [0, 0], sizes = [2, 32], strides = [1, 1]} : vector<2x64xf32> to vector<2x32xf32>
    %297 = vector.extract_strided_slice %157 {offsets = [0, 0], sizes = [2, 32], strides = [1, 1]} : vector<2x64xf32> to vector<2x32xf32>
    %298 = vector.extract_strided_slice %191 {offsets = [0, 0], sizes = [2, 32], strides = [1, 1]} : vector<2x64xf32> to vector<2x32xf32>
    %299 = vector.extract_strided_slice %225 {offsets = [0, 0], sizes = [2, 32], strides = [1, 1]} : vector<2x64xf32> to vector<2x32xf32>
    %300 = vector.extract_strided_slice %259 {offsets = [0, 0], sizes = [2, 32], strides = [1, 1]} : vector<2x64xf32> to vector<2x32xf32>
    %301 = vector.extract_strided_slice %293 {offsets = [0, 0], sizes = [2, 32], strides = [1, 1]} : vector<2x64xf32> to vector<2x32xf32>
    %302 = tpu.concatenate %294, %295, %296, %297, %298, %299, %300, %301 in 0 : vector<2x32xf32>, vector<2x32xf32>, vector<2x32xf32>, vector<2x32xf32>, vector<2x32xf32>, vector<2x32xf32>, vector<2x32xf32>, vector<2x32xf32> -> vector<16x32xf32>
    %303 = vector.extract_strided_slice %293 {offsets = [0, 32], sizes = [2, 32], strides = [1, 1]} : vector<2x64xf32> to vector<2x32xf32>
    %304 = vector.extract_strided_slice %259 {offsets = [0, 32], sizes = [2, 32], strides = [1, 1]} : vector<2x64xf32> to vector<2x32xf32>
    %305 = vector.extract_strided_slice %225 {offsets = [0, 32], sizes = [2, 32], strides = [1, 1]} : vector<2x64xf32> to vector<2x32xf32>
    %306 = vector.extract_strided_slice %191 {offsets = [0, 32], sizes = [2, 32], strides = [1, 1]} : vector<2x64xf32> to vector<2x32xf32>
    %307 = vector.extract_strided_slice %157 {offsets = [0, 32], sizes = [2, 32], strides = [1, 1]} : vector<2x64xf32> to vector<2x32xf32>
    %308 = vector.extract_strided_slice %123 {offsets = [0, 32], sizes = [2, 32], strides = [1, 1]} : vector<2x64xf32> to vector<2x32xf32>
    %309 = vector.extract_strided_slice %89 {offsets = [0, 32], sizes = [2, 32], strides = [1, 1]} : vector<2x64xf32> to vector<2x32xf32>
    %310 = vector.extract_strided_slice %55 {offsets = [0, 32], sizes = [2, 32], strides = [1, 1]} : vector<2x64xf32> to vector<2x32xf32>
    %311 = tpu.concatenate %303, %304, %305, %306, %307, %308, %309, %310 in 0 : vector<2x32xf32>, vector<2x32xf32>, vector<2x32xf32>, vector<2x32xf32>, vector<2x32xf32>, vector<2x32xf32>, vector<2x32xf32>, vector<2x32xf32> -> vector<16x32xf32>
    %312 = tpu.concatenate %302, %311 in 1 : vector<16x32xf32>, vector<16x32xf32> -> vector<16x64xf32>
    %c0_60 = arith.constant 0 : index
    %c0_61 = arith.constant 0 : index
    %313 = vector.load %arg5[%c0_60, %c0_61] : memref<64x256xf32, #tpu.memory_space<vmem>>, vector<64x256xf32>
    %c0_62 = arith.constant 0 : index
    %c0_63 = arith.constant 0 : index
    %314 = vector.load %arg6[%c0_62, %c0_63] : memref<64x256xf32, #tpu.memory_space<vmem>>, vector<64x256xf32>
    %c0_64 = arith.constant 0 : index
    %c0_65 = arith.constant 0 : index
    %315 = vector.load %arg7[%c0_64, %c0_65] : memref<1x256xf32, #tpu.memory_space<vmem>>, vector<1x256xf32>
    %cst_66 = arith.constant dense<0.000000e+00> : vector<16x256xf32>
    %316 = tpu.matmul %312, %313, %cst_66 {dimension_numbers = #tpu.dot_dimension_numbers<[1], [0], [0], [1], [0, 0, 1, 1], [], []>} : vector<16x64xf32>, vector<64x256xf32>, vector<16x256xf32> -> vector<16x256xf32>
    %317 = vector.broadcast %315 : vector<1x256xf32> to vector<16x256xf32>
    %318 = arith.addf %316, %317 : vector<16x256xf32>
    %319 = vector.extract_strided_slice %318 {offsets = [14, 128], sizes = [2, 128], strides = [1, 1]} : vector<16x256xf32> to vector<2x128xf32>
    %320 = vector.extract_strided_slice %318 {offsets = [12, 128], sizes = [2, 128], strides = [1, 1]} : vector<16x256xf32> to vector<2x128xf32>
    %321 = vector.extract_strided_slice %318 {offsets = [10, 128], sizes = [2, 128], strides = [1, 1]} : vector<16x256xf32> to vector<2x128xf32>
    %322 = vector.extract_strided_slice %318 {offsets = [8, 128], sizes = [2, 128], strides = [1, 1]} : vector<16x256xf32> to vector<2x128xf32>
    %323 = vector.extract_strided_slice %318 {offsets = [6, 128], sizes = [2, 128], strides = [1, 1]} : vector<16x256xf32> to vector<2x128xf32>
    %324 = vector.extract_strided_slice %318 {offsets = [4, 128], sizes = [2, 128], strides = [1, 1]} : vector<16x256xf32> to vector<2x128xf32>
    %325 = vector.extract_strided_slice %318 {offsets = [2, 128], sizes = [2, 128], strides = [1, 1]} : vector<16x256xf32> to vector<2x128xf32>
    %326 = vector.extract_strided_slice %318 {offsets = [0, 128], sizes = [2, 128], strides = [1, 1]} : vector<16x256xf32> to vector<2x128xf32>
    %327 = tpu.concatenate %319, %320, %321, %322, %323, %324, %325, %326 in 0 : vector<2x128xf32>, vector<2x128xf32>, vector<2x128xf32>, vector<2x128xf32>, vector<2x128xf32>, vector<2x128xf32>, vector<2x128xf32>, vector<2x128xf32> -> vector<16x128xf32>
    %328 = vector.extract_strided_slice %318 {offsets = [0, 0], sizes = [16, 128], strides = [1, 1]} : vector<16x256xf32> to vector<16x128xf32>
    %329 = tpu.concatenate %328, %327 in 1 : vector<16x128xf32>, vector<16x128xf32> -> vector<16x256xf32>
    %cst_67 = arith.constant 0.000000e+00 : f32
    %330 = vector.broadcast %cst_67 : f32 to vector<2x64xf32>
    %cst_68 = arith.constant 0.000000e+00 : f32
    %331 = vector.broadcast %cst_68 : f32 to vector<2x32xf32>
    %cst_69 = arith.constant 0.000000e+00 : f32
    %332 = vector.broadcast %cst_69 : f32 to vector<2x32xf32>
    %cst_70 = arith.constant 0.000000e+00 : f32
    %333 = vector.broadcast %cst_70 : f32 to vector<2x32xf32>
    %cst_71 = arith.constant 0.000000e+00 : f32
    %334 = vector.broadcast %cst_71 : f32 to vector<2x32xf32>
    %335 = vector.extract_strided_slice %329 {offsets = [0, 0], sizes = [2, 256], strides = [1, 1]} : vector<16x256xf32> to vector<2x256xf32>
    %cst_72 = arith.constant dense<0.000000e+00> : vector<2x256xf32>
    %336 = tpu.matmul %330, %314, %cst_72 {dimension_numbers = #tpu.dot_dimension_numbers<[1], [0], [0], [1], [0, 0, 1, 1], [], []>} : vector<2x64xf32>, vector<64x256xf32>, vector<2x256xf32> -> vector<2x256xf32>
    %337 = arith.addf %335, %336 : vector<2x256xf32>
    %338 = arith.negf %337 : vector<2x256xf32>
    %339 = math.exp %338 : vector<2x256xf32>
    %cst_73 = arith.constant 1.000000e+00 : f32
    %340 = vector.broadcast %cst_73 : f32 to vector<2x256xf32>
    %341 = arith.addf %340, %339 : vector<2x256xf32>
    %342 = arith.divf %340, %341 : vector<2x256xf32>
    %343 = vector.extract_strided_slice %342 {offsets = [0, 32], sizes = [2, 32], strides = [1, 1]} : vector<2x256xf32> to vector<2x32xf32>
    %344 = arith.mulf %343, %331 : vector<2x32xf32>
    %345 = vector.extract_strided_slice %342 {offsets = [0, 0], sizes = [2, 32], strides = [1, 1]} : vector<2x256xf32> to vector<2x32xf32>
    %346 = vector.extract_strided_slice %342 {offsets = [0, 64], sizes = [2, 32], strides = [1, 1]} : vector<2x256xf32> to vector<2x32xf32>
    %cst_74 = arith.constant 2.000000e+00 : f32
    %347 = vector.broadcast %cst_74 : f32 to vector<2x32xf32>
    %348 = arith.mulf %347, %346 : vector<2x32xf32>
    %cst_75 = arith.constant 1.000000e+00 : f32
    %349 = vector.broadcast %cst_75 : f32 to vector<2x32xf32>
    %350 = arith.subf %348, %349 : vector<2x32xf32>
    %351 = arith.mulf %345, %350 : vector<2x32xf32>
    %352 = arith.addf %344, %351 : vector<2x32xf32>
    %353 = vector.extract_strided_slice %342 {offsets = [0, 160], sizes = [2, 32], strides = [1, 1]} : vector<2x256xf32> to vector<2x32xf32>
    %354 = arith.mulf %353, %332 : vector<2x32xf32>
    %355 = vector.extract_strided_slice %342 {offsets = [0, 128], sizes = [2, 32], strides = [1, 1]} : vector<2x256xf32> to vector<2x32xf32>
    %356 = vector.extract_strided_slice %342 {offsets = [0, 192], sizes = [2, 32], strides = [1, 1]} : vector<2x256xf32> to vector<2x32xf32>
    %cst_76 = arith.constant 2.000000e+00 : f32
    %357 = vector.broadcast %cst_76 : f32 to vector<2x32xf32>
    %358 = arith.mulf %357, %356 : vector<2x32xf32>
    %cst_77 = arith.constant 1.000000e+00 : f32
    %359 = vector.broadcast %cst_77 : f32 to vector<2x32xf32>
    %360 = arith.subf %358, %359 : vector<2x32xf32>
    %361 = arith.mulf %355, %360 : vector<2x32xf32>
    %362 = arith.addf %354, %361 : vector<2x32xf32>
    %363 = tpu.concatenate %352, %362 in 1 : vector<2x32xf32>, vector<2x32xf32> -> vector<2x64xf32>
    %364 = math.tanh %363 : vector<2x64xf32>
    %365 = vector.extract_strided_slice %342 {offsets = [0, 96], sizes = [2, 32], strides = [1, 1]} : vector<2x256xf32> to vector<2x32xf32>
    %366 = vector.extract_strided_slice %342 {offsets = [0, 224], sizes = [2, 32], strides = [1, 1]} : vector<2x256xf32> to vector<2x32xf32>
    %367 = tpu.concatenate %365, %366 in 1 : vector<2x32xf32>, vector<2x32xf32> -> vector<2x64xf32>
    %368 = arith.mulf %367, %364 : vector<2x64xf32>
    %369 = vector.extract_strided_slice %0 {offsets = [0, 0], sizes = [2, 1], strides = [1, 1]} : vector<16x1xf32> to vector<2x1xf32>
    %370 = vector.extract_strided_slice %368 {offsets = [0, 0], sizes = [2, 32], strides = [1, 1]} : vector<2x64xf32> to vector<2x32xf32>
    %371 = vector.broadcast %369 : vector<2x1xf32> to vector<2x32xf32>
    %372 = arith.mulf %371, %370 : vector<2x32xf32>
    %373 = arith.addf %333, %372 : vector<2x32xf32>
    %374 = vector.extract_strided_slice %0 {offsets = [14, 0], sizes = [2, 1], strides = [1, 1]} : vector<16x1xf32> to vector<2x1xf32>
    %375 = vector.extract_strided_slice %368 {offsets = [0, 32], sizes = [2, 32], strides = [1, 1]} : vector<2x64xf32> to vector<2x32xf32>
    %376 = vector.broadcast %374 : vector<2x1xf32> to vector<2x32xf32>
    %377 = arith.mulf %376, %375 : vector<2x32xf32>
    %378 = arith.addf %334, %377 : vector<2x32xf32>
    %379 = vector.extract_strided_slice %329 {offsets = [2, 0], sizes = [2, 256], strides = [1, 1]} : vector<16x256xf32> to vector<2x256xf32>
    %cst_78 = arith.constant dense<0.000000e+00> : vector<2x256xf32>
    %380 = tpu.matmul %368, %314, %cst_78 {dimension_numbers = #tpu.dot_dimension_numbers<[1], [0], [0], [1], [0, 0, 1, 1], [], []>} : vector<2x64xf32>, vector<64x256xf32>, vector<2x256xf32> -> vector<2x256xf32>
    %381 = arith.addf %379, %380 : vector<2x256xf32>
    %382 = arith.negf %381 : vector<2x256xf32>
    %383 = math.exp %382 : vector<2x256xf32>
    %cst_79 = arith.constant 1.000000e+00 : f32
    %384 = vector.broadcast %cst_79 : f32 to vector<2x256xf32>
    %385 = arith.addf %384, %383 : vector<2x256xf32>
    %386 = arith.divf %384, %385 : vector<2x256xf32>
    %387 = vector.extract_strided_slice %386 {offsets = [0, 32], sizes = [2, 32], strides = [1, 1]} : vector<2x256xf32> to vector<2x32xf32>
    %388 = arith.mulf %387, %352 : vector<2x32xf32>
    %389 = vector.extract_strided_slice %386 {offsets = [0, 0], sizes = [2, 32], strides = [1, 1]} : vector<2x256xf32> to vector<2x32xf32>
    %390 = vector.extract_strided_slice %386 {offsets = [0, 64], sizes = [2, 32], strides = [1, 1]} : vector<2x256xf32> to vector<2x32xf32>
    %cst_80 = arith.constant 2.000000e+00 : f32
    %391 = vector.broadcast %cst_80 : f32 to vector<2x32xf32>
    %392 = arith.mulf %391, %390 : vector<2x32xf32>
    %cst_81 = arith.constant 1.000000e+00 : f32
    %393 = vector.broadcast %cst_81 : f32 to vector<2x32xf32>
    %394 = arith.subf %392, %393 : vector<2x32xf32>
    %395 = arith.mulf %389, %394 : vector<2x32xf32>
    %396 = arith.addf %388, %395 : vector<2x32xf32>
    %397 = vector.extract_strided_slice %386 {offsets = [0, 160], sizes = [2, 32], strides = [1, 1]} : vector<2x256xf32> to vector<2x32xf32>
    %398 = arith.mulf %397, %362 : vector<2x32xf32>
    %399 = vector.extract_strided_slice %386 {offsets = [0, 128], sizes = [2, 32], strides = [1, 1]} : vector<2x256xf32> to vector<2x32xf32>
    %400 = vector.extract_strided_slice %386 {offsets = [0, 192], sizes = [2, 32], strides = [1, 1]} : vector<2x256xf32> to vector<2x32xf32>
    %cst_82 = arith.constant 2.000000e+00 : f32
    %401 = vector.broadcast %cst_82 : f32 to vector<2x32xf32>
    %402 = arith.mulf %401, %400 : vector<2x32xf32>
    %cst_83 = arith.constant 1.000000e+00 : f32
    %403 = vector.broadcast %cst_83 : f32 to vector<2x32xf32>
    %404 = arith.subf %402, %403 : vector<2x32xf32>
    %405 = arith.mulf %399, %404 : vector<2x32xf32>
    %406 = arith.addf %398, %405 : vector<2x32xf32>
    %407 = tpu.concatenate %396, %406 in 1 : vector<2x32xf32>, vector<2x32xf32> -> vector<2x64xf32>
    %408 = math.tanh %407 : vector<2x64xf32>
    %409 = vector.extract_strided_slice %386 {offsets = [0, 96], sizes = [2, 32], strides = [1, 1]} : vector<2x256xf32> to vector<2x32xf32>
    %410 = vector.extract_strided_slice %386 {offsets = [0, 224], sizes = [2, 32], strides = [1, 1]} : vector<2x256xf32> to vector<2x32xf32>
    %411 = tpu.concatenate %409, %410 in 1 : vector<2x32xf32>, vector<2x32xf32> -> vector<2x64xf32>
    %412 = arith.mulf %411, %408 : vector<2x64xf32>
    %413 = vector.extract_strided_slice %0 {offsets = [2, 0], sizes = [2, 1], strides = [1, 1]} : vector<16x1xf32> to vector<2x1xf32>
    %414 = vector.extract_strided_slice %412 {offsets = [0, 0], sizes = [2, 32], strides = [1, 1]} : vector<2x64xf32> to vector<2x32xf32>
    %415 = vector.broadcast %413 : vector<2x1xf32> to vector<2x32xf32>
    %416 = arith.mulf %415, %414 : vector<2x32xf32>
    %417 = arith.addf %373, %416 : vector<2x32xf32>
    %418 = vector.extract_strided_slice %0 {offsets = [12, 0], sizes = [2, 1], strides = [1, 1]} : vector<16x1xf32> to vector<2x1xf32>
    %419 = vector.extract_strided_slice %412 {offsets = [0, 32], sizes = [2, 32], strides = [1, 1]} : vector<2x64xf32> to vector<2x32xf32>
    %420 = vector.broadcast %418 : vector<2x1xf32> to vector<2x32xf32>
    %421 = arith.mulf %420, %419 : vector<2x32xf32>
    %422 = arith.addf %378, %421 : vector<2x32xf32>
    %423 = vector.extract_strided_slice %329 {offsets = [4, 0], sizes = [2, 256], strides = [1, 1]} : vector<16x256xf32> to vector<2x256xf32>
    %cst_84 = arith.constant dense<0.000000e+00> : vector<2x256xf32>
    %424 = tpu.matmul %412, %314, %cst_84 {dimension_numbers = #tpu.dot_dimension_numbers<[1], [0], [0], [1], [0, 0, 1, 1], [], []>} : vector<2x64xf32>, vector<64x256xf32>, vector<2x256xf32> -> vector<2x256xf32>
    %425 = arith.addf %423, %424 : vector<2x256xf32>
    %426 = arith.negf %425 : vector<2x256xf32>
    %427 = math.exp %426 : vector<2x256xf32>
    %cst_85 = arith.constant 1.000000e+00 : f32
    %428 = vector.broadcast %cst_85 : f32 to vector<2x256xf32>
    %429 = arith.addf %428, %427 : vector<2x256xf32>
    %430 = arith.divf %428, %429 : vector<2x256xf32>
    %431 = vector.extract_strided_slice %430 {offsets = [0, 32], sizes = [2, 32], strides = [1, 1]} : vector<2x256xf32> to vector<2x32xf32>
    %432 = arith.mulf %431, %396 : vector<2x32xf32>
    %433 = vector.extract_strided_slice %430 {offsets = [0, 0], sizes = [2, 32], strides = [1, 1]} : vector<2x256xf32> to vector<2x32xf32>
    %434 = vector.extract_strided_slice %430 {offsets = [0, 64], sizes = [2, 32], strides = [1, 1]} : vector<2x256xf32> to vector<2x32xf32>
    %cst_86 = arith.constant 2.000000e+00 : f32
    %435 = vector.broadcast %cst_86 : f32 to vector<2x32xf32>
    %436 = arith.mulf %435, %434 : vector<2x32xf32>
    %cst_87 = arith.constant 1.000000e+00 : f32
    %437 = vector.broadcast %cst_87 : f32 to vector<2x32xf32>
    %438 = arith.subf %436, %437 : vector<2x32xf32>
    %439 = arith.mulf %433, %438 : vector<2x32xf32>
    %440 = arith.addf %432, %439 : vector<2x32xf32>
    %441 = vector.extract_strided_slice %430 {offsets = [0, 160], sizes = [2, 32], strides = [1, 1]} : vector<2x256xf32> to vector<2x32xf32>
    %442 = arith.mulf %441, %406 : vector<2x32xf32>
    %443 = vector.extract_strided_slice %430 {offsets = [0, 128], sizes = [2, 32], strides = [1, 1]} : vector<2x256xf32> to vector<2x32xf32>
    %444 = vector.extract_strided_slice %430 {offsets = [0, 192], sizes = [2, 32], strides = [1, 1]} : vector<2x256xf32> to vector<2x32xf32>
    %cst_88 = arith.constant 2.000000e+00 : f32
    %445 = vector.broadcast %cst_88 : f32 to vector<2x32xf32>
    %446 = arith.mulf %445, %444 : vector<2x32xf32>
    %cst_89 = arith.constant 1.000000e+00 : f32
    %447 = vector.broadcast %cst_89 : f32 to vector<2x32xf32>
    %448 = arith.subf %446, %447 : vector<2x32xf32>
    %449 = arith.mulf %443, %448 : vector<2x32xf32>
    %450 = arith.addf %442, %449 : vector<2x32xf32>
    %451 = tpu.concatenate %440, %450 in 1 : vector<2x32xf32>, vector<2x32xf32> -> vector<2x64xf32>
    %452 = math.tanh %451 : vector<2x64xf32>
    %453 = vector.extract_strided_slice %430 {offsets = [0, 96], sizes = [2, 32], strides = [1, 1]} : vector<2x256xf32> to vector<2x32xf32>
    %454 = vector.extract_strided_slice %430 {offsets = [0, 224], sizes = [2, 32], strides = [1, 1]} : vector<2x256xf32> to vector<2x32xf32>
    %455 = tpu.concatenate %453, %454 in 1 : vector<2x32xf32>, vector<2x32xf32> -> vector<2x64xf32>
    %456 = arith.mulf %455, %452 : vector<2x64xf32>
    %457 = vector.extract_strided_slice %0 {offsets = [4, 0], sizes = [2, 1], strides = [1, 1]} : vector<16x1xf32> to vector<2x1xf32>
    %458 = vector.extract_strided_slice %456 {offsets = [0, 0], sizes = [2, 32], strides = [1, 1]} : vector<2x64xf32> to vector<2x32xf32>
    %459 = vector.broadcast %457 : vector<2x1xf32> to vector<2x32xf32>
    %460 = arith.mulf %459, %458 : vector<2x32xf32>
    %461 = arith.addf %417, %460 : vector<2x32xf32>
    %462 = vector.extract_strided_slice %0 {offsets = [10, 0], sizes = [2, 1], strides = [1, 1]} : vector<16x1xf32> to vector<2x1xf32>
    %463 = vector.extract_strided_slice %456 {offsets = [0, 32], sizes = [2, 32], strides = [1, 1]} : vector<2x64xf32> to vector<2x32xf32>
    %464 = vector.broadcast %462 : vector<2x1xf32> to vector<2x32xf32>
    %465 = arith.mulf %464, %463 : vector<2x32xf32>
    %466 = arith.addf %422, %465 : vector<2x32xf32>
    %467 = vector.extract_strided_slice %329 {offsets = [6, 0], sizes = [2, 256], strides = [1, 1]} : vector<16x256xf32> to vector<2x256xf32>
    %cst_90 = arith.constant dense<0.000000e+00> : vector<2x256xf32>
    %468 = tpu.matmul %456, %314, %cst_90 {dimension_numbers = #tpu.dot_dimension_numbers<[1], [0], [0], [1], [0, 0, 1, 1], [], []>} : vector<2x64xf32>, vector<64x256xf32>, vector<2x256xf32> -> vector<2x256xf32>
    %469 = arith.addf %467, %468 : vector<2x256xf32>
    %470 = arith.negf %469 : vector<2x256xf32>
    %471 = math.exp %470 : vector<2x256xf32>
    %cst_91 = arith.constant 1.000000e+00 : f32
    %472 = vector.broadcast %cst_91 : f32 to vector<2x256xf32>
    %473 = arith.addf %472, %471 : vector<2x256xf32>
    %474 = arith.divf %472, %473 : vector<2x256xf32>
    %475 = vector.extract_strided_slice %474 {offsets = [0, 32], sizes = [2, 32], strides = [1, 1]} : vector<2x256xf32> to vector<2x32xf32>
    %476 = arith.mulf %475, %440 : vector<2x32xf32>
    %477 = vector.extract_strided_slice %474 {offsets = [0, 0], sizes = [2, 32], strides = [1, 1]} : vector<2x256xf32> to vector<2x32xf32>
    %478 = vector.extract_strided_slice %474 {offsets = [0, 64], sizes = [2, 32], strides = [1, 1]} : vector<2x256xf32> to vector<2x32xf32>
    %cst_92 = arith.constant 2.000000e+00 : f32
    %479 = vector.broadcast %cst_92 : f32 to vector<2x32xf32>
    %480 = arith.mulf %479, %478 : vector<2x32xf32>
    %cst_93 = arith.constant 1.000000e+00 : f32
    %481 = vector.broadcast %cst_93 : f32 to vector<2x32xf32>
    %482 = arith.subf %480, %481 : vector<2x32xf32>
    %483 = arith.mulf %477, %482 : vector<2x32xf32>
    %484 = arith.addf %476, %483 : vector<2x32xf32>
    %485 = vector.extract_strided_slice %474 {offsets = [0, 160], sizes = [2, 32], strides = [1, 1]} : vector<2x256xf32> to vector<2x32xf32>
    %486 = arith.mulf %485, %450 : vector<2x32xf32>
    %487 = vector.extract_strided_slice %474 {offsets = [0, 128], sizes = [2, 32], strides = [1, 1]} : vector<2x256xf32> to vector<2x32xf32>
    %488 = vector.extract_strided_slice %474 {offsets = [0, 192], sizes = [2, 32], strides = [1, 1]} : vector<2x256xf32> to vector<2x32xf32>
    %cst_94 = arith.constant 2.000000e+00 : f32
    %489 = vector.broadcast %cst_94 : f32 to vector<2x32xf32>
    %490 = arith.mulf %489, %488 : vector<2x32xf32>
    %cst_95 = arith.constant 1.000000e+00 : f32
    %491 = vector.broadcast %cst_95 : f32 to vector<2x32xf32>
    %492 = arith.subf %490, %491 : vector<2x32xf32>
    %493 = arith.mulf %487, %492 : vector<2x32xf32>
    %494 = arith.addf %486, %493 : vector<2x32xf32>
    %495 = tpu.concatenate %484, %494 in 1 : vector<2x32xf32>, vector<2x32xf32> -> vector<2x64xf32>
    %496 = math.tanh %495 : vector<2x64xf32>
    %497 = vector.extract_strided_slice %474 {offsets = [0, 96], sizes = [2, 32], strides = [1, 1]} : vector<2x256xf32> to vector<2x32xf32>
    %498 = vector.extract_strided_slice %474 {offsets = [0, 224], sizes = [2, 32], strides = [1, 1]} : vector<2x256xf32> to vector<2x32xf32>
    %499 = tpu.concatenate %497, %498 in 1 : vector<2x32xf32>, vector<2x32xf32> -> vector<2x64xf32>
    %500 = arith.mulf %499, %496 : vector<2x64xf32>
    %501 = vector.extract_strided_slice %0 {offsets = [6, 0], sizes = [2, 1], strides = [1, 1]} : vector<16x1xf32> to vector<2x1xf32>
    %502 = vector.extract_strided_slice %500 {offsets = [0, 0], sizes = [2, 32], strides = [1, 1]} : vector<2x64xf32> to vector<2x32xf32>
    %503 = vector.broadcast %501 : vector<2x1xf32> to vector<2x32xf32>
    %504 = arith.mulf %503, %502 : vector<2x32xf32>
    %505 = arith.addf %461, %504 : vector<2x32xf32>
    %506 = vector.extract_strided_slice %0 {offsets = [8, 0], sizes = [2, 1], strides = [1, 1]} : vector<16x1xf32> to vector<2x1xf32>
    %507 = vector.extract_strided_slice %500 {offsets = [0, 32], sizes = [2, 32], strides = [1, 1]} : vector<2x64xf32> to vector<2x32xf32>
    %508 = vector.broadcast %506 : vector<2x1xf32> to vector<2x32xf32>
    %509 = arith.mulf %508, %507 : vector<2x32xf32>
    %510 = arith.addf %466, %509 : vector<2x32xf32>
    %511 = vector.extract_strided_slice %329 {offsets = [8, 0], sizes = [2, 256], strides = [1, 1]} : vector<16x256xf32> to vector<2x256xf32>
    %cst_96 = arith.constant dense<0.000000e+00> : vector<2x256xf32>
    %512 = tpu.matmul %500, %314, %cst_96 {dimension_numbers = #tpu.dot_dimension_numbers<[1], [0], [0], [1], [0, 0, 1, 1], [], []>} : vector<2x64xf32>, vector<64x256xf32>, vector<2x256xf32> -> vector<2x256xf32>
    %513 = arith.addf %511, %512 : vector<2x256xf32>
    %514 = arith.negf %513 : vector<2x256xf32>
    %515 = math.exp %514 : vector<2x256xf32>
    %cst_97 = arith.constant 1.000000e+00 : f32
    %516 = vector.broadcast %cst_97 : f32 to vector<2x256xf32>
    %517 = arith.addf %516, %515 : vector<2x256xf32>
    %518 = arith.divf %516, %517 : vector<2x256xf32>
    %519 = vector.extract_strided_slice %518 {offsets = [0, 32], sizes = [2, 32], strides = [1, 1]} : vector<2x256xf32> to vector<2x32xf32>
    %520 = arith.mulf %519, %484 : vector<2x32xf32>
    %521 = vector.extract_strided_slice %518 {offsets = [0, 0], sizes = [2, 32], strides = [1, 1]} : vector<2x256xf32> to vector<2x32xf32>
    %522 = vector.extract_strided_slice %518 {offsets = [0, 64], sizes = [2, 32], strides = [1, 1]} : vector<2x256xf32> to vector<2x32xf32>
    %cst_98 = arith.constant 2.000000e+00 : f32
    %523 = vector.broadcast %cst_98 : f32 to vector<2x32xf32>
    %524 = arith.mulf %523, %522 : vector<2x32xf32>
    %cst_99 = arith.constant 1.000000e+00 : f32
    %525 = vector.broadcast %cst_99 : f32 to vector<2x32xf32>
    %526 = arith.subf %524, %525 : vector<2x32xf32>
    %527 = arith.mulf %521, %526 : vector<2x32xf32>
    %528 = arith.addf %520, %527 : vector<2x32xf32>
    %529 = vector.extract_strided_slice %518 {offsets = [0, 160], sizes = [2, 32], strides = [1, 1]} : vector<2x256xf32> to vector<2x32xf32>
    %530 = arith.mulf %529, %494 : vector<2x32xf32>
    %531 = vector.extract_strided_slice %518 {offsets = [0, 128], sizes = [2, 32], strides = [1, 1]} : vector<2x256xf32> to vector<2x32xf32>
    %532 = vector.extract_strided_slice %518 {offsets = [0, 192], sizes = [2, 32], strides = [1, 1]} : vector<2x256xf32> to vector<2x32xf32>
    %cst_100 = arith.constant 2.000000e+00 : f32
    %533 = vector.broadcast %cst_100 : f32 to vector<2x32xf32>
    %534 = arith.mulf %533, %532 : vector<2x32xf32>
    %cst_101 = arith.constant 1.000000e+00 : f32
    %535 = vector.broadcast %cst_101 : f32 to vector<2x32xf32>
    %536 = arith.subf %534, %535 : vector<2x32xf32>
    %537 = arith.mulf %531, %536 : vector<2x32xf32>
    %538 = arith.addf %530, %537 : vector<2x32xf32>
    %539 = tpu.concatenate %528, %538 in 1 : vector<2x32xf32>, vector<2x32xf32> -> vector<2x64xf32>
    %540 = math.tanh %539 : vector<2x64xf32>
    %541 = vector.extract_strided_slice %518 {offsets = [0, 96], sizes = [2, 32], strides = [1, 1]} : vector<2x256xf32> to vector<2x32xf32>
    %542 = vector.extract_strided_slice %518 {offsets = [0, 224], sizes = [2, 32], strides = [1, 1]} : vector<2x256xf32> to vector<2x32xf32>
    %543 = tpu.concatenate %541, %542 in 1 : vector<2x32xf32>, vector<2x32xf32> -> vector<2x64xf32>
    %544 = arith.mulf %543, %540 : vector<2x64xf32>
    %545 = vector.extract_strided_slice %0 {offsets = [8, 0], sizes = [2, 1], strides = [1, 1]} : vector<16x1xf32> to vector<2x1xf32>
    %546 = vector.extract_strided_slice %544 {offsets = [0, 0], sizes = [2, 32], strides = [1, 1]} : vector<2x64xf32> to vector<2x32xf32>
    %547 = vector.broadcast %545 : vector<2x1xf32> to vector<2x32xf32>
    %548 = arith.mulf %547, %546 : vector<2x32xf32>
    %549 = arith.addf %505, %548 : vector<2x32xf32>
    %550 = vector.extract_strided_slice %0 {offsets = [6, 0], sizes = [2, 1], strides = [1, 1]} : vector<16x1xf32> to vector<2x1xf32>
    %551 = vector.extract_strided_slice %544 {offsets = [0, 32], sizes = [2, 32], strides = [1, 1]} : vector<2x64xf32> to vector<2x32xf32>
    %552 = vector.broadcast %550 : vector<2x1xf32> to vector<2x32xf32>
    %553 = arith.mulf %552, %551 : vector<2x32xf32>
    %554 = arith.addf %510, %553 : vector<2x32xf32>
    %555 = vector.extract_strided_slice %329 {offsets = [10, 0], sizes = [2, 256], strides = [1, 1]} : vector<16x256xf32> to vector<2x256xf32>
    %cst_102 = arith.constant dense<0.000000e+00> : vector<2x256xf32>
    %556 = tpu.matmul %544, %314, %cst_102 {dimension_numbers = #tpu.dot_dimension_numbers<[1], [0], [0], [1], [0, 0, 1, 1], [], []>} : vector<2x64xf32>, vector<64x256xf32>, vector<2x256xf32> -> vector<2x256xf32>
    %557 = arith.addf %555, %556 : vector<2x256xf32>
    %558 = arith.negf %557 : vector<2x256xf32>
    %559 = math.exp %558 : vector<2x256xf32>
    %cst_103 = arith.constant 1.000000e+00 : f32
    %560 = vector.broadcast %cst_103 : f32 to vector<2x256xf32>
    %561 = arith.addf %560, %559 : vector<2x256xf32>
    %562 = arith.divf %560, %561 : vector<2x256xf32>
    %563 = vector.extract_strided_slice %562 {offsets = [0, 32], sizes = [2, 32], strides = [1, 1]} : vector<2x256xf32> to vector<2x32xf32>
    %564 = arith.mulf %563, %528 : vector<2x32xf32>
    %565 = vector.extract_strided_slice %562 {offsets = [0, 0], sizes = [2, 32], strides = [1, 1]} : vector<2x256xf32> to vector<2x32xf32>
    %566 = vector.extract_strided_slice %562 {offsets = [0, 64], sizes = [2, 32], strides = [1, 1]} : vector<2x256xf32> to vector<2x32xf32>
    %cst_104 = arith.constant 2.000000e+00 : f32
    %567 = vector.broadcast %cst_104 : f32 to vector<2x32xf32>
    %568 = arith.mulf %567, %566 : vector<2x32xf32>
    %cst_105 = arith.constant 1.000000e+00 : f32
    %569 = vector.broadcast %cst_105 : f32 to vector<2x32xf32>
    %570 = arith.subf %568, %569 : vector<2x32xf32>
    %571 = arith.mulf %565, %570 : vector<2x32xf32>
    %572 = arith.addf %564, %571 : vector<2x32xf32>
    %573 = vector.extract_strided_slice %562 {offsets = [0, 160], sizes = [2, 32], strides = [1, 1]} : vector<2x256xf32> to vector<2x32xf32>
    %574 = arith.mulf %573, %538 : vector<2x32xf32>
    %575 = vector.extract_strided_slice %562 {offsets = [0, 128], sizes = [2, 32], strides = [1, 1]} : vector<2x256xf32> to vector<2x32xf32>
    %576 = vector.extract_strided_slice %562 {offsets = [0, 192], sizes = [2, 32], strides = [1, 1]} : vector<2x256xf32> to vector<2x32xf32>
    %cst_106 = arith.constant 2.000000e+00 : f32
    %577 = vector.broadcast %cst_106 : f32 to vector<2x32xf32>
    %578 = arith.mulf %577, %576 : vector<2x32xf32>
    %cst_107 = arith.constant 1.000000e+00 : f32
    %579 = vector.broadcast %cst_107 : f32 to vector<2x32xf32>
    %580 = arith.subf %578, %579 : vector<2x32xf32>
    %581 = arith.mulf %575, %580 : vector<2x32xf32>
    %582 = arith.addf %574, %581 : vector<2x32xf32>
    %583 = tpu.concatenate %572, %582 in 1 : vector<2x32xf32>, vector<2x32xf32> -> vector<2x64xf32>
    %584 = math.tanh %583 : vector<2x64xf32>
    %585 = vector.extract_strided_slice %562 {offsets = [0, 96], sizes = [2, 32], strides = [1, 1]} : vector<2x256xf32> to vector<2x32xf32>
    %586 = vector.extract_strided_slice %562 {offsets = [0, 224], sizes = [2, 32], strides = [1, 1]} : vector<2x256xf32> to vector<2x32xf32>
    %587 = tpu.concatenate %585, %586 in 1 : vector<2x32xf32>, vector<2x32xf32> -> vector<2x64xf32>
    %588 = arith.mulf %587, %584 : vector<2x64xf32>
    %589 = vector.extract_strided_slice %0 {offsets = [10, 0], sizes = [2, 1], strides = [1, 1]} : vector<16x1xf32> to vector<2x1xf32>
    %590 = vector.extract_strided_slice %588 {offsets = [0, 0], sizes = [2, 32], strides = [1, 1]} : vector<2x64xf32> to vector<2x32xf32>
    %591 = vector.broadcast %589 : vector<2x1xf32> to vector<2x32xf32>
    %592 = arith.mulf %591, %590 : vector<2x32xf32>
    %593 = arith.addf %549, %592 : vector<2x32xf32>
    %594 = vector.extract_strided_slice %0 {offsets = [4, 0], sizes = [2, 1], strides = [1, 1]} : vector<16x1xf32> to vector<2x1xf32>
    %595 = vector.extract_strided_slice %588 {offsets = [0, 32], sizes = [2, 32], strides = [1, 1]} : vector<2x64xf32> to vector<2x32xf32>
    %596 = vector.broadcast %594 : vector<2x1xf32> to vector<2x32xf32>
    %597 = arith.mulf %596, %595 : vector<2x32xf32>
    %598 = arith.addf %554, %597 : vector<2x32xf32>
    %599 = vector.extract_strided_slice %329 {offsets = [12, 0], sizes = [2, 256], strides = [1, 1]} : vector<16x256xf32> to vector<2x256xf32>
    %cst_108 = arith.constant dense<0.000000e+00> : vector<2x256xf32>
    %600 = tpu.matmul %588, %314, %cst_108 {dimension_numbers = #tpu.dot_dimension_numbers<[1], [0], [0], [1], [0, 0, 1, 1], [], []>} : vector<2x64xf32>, vector<64x256xf32>, vector<2x256xf32> -> vector<2x256xf32>
    %601 = arith.addf %599, %600 : vector<2x256xf32>
    %602 = arith.negf %601 : vector<2x256xf32>
    %603 = math.exp %602 : vector<2x256xf32>
    %cst_109 = arith.constant 1.000000e+00 : f32
    %604 = vector.broadcast %cst_109 : f32 to vector<2x256xf32>
    %605 = arith.addf %604, %603 : vector<2x256xf32>
    %606 = arith.divf %604, %605 : vector<2x256xf32>
    %607 = vector.extract_strided_slice %606 {offsets = [0, 32], sizes = [2, 32], strides = [1, 1]} : vector<2x256xf32> to vector<2x32xf32>
    %608 = arith.mulf %607, %572 : vector<2x32xf32>
    %609 = vector.extract_strided_slice %606 {offsets = [0, 0], sizes = [2, 32], strides = [1, 1]} : vector<2x256xf32> to vector<2x32xf32>
    %610 = vector.extract_strided_slice %606 {offsets = [0, 64], sizes = [2, 32], strides = [1, 1]} : vector<2x256xf32> to vector<2x32xf32>
    %cst_110 = arith.constant 2.000000e+00 : f32
    %611 = vector.broadcast %cst_110 : f32 to vector<2x32xf32>
    %612 = arith.mulf %611, %610 : vector<2x32xf32>
    %cst_111 = arith.constant 1.000000e+00 : f32
    %613 = vector.broadcast %cst_111 : f32 to vector<2x32xf32>
    %614 = arith.subf %612, %613 : vector<2x32xf32>
    %615 = arith.mulf %609, %614 : vector<2x32xf32>
    %616 = arith.addf %608, %615 : vector<2x32xf32>
    %617 = vector.extract_strided_slice %606 {offsets = [0, 160], sizes = [2, 32], strides = [1, 1]} : vector<2x256xf32> to vector<2x32xf32>
    %618 = arith.mulf %617, %582 : vector<2x32xf32>
    %619 = vector.extract_strided_slice %606 {offsets = [0, 128], sizes = [2, 32], strides = [1, 1]} : vector<2x256xf32> to vector<2x32xf32>
    %620 = vector.extract_strided_slice %606 {offsets = [0, 192], sizes = [2, 32], strides = [1, 1]} : vector<2x256xf32> to vector<2x32xf32>
    %cst_112 = arith.constant 2.000000e+00 : f32
    %621 = vector.broadcast %cst_112 : f32 to vector<2x32xf32>
    %622 = arith.mulf %621, %620 : vector<2x32xf32>
    %cst_113 = arith.constant 1.000000e+00 : f32
    %623 = vector.broadcast %cst_113 : f32 to vector<2x32xf32>
    %624 = arith.subf %622, %623 : vector<2x32xf32>
    %625 = arith.mulf %619, %624 : vector<2x32xf32>
    %626 = arith.addf %618, %625 : vector<2x32xf32>
    %627 = tpu.concatenate %616, %626 in 1 : vector<2x32xf32>, vector<2x32xf32> -> vector<2x64xf32>
    %628 = math.tanh %627 : vector<2x64xf32>
    %629 = vector.extract_strided_slice %606 {offsets = [0, 96], sizes = [2, 32], strides = [1, 1]} : vector<2x256xf32> to vector<2x32xf32>
    %630 = vector.extract_strided_slice %606 {offsets = [0, 224], sizes = [2, 32], strides = [1, 1]} : vector<2x256xf32> to vector<2x32xf32>
    %631 = tpu.concatenate %629, %630 in 1 : vector<2x32xf32>, vector<2x32xf32> -> vector<2x64xf32>
    %632 = arith.mulf %631, %628 : vector<2x64xf32>
    %633 = vector.extract_strided_slice %0 {offsets = [12, 0], sizes = [2, 1], strides = [1, 1]} : vector<16x1xf32> to vector<2x1xf32>
    %634 = vector.extract_strided_slice %632 {offsets = [0, 0], sizes = [2, 32], strides = [1, 1]} : vector<2x64xf32> to vector<2x32xf32>
    %635 = vector.broadcast %633 : vector<2x1xf32> to vector<2x32xf32>
    %636 = arith.mulf %635, %634 : vector<2x32xf32>
    %637 = arith.addf %593, %636 : vector<2x32xf32>
    %638 = vector.extract_strided_slice %0 {offsets = [2, 0], sizes = [2, 1], strides = [1, 1]} : vector<16x1xf32> to vector<2x1xf32>
    %639 = vector.extract_strided_slice %632 {offsets = [0, 32], sizes = [2, 32], strides = [1, 1]} : vector<2x64xf32> to vector<2x32xf32>
    %640 = vector.broadcast %638 : vector<2x1xf32> to vector<2x32xf32>
    %641 = arith.mulf %640, %639 : vector<2x32xf32>
    %642 = arith.addf %598, %641 : vector<2x32xf32>
    %643 = vector.extract_strided_slice %329 {offsets = [14, 0], sizes = [2, 256], strides = [1, 1]} : vector<16x256xf32> to vector<2x256xf32>
    %cst_114 = arith.constant dense<0.000000e+00> : vector<2x256xf32>
    %644 = tpu.matmul %632, %314, %cst_114 {dimension_numbers = #tpu.dot_dimension_numbers<[1], [0], [0], [1], [0, 0, 1, 1], [], []>} : vector<2x64xf32>, vector<64x256xf32>, vector<2x256xf32> -> vector<2x256xf32>
    %645 = arith.addf %643, %644 : vector<2x256xf32>
    %646 = arith.negf %645 : vector<2x256xf32>
    %647 = math.exp %646 : vector<2x256xf32>
    %cst_115 = arith.constant 1.000000e+00 : f32
    %648 = vector.broadcast %cst_115 : f32 to vector<2x256xf32>
    %649 = arith.addf %648, %647 : vector<2x256xf32>
    %650 = arith.divf %648, %649 : vector<2x256xf32>
    %651 = vector.extract_strided_slice %650 {offsets = [0, 32], sizes = [2, 32], strides = [1, 1]} : vector<2x256xf32> to vector<2x32xf32>
    %652 = arith.mulf %651, %616 : vector<2x32xf32>
    %653 = vector.extract_strided_slice %650 {offsets = [0, 0], sizes = [2, 32], strides = [1, 1]} : vector<2x256xf32> to vector<2x32xf32>
    %654 = vector.extract_strided_slice %650 {offsets = [0, 64], sizes = [2, 32], strides = [1, 1]} : vector<2x256xf32> to vector<2x32xf32>
    %cst_116 = arith.constant 2.000000e+00 : f32
    %655 = vector.broadcast %cst_116 : f32 to vector<2x32xf32>
    %656 = arith.mulf %655, %654 : vector<2x32xf32>
    %cst_117 = arith.constant 1.000000e+00 : f32
    %657 = vector.broadcast %cst_117 : f32 to vector<2x32xf32>
    %658 = arith.subf %656, %657 : vector<2x32xf32>
    %659 = arith.mulf %653, %658 : vector<2x32xf32>
    %660 = arith.addf %652, %659 : vector<2x32xf32>
    %661 = vector.extract_strided_slice %650 {offsets = [0, 160], sizes = [2, 32], strides = [1, 1]} : vector<2x256xf32> to vector<2x32xf32>
    %662 = arith.mulf %661, %626 : vector<2x32xf32>
    %663 = vector.extract_strided_slice %650 {offsets = [0, 128], sizes = [2, 32], strides = [1, 1]} : vector<2x256xf32> to vector<2x32xf32>
    %664 = vector.extract_strided_slice %650 {offsets = [0, 192], sizes = [2, 32], strides = [1, 1]} : vector<2x256xf32> to vector<2x32xf32>
    %cst_118 = arith.constant 2.000000e+00 : f32
    %665 = vector.broadcast %cst_118 : f32 to vector<2x32xf32>
    %666 = arith.mulf %665, %664 : vector<2x32xf32>
    %cst_119 = arith.constant 1.000000e+00 : f32
    %667 = vector.broadcast %cst_119 : f32 to vector<2x32xf32>
    %668 = arith.subf %666, %667 : vector<2x32xf32>
    %669 = arith.mulf %663, %668 : vector<2x32xf32>
    %670 = arith.addf %662, %669 : vector<2x32xf32>
    %671 = tpu.concatenate %660, %670 in 1 : vector<2x32xf32>, vector<2x32xf32> -> vector<2x64xf32>
    %672 = math.tanh %671 : vector<2x64xf32>
    %673 = vector.extract_strided_slice %650 {offsets = [0, 96], sizes = [2, 32], strides = [1, 1]} : vector<2x256xf32> to vector<2x32xf32>
    %674 = vector.extract_strided_slice %650 {offsets = [0, 224], sizes = [2, 32], strides = [1, 1]} : vector<2x256xf32> to vector<2x32xf32>
    %675 = tpu.concatenate %673, %674 in 1 : vector<2x32xf32>, vector<2x32xf32> -> vector<2x64xf32>
    %676 = arith.mulf %675, %672 : vector<2x64xf32>
    %677 = vector.extract_strided_slice %0 {offsets = [14, 0], sizes = [2, 1], strides = [1, 1]} : vector<16x1xf32> to vector<2x1xf32>
    %678 = vector.extract_strided_slice %676 {offsets = [0, 0], sizes = [2, 32], strides = [1, 1]} : vector<2x64xf32> to vector<2x32xf32>
    %679 = vector.broadcast %677 : vector<2x1xf32> to vector<2x32xf32>
    %680 = arith.mulf %679, %678 : vector<2x32xf32>
    %681 = arith.addf %637, %680 : vector<2x32xf32>
    %682 = vector.extract_strided_slice %0 {offsets = [0, 0], sizes = [2, 1], strides = [1, 1]} : vector<16x1xf32> to vector<2x1xf32>
    %683 = vector.extract_strided_slice %676 {offsets = [0, 32], sizes = [2, 32], strides = [1, 1]} : vector<2x64xf32> to vector<2x32xf32>
    %684 = vector.broadcast %682 : vector<2x1xf32> to vector<2x32xf32>
    %685 = arith.mulf %684, %683 : vector<2x32xf32>
    %686 = arith.addf %642, %685 : vector<2x32xf32>
    %687 = tpu.concatenate %681, %686 in 1 : vector<2x32xf32>, vector<2x32xf32> -> vector<2x64xf32>
    %c0_120 = arith.constant 0 : index
    %c0_121 = arith.constant 0 : index
    %688 = vector.load %arg8[%c0_120, %c0_121] : memref<64x8xf32, #tpu.memory_space<vmem>>, vector<64x8xf32>
    %cst_122 = arith.constant dense<0.000000e+00> : vector<2x8xf32>
    %689 = tpu.matmul %687, %688, %cst_122 {dimension_numbers = #tpu.dot_dimension_numbers<[1], [0], [0], [1], [0, 0, 1, 1], [], []>} : vector<2x64xf32>, vector<64x8xf32>, vector<2x8xf32> -> vector<2x8xf32>
    %c0_123 = arith.constant 0 : index
    %c0_124 = arith.constant 0 : index
    %690 = vector.load %arg9[%c0_123, %c0_124] : memref<1x8xf32, #tpu.memory_space<vmem>>, vector<1x8xf32>
    %691 = vector.broadcast %690 : vector<1x8xf32> to vector<2x8xf32>
    %692 = arith.addf %689, %691 : vector<2x8xf32>
    %c0_125 = arith.constant 0 : index
    %c0_126 = arith.constant 0 : index
    %693 = vector.load %arg10[%c0_125, %c0_126] : memref<2x8xf32, #tpu.memory_space<vmem>>, vector<2x8xf32>
    tpu.vector_store %arg10[%c0_125, %c0_126], %692 {strides = array<i32>} : memref<2x8xf32, #tpu.memory_space<vmem>>, vector<2x8xf32>,
    return
  }
}

</mosaic_0001>

<bundles_post_ra>
// kernel: tpu_custom_call.1
= control target key start
LH: loop header
LB: loop body
LE: loop exit
PB: predicated region body
PF: predicated region fallthrough
CT: control target
= control target key end

     0   :  { %15 = vsyncpa [#allocation3], 0  ;;  %s4260_s0 = inlined_call_operand.vmem [shape: f32[16,16], index: 0, kind: input, shape index: {}]   ;;  %s4261_s1 = inlined_call_operand.vmem [shape: f32[16,1], index: 1, kind: input, shape index: {}]   ;;  %s4262_s2 = inlined_call_operand.vmem [shape: f32[16,256], index: 2, kind: input, shape index: {}]   ;;  %s4263_s3 = inlined_call_operand.hbm [shape: f32[64,256], index: 3, kind: input, shape index: {}]   ;;  %s4264_s4 = inlined_call_operand.vmem [shape: f32[1,256], index: 4, kind: input, shape index: {}]   ;;  %s4265_s5 = inlined_call_operand.hbm [shape: f32[64,256], index: 5, kind: input, shape index: {}]   ;;  %s4266_s6 = inlined_call_operand.hbm [shape: f32[64,256], index: 6, kind: input, shape index: {}]   ;;  %s4267_s7 = inlined_call_operand.vmem [shape: f32[1,256], index: 7, kind: input, shape index: {}]   ;;  %s4268_s8 = inlined_call_operand.vmem [shape: f32[64,8], index: 8, kind: input, shape index: {}]   ;;  %s4269_s9 = inlined_call_operand.vmem [shape: f32[1,8], index: 9, kind: input, shape index: {}]   ;;  %s4270_s10 = inlined_call_operand.hbm [shape: f32[2,8], index: 10, kind: output, shape index: {}]  }
   0x1   :  { %16 = vsyncpa [#allocation6], 0 }
   0x2   :  { %17 = vsyncpa [#allocation4], 0  ;;  %s3511_s13 = smov [#allocation5]   ;;  %s3512_s15 = smov [#allocation2]  }
   0x3   :  { %s43_s14 = sshll.u32 %s3511_s13, 4  ;;  %s29_s16 = sshll.u32 %s3512_s15, 4  ;;  %s44_s14 = int_to_ptr.vmem [resolvable:$true] %s43_s14  ;;  %s3579_s16 = int_to_ptr.vmem [resolvable:$true] %s29_s16 }
   0x4   :  { %s3417_s19 = scalar_lea.hbm %s4265_s5, 2048 }
   0x5   :  { %p3418_p0 = scmp.ne.s32.totalorder %s4265_s5, %s3417_s19  ;;  %p3421_p1 = scmp.lt.u32.totalorder %s3417_s19, %s4265_s5 }
   0x7   :  { %p3423_p2 = pnand %p3421_p1, %p3418_p0 }
   0x9   :  { %3426 = shalt.err (!%p3423_p2)
}
   0xa   :  { %s3427_s24 = scalar_lea.vmem %s44_s14, 2048  ;;  %p3432_p4 = scmp.lt.s32.totalorder %s44_s14, %s44_s14 }
   0xb   :  { %p3428_p3 = scmp.ne.s32.totalorder %s44_s14, %s3427_s24  ;;  %p3433_p5 = scmp.lt.s32.totalorder %s3427_s24, %s3427_s24 }
   0xd   :  { %p3434_p6 = por %p3433_p5, %p3432_p4 }
   0xf   :  { %p3435_p7 = pnand %p3434_p6, %p3428_p3 }
  0x11   :  { %3438 = shalt.err (!%p3435_p7)
}
  0x12   :  { %s3513_s25 = smov 256   ;;  %s3514_s26 = smov 16  }
  0x13   :  { %49 = dma.hbm_to_vmem [thread:$0]  %s4265_s5, 2048, %s44_s14, [#allocation6], %s3513_s25, %s3513_s25, %s3514_s26  }
  0x14   :  { %s3439_s11 = scalar_lea.hbm %s4263_s3, 2048 }
  0x15   :  { %p3440_p8 = scmp.ne.s32.totalorder %s4263_s3, %s3439_s11  ;;  %p3443_p9 = scmp.lt.u32.totalorder %s3439_s11, %s4263_s3 }
  0x17   :  { %p3445_p10 = pnand %p3443_p9, %p3440_p8 }
  0x19   :  { %3448 = shalt.err (!%p3445_p10)
}
  0x1a   :  { %s3449_s18 = scalar_lea.vmem %s3579_s16, 2048  ;;  %p3454_p12 = scmp.lt.s32.totalorder %s3579_s16, %s3579_s16 }
  0x1b   :  { %p3450_p11 = scmp.ne.s32.totalorder %s3579_s16, %s3449_s18  ;;  %p3455_p13 = scmp.lt.s32.totalorder %s3449_s18, %s3449_s18 }
  0x1d   :  { %p3456_p0 = por %p3455_p13, %p3454_p12 }
  0x1f   :  { %p3457_p1 = pnand %p3456_p0, %p3450_p11 }
  0x21   :  { %3460 = shalt.err (!%p3457_p1)
}
  0x22   :  { %35 = dma.hbm_to_vmem [thread:$0]  %s4263_s3, 2048, %s3579_s16, [#allocation3], %s3513_s25, %s3513_s25, %s3514_s26  }
  0x23   :  { %s3515_s19 = smov [#allocation7]   ;;  %s3461_s23 = scalar_lea.hbm %s4266_s6, 2048 }
  0x24   :  { %s55_s20 = sshll.u32 %s3515_s19, 4  ;;  %p3462_p2 = scmp.ne.s32.totalorder %s4266_s6, %s3461_s23  ;;  %s56_s20 = int_to_ptr.vmem [resolvable:$true] %s55_s20 }
  0x25   :  { %p3465_p3 = scmp.lt.u32.totalorder %s3461_s23, %s4266_s6 }
  0x27   :  { %p3467_p4 = pnand %p3465_p3, %p3462_p2 }
  0x29   :  { %3470 = shalt.err (!%p3467_p4)
}
  0x2a   :  { %s3471_s30 = scalar_lea.vmem %s56_s20, 2048  ;;  %p3476_p6 = scmp.lt.s32.totalorder %s56_s20, %s56_s20 }
  0x2b   :  { %p3472_p5 = scmp.ne.s32.totalorder %s56_s20, %s3471_s30  ;;  %p3477_p7 = scmp.lt.s32.totalorder %s3471_s30, %s3471_s30 }
  0x2d   :  { %p3478_p8 = por %p3477_p7, %p3476_p6 }
  0x2f   :  { %p3479_p9 = pnand %p3478_p8, %p3472_p5 }
  0x31   :  { %3482 = shalt.err (!%p3479_p9)
}
  0x32   :  { %61 = dma.hbm_to_vmem [thread:$0]  %s4266_s6, 2048, %s56_s20, [#allocation6], %s3513_s25, %s3513_s25, %s3514_s26  }
  0x33   :  { %3505 = dma.done.wait [#allocation3], 2048  }
  0x34   :  { %3506 = vsyncadd [#allocation3], 4294965248 }
  0x35   :  { %3507 = dma.done.wait [#allocation6], 4096  }
  0x36   :  { %3508 = vsyncadd [#allocation6], 4294963200  ;;  %v3516_v0 = vmov 0.0   ;;  %v86_v1 = vld [vmem:[#allocation2 + $0x8] sm:$0xff]  ;;  %v88_v2 = vld [vmem:[#allocation2 + $0x18] sm:$0xff]  ;;  %vm113_vm0 = vcmask 130048   ;;  %v103_v33 = vlaneseq }
  0x37   :  { %184 = vmatprep.mubr.f32.mxu0 %v3516_v0  ;;  %284 = vmatprep.mubr.f32.mxu1 %v3516_v0  ;;  %v82_v3 = vld [vmem:[%s4262_s2 + $0x8] sm:$0xff]  ;;  %v3636_v4 = vpack.c.bf16 %v88_v2, %v86_v1  ;;  %v84_v5 = vld [vmem:[%s4262_s2 + $0x18] sm:$0xff]  ;;  %v85_v6 = vld [vmem:[#allocation2] sm:$0xff]  ;;  %vm207_vm1 = vcmask 1041408   ;;  %vm209_vm2 = vcmask 1043456   ;;  %vm211_vm3 = vcmask 1045504  }
  0x38   :  { %v87_v7 = vld [vmem:[#allocation2 + $0x10] sm:$0xff]  ;;  %v2954_v8 = vpack.c.bf16 %v84_v5, %v82_v3  ;;  %v81_v10 = vld [vmem:[%s4262_s2] sm:$0xff]  ;;  %v90_v12 = vld [vmem:[#allocation2 + $0x28] sm:$0xff]  ;;  %v3699_v34 = vshrl.u32 %v103_v33, 7  ;;  %s3518_s20 = smov 32   ;;  %s3519_s21 = smov 96  }
  0x39   :  { %v3641_v9 = vpack.c.bf16 %v87_v7, %v85_v6  ;;  %v83_v11 = vld [vmem:[%s4262_s2 + $0x10] sm:$0xff]  ;;  %2959 = vmatprep.subr.bf16.mxu1 %v3636_v4  ;;  %v92_v14 = vld [vmem:[#allocation2 + $0x38] sm:$0xff]  ;;  %v89_v15 = vld [vmem:[#allocation2 + $0x20] sm:$0xff]  ;;  %vm335_vm4 = vcmask 261120   ;;  %vm216_vm5 = vcmask 523264   ;;  %vm3522_vm6 = vmmov 0  }
  0x3a   :  { %v2956_v13 = vpack.c.bf16 %v83_v11, %v81_v10  ;;  %2955 = vmatprep.subr.bf16.mxu0 %v2954_v8  ;;  %v3651_v16 = vpack.c.bf16 %v92_v14, %v90_v12  ;;  %v91_v17 = vld [vmem:[#allocation2 + $0x30] sm:$0xff]  ;;  %v94_v18 = vld [vmem:[#allocation2 + $0x48] sm:$0xff]  ;;  %v96_v19 = vld [vmem:[#allocation2 + $0x58] sm:$0xff]  ;;  %v109_v35 = vsub.s32 1, %v3699_v34  ;;  %v105_v37 = vsub.s32 0, %v3699_v34 }
  0x3b   :  { %2961 = vmatpush1.bf16.msra.mxu1 %v3641_v9  ;;  %v79_v20 = vld [vmem:[%s4260_s0] sm:$0xff]  ;;  %v3656_v21 = vpack.c.bf16 %v91_v17, %v89_v15  ;;  %v3658_v22 = vpack.c.bf16 %v96_v19, %v94_v18  ;;  %v95_v24 = vld [vmem:[#allocation2 + $0x50] sm:$0xff]  ;;  %v98_v25 = vld [vmem:[#allocation2 + $0x68] sm:$0xff]  ;;  %vm2824_vm7 = vcmask 58368  }
  0x3c   :  { %2957 = vmatpush1.bf16.msra.mxu0 %v2956_v13  ;;  %v93_v23 = vld [vmem:[#allocation2 + $0x40] sm:$0xff]  ;;  %2963 = vmatprep.subr.bf16.mxu1 %v3651_v16  ;;  %v100_v26 = vld [vmem:[#allocation2 + $0x78] sm:$0xff]  ;;  %v80_v28 = vld [vmem:[%s4260_s0 + $0x8] sm:$0xff]  ;;  %s3523_s0 = smov [#allocation8]  }
  0x3d   :  { %2975 = vmatprep.subr.bf16.mxu0 %v3636_v4  ;;  %v3664_v27 = vpack.c.bf16 %v95_v24, %v93_v23  ;;  %v3671_v29 = vpack.c.bf16 %v100_v26, %v98_v25  ;;  %v97_v30 = vld [vmem:[#allocation2 + $0x60] sm:$0xff]  ;;  %v99_v31 = vld [vmem:[#allocation2 + $0x70] sm:$0xff]  ;;  %s2832_s19 = sshll.u32 %s3523_s0, 4  ;;  %s2833_s19 = int_to_ptr.vmem [resolvable:$true] %s2832_s19 }
  0x3e   :  { %v3677_v32 = vpack.c.bf16 %v99_v31, %v97_v30  ;;  %v101_v36 = vld [vmem:[%s4264_s4] sm:$0x3]  ;;  %s3517_s4 = smov 64   ;;  %p3488_p11 = scmp.lt.s32.totalorder %s2833_s19, %s2833_s19 }
  0x3f   :  { %2842 = vmatmul.mubr.msk.f32.vlgmr.msra.gmra.mrb[0].mxu0 %vm113_vm0, %v79_v20  ;;  %2965 = vmatpush1.bf16.msra.mxu1 %v3656_v21  ;;  %v110_v39 = vrot.slane %v101_v36, %v109_v35  ;;  %v106_v42 = vrot.slane %v101_v36, %v105_v37 }
  0x40   :  { %190 = vmatprep.mubr.f32.mxu0 %v3516_v0  ;;  %2967 = vmatprep.subr.bf16.mxu1 %v3658_v22 }
  0x41   :  { %2977 = vmatpush1.bf16.msra.mxu0 %v3641_v9 }
  0x42   :  { %2979 = vmatprep.subr.bf16.mxu0 %v3651_v16 }
  0x43   :  { %2843 = vmatmul.mubr.msk.f32.gmra.mrb[2].mxu0 %vm113_vm0, %v80_v28  ;;  %2969 = vmatpush1.bf16.msra.mxu1 %v3664_v27 }
  0x44   :  { %2971 = vmatprep.subr.bf16.mxu1 %v3671_v29  ;;  %415 = vmatprep.mubr.f32.mxu0 %v3516_v0 }
  0x45   :  { %2981 = vmatpush1.bf16.msra.mxu0 %v3656_v21 }
  0x46   :  { %2983 = vmatprep.subr.bf16.mxu0 %v3658_v22 }
  0x47   :  { %2973 = vmatpush1.bf16.msra.mxu1 %v3677_v32 }
  0x48   :  { %2991 = vmatprep.subr.bf16.mxu1 %v3636_v4 }
  0x49   :  { %2985 = vmatpush1.bf16.msra.mxu0 %v3664_v27 }
  0x4a   :  { %285 = vmatmul.mubr.f32.vlgmr.msra.gmra.mrb[0].mxu1 %v3516_v0  ;;  %2987 = vmatprep.subr.bf16.mxu0 %v3671_v29 }
  0x4b   :  { %2993 = vmatpush1.bf16.msra.mxu1 %v3641_v9  ;;  %557 = vmatprep.mubr.f32.mxu1 %v3516_v0 }
  0x4c   :  { %2995 = vmatprep.subr.bf16.mxu1 %v3651_v16 }
  0x4d   :  { %2989 = vmatpush1.bf16.msra.mxu0 %v3677_v32 }
  0x4e   :  { %3007 = vmatprep.subr.bf16.mxu0 %v3636_v4 }
  0x4f   :  { %2997 = vmatpush1.bf16.msra.mxu1 %v3656_v21 }
  0x50   :  { %2999 = vmatprep.subr.bf16.mxu1 %v3658_v22 }
  0x53   :  { %3001 = vmatpush1.bf16.msra.mxu1 %v3664_v27 }
  0x54   :  { %3003 = vmatprep.subr.bf16.mxu1 %v3671_v29 }
  0x57   :  { %3005 = vmatpush1.bf16.msra.mxu1 %v3677_v32 }
  0x58   :  { %3023 = vmatprep.subr.bf16.mxu1 %v3636_v4 }
 0x112   :  { %v186_v38 = vpop.f32.mrb[0].mxu0 }
 0x113   :  { %v188_v40 = vpop.f32.mrb[1].mxu0  ;;  %v3714_v47 = vadd.f32 %v186_v38, %v106_v42 }
 0x114   :  { %v3708_v41 = vadd.f32 %v188_v40, %v110_v39 }
 0x116   :  { %v192_v43 = vpop.f32.mrb[2].mxu0 }
 0x117   :  { %v3712_v44 = vadd.f32 %v192_v43, %v106_v42  ;;  %v194_v45 = vpop.f32.mrb[3].mxu0 }
 0x118   :  { %v195_v46 = vadd.f32 %v194_v45, %v110_v39 }
 0x11a   :  { %v198_v48 = vrot.slane %v195_v46, 6  ;;  %v200_v49 = vrot.slane %v195_v46, 2 }
 0x11c   :  { %v208_v50 = vsel %vm207_vm1, %v198_v48, %v200_v49 }
 0x11d   :  { %v286_v51 = vpop.f32.mrb[0].mxu1  ;;  %v210_v52 = vsel %vm209_vm2, %v208_v50, %v198_v48 }
 0x11e   :  { %v291_v53 = vadd.f32 %v286_v51, %v3714_v47  ;;  %v3720_v54 = vsel %vm211_vm3, %v210_v52, %v200_v49  ;;  %v288_v55 = vpop.f32.mrb[1].mxu1 }
 0x11f   :  { %v292_v56 = vadd.f32 %v288_v55, %v3720_v54 }
 0x120   :  { %v2844_v57 = vmul.f32 -1.442695, %v291_v53 }
 0x121   :  { %v2845_v58 = vmul.f32 -1.442695, %v292_v56 }
 0x122   :  { %3257 = vpow2.f32 %v2844_v57 }
 0x123   :  { %3259 = vpow2.f32 %v2845_v58 }
 0x12c   :  { %v3258_v59 = vpop.eup %3257 }
 0x12d   :  { %v3260_v60 = vpop.eup %3259  ;;  %v299_v61 = vadd.f32 1.0, %v3258_v59 }
 0x12e   :  { %v300_v62 = vadd.f32 1.0, %v3260_v60 }
 0x12f   :  { %3261 = vrcp.f32 %v299_v61 }
 0x130   :  { %3263 = vrcp.f32 %v300_v62 }
 0x139   :  { %v3262_v63 = vpop.eup %3261 }
 0x13a   :  { %v3264_v1 = vpop.eup %3263  ;;  %v306_v2 = vmul.f32 2.0, %v3262_v63  ;;  %v305_v12 = vmul.f32 0.0, %v3262_v63 }
 0x13b   :  { %v319_v5 = vmul.f32 2.0, %v3264_v1  ;;  %v318_v17 = vmul.f32 0.0, %v3264_v1 }
 0x13c   :  { %v2846_v3 = vadd.f32 -1.0, %v306_v2 }
 0x13d   :  { %v2847_v6 = vadd.f32 -1.0, %v319_v5 }
 0x13e   :  { %309 = vrot.lane.b32.xlu0 %v2846_v3, %s3517_s4 }
 0x142   :  { %322 = vrot.lane.b32.xlu0 %v2847_v6, %s3517_s4 }
 0x1b0   :  { %v310_v7 = vpop.permute.xlu0 %309 }
 0x1b1   :  { %v312_v8 = vmul.f32 %v3262_v63, %v310_v7 }
 0x1b3   :  { %314 = vrot.lane.b32.xlu1 %v312_v8, %s3518_s20 }
 0x1b4   :  { %v323_v10 = vpop.permute.xlu0 %322 }
 0x1b5   :  { %v325_v11 = vmul.f32 %v3264_v1, %v323_v10 }
 0x1b7   :  { %327 = vrot.lane.b32.xlu1 %v325_v11, %s3518_s20 }
 0x1bb   :  { %339 = vrot.lane.b32.xlu1 %v3262_v63, %s3518_s20 }
 0x225   :  { %v315_v13 = vpop.permute.xlu1 %314 }
 0x226   :  { %v317_v14 = vadd.f32 %v315_v13, %v305_v12 }
 0x228   :  { %332 = vrot.lane.b32.xlu0 %v317_v14, %s3519_s21  ;;  %v442_v60 = vrot.slane %v317_v14, 6 }
 0x229   :  { %v328_v15 = vpop.permute.xlu1 %327 }
 0x22a   :  { %v330_v18 = vadd.f32 %v328_v15, %v318_v17 }
 0x22c   :  { %343 = vrot.lane.b32.xlu0 %v3264_v1, %s3517_s4  ;;  %v458_v1 = vrot.slane %v330_v18, 6 }
 0x22d   :  { %v340_v24 = vpop.permute.xlu1 %339 }
 0x29a   :  { %v333_v19 = vpop.permute.xlu0 %332 }
 0x29b   :  { %v336_v20 = vsel %vm335_vm4, %v333_v19, %v330_v18 }
 0x29c   :  { %3265 = vtanh.f32 %v336_v20 }
 0x29e   :  { %v344_v23 = vpop.permute.xlu0 %343 }
 0x29f   :  { %v346_v26 = vsel %vm335_vm4, %v340_v24, %v344_v23 }
 0x2a6   :  { %v3266_v25 = vpop.eup %3265 }
 0x2a7   :  { %v3732_v28 = vmul.f32 %v3266_v25, %v346_v26 }
 0x2a9   :  { %2848 = vmatmul.mubr.msk.f32.vlgmr.msra.gmra.mrb[4].mxu0 %vm216_vm5, %v3732_v28 }
 0x2aa   :  { %3009 = vmatpush1.bf16.msra.mxu0 %v3641_v9  ;;  %699 = vmatprep.mubr.f32.mxu0 %v3516_v0 }
 0x2ab   :  { %3011 = vmatprep.subr.bf16.mxu0 %v3651_v16 }
 0x2ae   :  { %3013 = vmatpush1.bf16.msra.mxu0 %v3656_v21 }
 0x2af   :  { %3015 = vmatprep.subr.bf16.mxu0 %v3658_v22 }
 0x2b2   :  { %3017 = vmatpush1.bf16.msra.mxu0 %v3664_v27 }
 0x2b3   :  { %3019 = vmatprep.subr.bf16.mxu0 %v3671_v29 }
 0x2b6   :  { %3021 = vmatpush1.bf16.msra.mxu0 %v3677_v32 }
 0x2b7   :  { %3039 = vmatprep.subr.bf16.mxu0 %v3636_v4 }
 0x37c   :  { %v417_v30 = vpop.f32.mrb[4].mxu0 }
 0x37d   :  { %v424_v31 = vrot.slane %v417_v30, 6  ;;  %v419_v33 = vpop.f32.mrb[5].mxu0 }
 0x37e   :  { %v425_v36 = vrot.slane %v419_v33, 6 }
 0x37f   :  { %v428_v38 = vadd.f32 %v424_v31, %v3714_v47 }
 0x380   :  { %v429_v39 = vadd.f32 %v425_v36, %v3720_v54 }
 0x381   :  { %v2849_v40 = vmul.f32 -1.442695, %v428_v38 }
 0x382   :  { %v2850_v42 = vmul.f32 -1.442695, %v429_v39 }
 0x383   :  { %3267 = vpow2.f32 %v2849_v40 }
 0x384   :  { %3269 = vpow2.f32 %v2850_v42 }
 0x38d   :  { %v3268_v43 = vpop.eup %3267 }
 0x38e   :  { %v3270_v45 = vpop.eup %3269  ;;  %v436_v46 = vadd.f32 1.0, %v3268_v43 }
 0x38f   :  { %v437_v48 = vadd.f32 1.0, %v3270_v45 }
 0x390   :  { %3271 = vrcp.f32 %v436_v46 }
 0x391   :  { %3273 = vrcp.f32 %v437_v48 }
 0x39a   :  { %v3272_v49 = vpop.eup %3271 }
 0x39b   :  { %v3274_v50 = vpop.eup %3273  ;;  %v445_v51 = vmul.f32 2.0, %v3272_v49  ;;  %v444_v61 = vmul.f32 %v3272_v49, %v442_v60 }
 0x39c   :  { %v461_v52 = vmul.f32 2.0, %v3274_v50  ;;  %v460_v3 = vmul.f32 %v3274_v50, %v458_v1 }
 0x39d   :  { %v2851_v53 = vadd.f32 -1.0, %v445_v51 }
 0x39e   :  { %v2852_v55 = vadd.f32 -1.0, %v461_v52 }
 0x39f   :  { %448 = vrot.lane.b32.xlu1 %v2851_v53, %s3517_s4 }
 0x3a0   :  { %464 = vrot.lane.b32.xlu0 %v2852_v55, %s3517_s4 }
 0x411   :  { %v449_v56 = vpop.permute.xlu1 %448 }
 0x412   :  { %v451_v57 = vmul.f32 %v3272_v49, %v449_v56  ;;  %v465_v58 = vpop.permute.xlu0 %464 }
 0x413   :  { %v467_v59 = vmul.f32 %v3274_v50, %v465_v58 }
 0x414   :  { %453 = vrot.lane.b32.xlu1 %v451_v57, %s3518_s20 }
 0x415   :  { %469 = vrot.lane.b32.xlu0 %v467_v59, %s3518_s20 }
 0x419   :  { %480 = vrot.lane.b32.xlu0 %v3272_v49, %s3518_s20 }
 0x486   :  { %v454_v62 = vpop.permute.xlu1 %453 }
 0x487   :  { %v456_v63 = vadd.f32 %v454_v62, %v444_v61  ;;  %v470_v2 = vpop.permute.xlu0 %469 }
 0x488   :  { %v472_v5 = vadd.f32 %v470_v2, %v460_v3 }
 0x489   :  { %474 = vrot.lane.b32.xlu1 %v456_v63, %s3519_s21 }
 0x48a   :  { %v600_v55 = vrot.slane %v472_v5, 6 }
 0x48b   :  { %v481_v10 = vpop.permute.xlu0 %480 }
 0x48d   :  { %484 = vrot.lane.b32.xlu1 %v3274_v50, %s3517_s4  ;;  %v584_v50 = vrot.slane %v456_v63, 6 }
 0x4fb   :  { %v475_v6 = vpop.permute.xlu1 %474 }
 0x4fc   :  { %v477_v7 = vsel %vm335_vm4, %v475_v6, %v472_v5 }
 0x4fd   :  { %3275 = vtanh.f32 %v477_v7 }
 0x4ff   :  { %v485_v8 = vpop.permute.xlu1 %484 }
 0x500   :  { %v487_v12 = vsel %vm335_vm4, %v481_v10, %v485_v8 }
 0x507   :  { %v3276_v11 = vpop.eup %3275 }
 0x508   :  { %v3756_v13 = vmul.f32 %v3276_v11, %v487_v12 }
 0x50a   :  { %v490_v14 = vrot.slane %v3756_v13, 2  ;;  %v1334_v3 = vsel %vm207_vm1, %v3732_v28, %v3756_v13 }
 0x50c   :  { %2853 = vmatmul.mubr.msk.f32.vlgmr.msra.gmra.mrb[2].mxu1 %vm216_vm5, %v490_v14 }
 0x50d   :  { %3025 = vmatpush1.bf16.msra.mxu1 %v3641_v9  ;;  %841 = vmatprep.mubr.f32.mxu1 %v3516_v0 }
 0x50e   :  { %3027 = vmatprep.subr.bf16.mxu1 %v3651_v16 }
 0x511   :  { %3029 = vmatpush1.bf16.msra.mxu1 %v3656_v21 }
 0x512   :  { %3031 = vmatprep.subr.bf16.mxu1 %v3658_v22 }
 0x515   :  { %3033 = vmatpush1.bf16.msra.mxu1 %v3664_v27 }
 0x516   :  { %3035 = vmatprep.subr.bf16.mxu1 %v3671_v29 }
 0x519   :  { %3037 = vmatpush1.bf16.msra.mxu1 %v3677_v32 }
 0x51a   :  { %3055 = vmatprep.subr.bf16.mxu1 %v3636_v4 }
 0x5df   :  { %v559_v15 = vpop.f32.mrb[2].mxu1 }
 0x5e0   :  { %v566_v17 = vrot.slane %v559_v15, 4  ;;  %v561_v18 = vpop.f32.mrb[3].mxu1 }
 0x5e1   :  { %v567_v19 = vrot.slane %v561_v18, 4 }
 0x5e2   :  { %v570_v20 = vadd.f32 %v566_v17, %v3714_v47 }
 0x5e3   :  { %v571_v23 = vadd.f32 %v567_v19, %v3720_v54 }
 0x5e4   :  { %v2854_v24 = vmul.f32 -1.442695, %v570_v20 }
 0x5e5   :  { %v2855_v25 = vmul.f32 -1.442695, %v571_v23 }
 0x5e6   :  { %3277 = vpow2.f32 %v2854_v24 }
 0x5e7   :  { %3279 = vpow2.f32 %v2855_v25 }
 0x5f0   :  { %v3278_v26 = vpop.eup %3277 }
 0x5f1   :  { %v3280_v30 = vpop.eup %3279  ;;  %v578_v31 = vadd.f32 1.0, %v3278_v26 }
 0x5f2   :  { %v579_v33 = vadd.f32 1.0, %v3280_v30 }
 0x5f3   :  { %3281 = vrcp.f32 %v578_v31 }
 0x5f4   :  { %3283 = vrcp.f32 %v579_v33 }
 0x5fd   :  { %v3282_v36 = vpop.eup %3281 }
 0x5fe   :  { %v3284_v38 = vpop.eup %3283  ;;  %v587_v39 = vmul.f32 2.0, %v3282_v36  ;;  %v586_v51 = vmul.f32 %v3282_v36, %v584_v50 }
 0x5ff   :  { %v603_v40 = vmul.f32 2.0, %v3284_v38  ;;  %v602_v57 = vmul.f32 %v3284_v38, %v600_v55 }
 0x600   :  { %v2856_v42 = vadd.f32 -1.0, %v587_v39 }
 0x601   :  { %v2857_v43 = vadd.f32 -1.0, %v603_v40 }
 0x602   :  { %590 = vrot.lane.b32.xlu0 %v2856_v42, %s3517_s4 }
 0x603   :  { %606 = vrot.lane.b32.xlu1 %v2857_v43, %s3517_s4 }
 0x674   :  { %v591_v45 = vpop.permute.xlu0 %590 }
 0x675   :  { %v593_v46 = vmul.f32 %v3282_v36, %v591_v45  ;;  %v607_v48 = vpop.permute.xlu1 %606 }
 0x676   :  { %v609_v49 = vmul.f32 %v3284_v38, %v607_v48 }
 0x677   :  { %595 = vrot.lane.b32.xlu0 %v593_v46, %s3518_s20 }
 0x678   :  { %611 = vrot.lane.b32.xlu1 %v609_v49, %s3518_s20 }
 0x67c   :  { %622 = vrot.lane.b32.xlu1 %v3282_v36, %s3518_s20 }
 0x6e9   :  { %v596_v52 = vpop.permute.xlu0 %595 }
 0x6ea   :  { %v598_v53 = vadd.f32 %v596_v52, %v586_v51  ;;  %v612_v56 = vpop.permute.xlu1 %611 }
 0x6eb   :  { %v614_v58 = vadd.f32 %v612_v56, %v602_v57 }
 0x6ec   :  { %616 = vrot.lane.b32.xlu0 %v598_v53, %s3519_s21 }
 0x6ed   :  { %v742_v43 = vrot.slane %v614_v58, 6 }
 0x6ee   :  { %v623_v62 = vpop.permute.xlu1 %622 }
 0x6f0   :  { %626 = vrot.lane.b32.xlu0 %v3284_v38, %s3517_s4  ;;  %v726_v38 = vrot.slane %v598_v53, 6 }
 0x75e   :  { %v617_v59 = vpop.permute.xlu0 %616 }
 0x75f   :  { %v619_v60 = vsel %vm335_vm4, %v617_v59, %v614_v58 }
 0x760   :  { %3285 = vtanh.f32 %v619_v60  ;;  %v1352_v60 = vrot.slane %v3756_v13, 6  ;;  %v203_v13 = vrot.slane %v3708_v41, 6 }
 0x762   :  { %v627_v61 = vpop.permute.xlu0 %626 }
 0x763   :  { %v629_v63 = vsel %vm335_vm4, %v623_v62, %v627_v61 }
 0x76a   :  { %v3286_v1 = vpop.eup %3285 }
 0x76b   :  { %v3780_v2 = vmul.f32 %v3286_v1, %v629_v63  ;;  %v205_v1 = vrot.slane %v3708_v41, 2 }
 0x76d   :  { %v632_v5 = vrot.slane %v3780_v2, 4  ;;  %v3788_v6 = vsel %vm209_vm2, %v1334_v3, %v3780_v2  ;;  %v1350_v57 = vrot.slane %v3780_v2, 2  ;;  %v213_v63 = vsel %vm207_vm1, %v203_v13, %v205_v1 }
 0x76e   :  { %v214_v2 = vsel %vm209_vm2, %v213_v63, %v203_v13 }
 0x76f   :  { %2858 = vmatmul.mubr.msk.f32.vlgmr.msra.gmra.mrb[6].mxu0 %vm216_vm5, %v632_v5 }
 0x770   :  { %3041 = vmatpush1.bf16.msra.mxu0 %v3641_v9  ;;  %976 = vmatprep.mubr.f32.mxu0 %v3516_v0 }
 0x771   :  { %3043 = vmatprep.subr.bf16.mxu0 %v3651_v16 }
 0x774   :  { %3045 = vmatpush1.bf16.msra.mxu0 %v3656_v21 }
 0x775   :  { %3047 = vmatprep.subr.bf16.mxu0 %v3658_v22 }
 0x778   :  { %3049 = vmatpush1.bf16.msra.mxu0 %v3664_v27 }
 0x779   :  { %3051 = vmatprep.subr.bf16.mxu0 %v3671_v29 }
 0x77c   :  { %3053 = vmatpush1.bf16.msra.mxu0 %v3677_v32 }
 0x77d   :  { %3071 = vmatprep.subr.bf16.mxu0 %v3636_v4 }
 0x842   :  { %v701_v7 = vpop.f32.mrb[6].mxu0 }
 0x843   :  { %v708_v8 = vrot.slane %v701_v7, 2  ;;  %v703_v10 = vpop.f32.mrb[7].mxu0 }
 0x844   :  { %v709_v11 = vrot.slane %v703_v10, 2 }
 0x845   :  { %v712_v12 = vadd.f32 %v708_v8, %v3714_v47 }
 0x846   :  { %v713_v14 = vadd.f32 %v709_v11, %v3720_v54 }
 0x847   :  { %v2859_v15 = vmul.f32 -1.442695, %v712_v12 }
 0x848   :  { %v2860_v17 = vmul.f32 -1.442695, %v713_v14 }
 0x849   :  { %3287 = vpow2.f32 %v2859_v15 }
 0x84a   :  { %3289 = vpow2.f32 %v2860_v17 }
 0x853   :  { %v3288_v18 = vpop.eup %3287 }
 0x854   :  { %v3290_v19 = vpop.eup %3289  ;;  %v720_v20 = vadd.f32 1.0, %v3288_v18 }
 0x855   :  { %v721_v23 = vadd.f32 1.0, %v3290_v19 }
 0x856   :  { %3291 = vrcp.f32 %v720_v20 }
 0x857   :  { %3293 = vrcp.f32 %v721_v23 }
 0x860   :  { %v3292_v24 = vpop.eup %3291 }
 0x861   :  { %v3294_v4 = vpop.eup %3293  ;;  %v729_v25 = vmul.f32 2.0, %v3292_v24  ;;  %v728_v39 = vmul.f32 %v3292_v24, %v726_v38 }
 0x862   :  { %v745_v26 = vmul.f32 2.0, %v3294_v4  ;;  %v744_v46 = vmul.f32 %v3294_v4, %v742_v43 }
 0x863   :  { %v2861_v30 = vadd.f32 -1.0, %v729_v25 }
 0x864   :  { %v2862_v31 = vadd.f32 -1.0, %v745_v26 }
 0x865   :  { %732 = vrot.lane.b32.xlu1 %v2861_v30, %s3517_s4 }
 0x866   :  { %748 = vrot.lane.b32.xlu0 %v2862_v31, %s3517_s4 }
 0x8d7   :  { %v733_v47 = vpop.permute.xlu1 %732 }
 0x8d8   :  { %v735_v54 = vmul.f32 %v3292_v24, %v733_v47  ;;  %v749_v33 = vpop.permute.xlu0 %748 }
 0x8d9   :  { %v751_v36 = vmul.f32 %v3294_v4, %v749_v33 }
 0x8da   :  { %737 = vrot.lane.b32.xlu1 %v735_v54, %s3518_s20 }
 0x8db   :  { %753 = vrot.lane.b32.xlu0 %v751_v36, %s3518_s20 }
 0x8df   :  { %764 = vrot.lane.b32.xlu0 %v3292_v24, %s3518_s20 }
 0x94c   :  { %v738_v40 = vpop.permute.xlu1 %737 }
 0x94d   :  { %v3807_v42 = vadd.f32 %v738_v40, %v728_v39  ;;  %v754_v45 = vpop.permute.xlu0 %753 }
 0x94e   :  { %v3812_v48 = vadd.f32 %v754_v45, %v744_v46 }
 0x94f   :  { %758 = vrot.lane.b32.xlu1 %v3807_v42, %s3519_s21  ;;  %v862_v31 = vrot.slane %v3807_v42, 6 }
 0x950   :  { %v878_v36 = vrot.slane %v3812_v48, 6 }
 0x951   :  { %v765_v52 = vpop.permute.xlu0 %764 }
 0x953   :  { %768 = vrot.lane.b32.xlu1 %v3294_v4, %s3517_s4 }
 0x9c1   :  { %v759_v49 = vpop.permute.xlu1 %758 }
 0x9c2   :  { %v761_v50 = vsel %vm335_vm4, %v759_v49, %v3812_v48 }
 0x9c3   :  { %3295 = vtanh.f32 %v761_v50 }
 0x9c5   :  { %v769_v51 = vpop.permute.xlu1 %768 }
 0x9c6   :  { %v771_v55 = vsel %vm335_vm4, %v765_v52, %v769_v51 }
 0x9cd   :  { %v3296_v53 = vpop.eup %3295 }
 0x9ce   :  { %v772_v56 = vmul.f32 %v3296_v53, %v771_v55 }
 0x9d0   :  { %v774_v59 = vrot.slane %v772_v56, 6  ;;  %v3820_v58 = vsel %vm211_vm3, %v3788_v6, %v772_v56  ;;  %v3842_v6 = vsel %vm211_vm3, %v214_v2, %v205_v1 }
 0x9d2   :  { %v1359_v61 = vsel %vm207_vm1, %v774_v59, %v1350_v57  ;;  %2863 = vmatmul.mubr.msk.f32.vlgmr.msra.gmra.mrb[4].mxu1 %vm216_vm5, %v774_v59 }
 0x9d3   :  { %3057 = vmatpush1.bf16.msra.mxu1 %v3641_v9  ;;  %1118 = vmatprep.mubr.f32.mxu1 %v3516_v0  ;;  %v3828_v62 = vsel %vm209_vm2, %v1359_v61, %v1352_v60 }
 0x9d4   :  { %3059 = vmatprep.subr.bf16.mxu1 %v3651_v16 }
 0x9d7   :  { %3061 = vmatpush1.bf16.msra.mxu1 %v3656_v21 }
 0x9d8   :  { %3063 = vmatprep.subr.bf16.mxu1 %v3658_v22 }
 0x9db   :  { %3065 = vmatpush1.bf16.msra.mxu1 %v3664_v27 }
 0x9dc   :  { %3067 = vmatprep.subr.bf16.mxu1 %v3671_v29 }
 0x9df   :  { %3069 = vmatpush1.bf16.msra.mxu1 %v3677_v32 }
 0xaa5   :  { %v843_v3 = vpop.f32.mrb[4].mxu1 }
 0xaa6   :  { %v848_v5 = vadd.f32 %v843_v3, %v3712_v44  ;;  %v845_v7 = vpop.f32.mrb[5].mxu1 }
 0xaa7   :  { %v849_v8 = vadd.f32 %v845_v7, %v3842_v6 }
 0xaa8   :  { %v2864_v10 = vmul.f32 -1.442695, %v848_v5 }
 0xaa9   :  { %v2865_v11 = vmul.f32 -1.442695, %v849_v8 }
 0xaaa   :  { %3297 = vpow2.f32 %v2864_v10 }
 0xaab   :  { %3299 = vpow2.f32 %v2865_v11 }
 0xab4   :  { %v3298_v12 = vpop.eup %3297 }
 0xab5   :  { %v3300_v14 = vpop.eup %3299  ;;  %v856_v41 = vadd.f32 1.0, %v3298_v12 }
 0xab6   :  { %v857_v15 = vadd.f32 1.0, %v3300_v14 }
 0xab7   :  { %3301 = vrcp.f32 %v856_v41 }
 0xab8   :  { %3303 = vrcp.f32 %v857_v15 }
 0xac1   :  { %v3302_v17 = vpop.eup %3301 }
 0xac2   :  { %v3304_v18 = vpop.eup %3303  ;;  %v865_v19 = vmul.f32 2.0, %v3302_v17  ;;  %v864_v47 = vmul.f32 %v3302_v17, %v862_v31 }
 0xac3   :  { %v881_v20 = vmul.f32 2.0, %v3304_v18  ;;  %v880_v39 = vmul.f32 %v3304_v18, %v878_v36 }
 0xac4   :  { %v2866_v23 = vadd.f32 -1.0, %v865_v19 }
 0xac5   :  { %v2867_v24 = vadd.f32 -1.0, %v881_v20 }
 0xac6   :  { %868 = vrot.lane.b32.xlu0 %v2866_v23, %s3517_s4 }
 0xac7   :  { %884 = vrot.lane.b32.xlu1 %v2867_v24, %s3517_s4 }
 0xb38   :  { %v869_v4 = vpop.permute.xlu0 %868 }
 0xb39   :  { %v871_v25 = vmul.f32 %v3302_v17, %v869_v4  ;;  %v885_v26 = vpop.permute.xlu1 %884 }
 0xb3a   :  { %v887_v30 = vmul.f32 %v3304_v18, %v885_v26 }
 0xb3b   :  { %873 = vrot.lane.b32.xlu0 %v871_v25, %s3518_s20 }
 0xb3c   :  { %889 = vrot.lane.b32.xlu1 %v887_v30, %s3518_s20 }
 0xb40   :  { %900 = vrot.lane.b32.xlu1 %v3302_v17, %s3518_s20 }
 0xbad   :  { %v874_v54 = vpop.permute.xlu0 %873 }
 0xbae   :  { %v876_v33 = vadd.f32 %v874_v54, %v864_v47  ;;  %v890_v38 = vpop.permute.xlu1 %889 }
 0xbaf   :  { %v892_v40 = vadd.f32 %v890_v38, %v880_v39 }
 0xbb0   :  { %894 = vrot.lane.b32.xlu0 %v876_v33, %s3519_s21  ;;  %v1003_v7 = vrot.slane %v876_v33, 6 }
 0xbb1   :  { %v1019_v12 = vrot.slane %v892_v40, 6 }
 0xbb2   :  { %v901_v49 = vpop.permute.xlu1 %900 }
 0xbb4   :  { %904 = vrot.lane.b32.xlu0 %v3304_v18, %s3517_s4 }
 0xc22   :  { %v895_v43 = vpop.permute.xlu0 %894 }
 0xc23   :  { %v897_v45 = vsel %vm335_vm4, %v895_v43, %v892_v40 }
 0xc24   :  { %3305 = vtanh.f32 %v897_v45 }
 0xc26   :  { %v905_v46 = vpop.permute.xlu0 %904 }
 0xc27   :  { %v907_v42 = vsel %vm335_vm4, %v901_v49, %v905_v46 }
 0xc2e   :  { %v3306_v50 = vpop.eup %3305 }
 0xc2f   :  { %v3856_v51 = vmul.f32 %v3306_v50, %v907_v42 }
 0xc31   :  { %2868 = vmatmul.mubr.msk.f32.vlgmr.msra.gmra.mrb[8].mxu0 %vm216_vm5, %v3856_v51 }
 0xc32   :  { %3073 = vmatpush1.bf16.msra.mxu0 %v3641_v9  ;;  %1260 = vmatprep.mubr.f32.mxu0 %v3516_v0 }
 0xc33   :  { %3075 = vmatprep.subr.bf16.mxu0 %v3651_v16 }
 0xc36   :  { %3077 = vmatpush1.bf16.msra.mxu0 %v3656_v21 }
 0xc37   :  { %3079 = vmatprep.subr.bf16.mxu0 %v3658_v22 }
 0xc3a   :  { %3081 = vmatpush1.bf16.msra.mxu0 %v3664_v27 }
 0xc3b   :  { %3083 = vmatprep.subr.bf16.mxu0 %v3671_v29 }
 0xc3e   :  { %3085 = vmatpush1.bf16.msra.mxu0 %v3677_v32 }
 0xd04   :  { %v978_v48 = vpop.f32.mrb[8].mxu0 }
 0xd05   :  { %v985_v52 = vrot.slane %v978_v48, 6  ;;  %v980_v53 = vpop.f32.mrb[9].mxu0 }
 0xd06   :  { %v986_v55 = vrot.slane %v980_v53, 6 }
 0xd07   :  { %v989_v9 = vadd.f32 %v985_v52, %v3712_v44 }
 0xd08   :  { %v990_v56 = vadd.f32 %v986_v55, %v3842_v6 }
 0xd09   :  { %v2869_v57 = vmul.f32 -1.442695, %v989_v9 }
 0xd0a   :  { %v2870_v16 = vmul.f32 -1.442695, %v990_v56 }
 0xd0b   :  { %3307 = vpow2.f32 %v2869_v57 }
 0xd0c   :  { %3309 = vpow2.f32 %v2870_v16 }
 0xd15   :  { %v3308_v21 = vpop.eup %3307 }
 0xd16   :  { %v3310_v22 = vpop.eup %3309  ;;  %v997_v59 = vadd.f32 1.0, %v3308_v21 }
 0xd17   :  { %v998_v27 = vadd.f32 1.0, %v3310_v22 }
 0xd18   :  { %3311 = vrcp.f32 %v997_v59 }
 0xd19   :  { %3313 = vrcp.f32 %v998_v27 }
 0xd22   :  { %v3312_v29 = vpop.eup %3311 }
 0xd23   :  { %v3314_v32 = vpop.eup %3313  ;;  %v1006_v60 = vmul.f32 2.0, %v3312_v29  ;;  %v1005_v8 = vmul.f32 %v3312_v29, %v1003_v7 }
 0xd24   :  { %v1022_v61 = vmul.f32 2.0, %v3314_v32  ;;  %v1021_v41 = vmul.f32 %v3314_v32, %v1019_v12 }
 0xd25   :  { %v2871_v13 = vadd.f32 -1.0, %v1006_v60 }
 0xd26   :  { %v2872_v1 = vadd.f32 -1.0, %v1022_v61 }
 0xd27   :  { %1009 = vrot.lane.b32.xlu1 %v2871_v13, %s3517_s4 }
 0xd28   :  { %1025 = vrot.lane.b32.xlu0 %v2872_v1, %s3517_s4 }
 0xd99   :  { %v1010_v63 = vpop.permute.xlu1 %1009 }
 0xd9a   :  { %v1012_v2 = vmul.f32 %v3312_v29, %v1010_v63  ;;  %v1026_v3 = vpop.permute.xlu0 %1025 }
 0xd9b   :  { %v1028_v5 = vmul.f32 %v3314_v32, %v1026_v3 }
 0xd9c   :  { %1014 = vrot.lane.b32.xlu1 %v1012_v2, %s3518_s20 }
 0xd9d   :  { %1030 = vrot.lane.b32.xlu0 %v1028_v5, %s3518_s20 }
 0xda1   :  { %1041 = vrot.lane.b32.xlu0 %v3312_v29, %s3518_s20 }
 0xe0e   :  { %v1015_v10 = vpop.permute.xlu1 %1014 }
 0xe0f   :  { %v1017_v11 = vadd.f32 %v1015_v10, %v1005_v8  ;;  %v1031_v14 = vpop.permute.xlu0 %1030 }
 0xe10   :  { %v1033_v15 = vadd.f32 %v1031_v14, %v1021_v41 }
 0xe11   :  { %1035 = vrot.lane.b32.xlu1 %v1017_v11, %s3519_s21  ;;  %v1145_v57 = vrot.slane %v1017_v11, 6 }
 0xe12   :  { %v1161_v59 = vrot.slane %v1033_v15, 6 }
 0xe13   :  { %v1042_v20 = vpop.permute.xlu0 %1041 }
 0xe15   :  { %1045 = vrot.lane.b32.xlu1 %v3314_v32, %s3517_s4 }
 0xe83   :  { %v1036_v17 = vpop.permute.xlu1 %1035 }
 0xe84   :  { %v1038_v18 = vsel %vm335_vm4, %v1036_v17, %v1033_v15 }
 0xe85   :  { %3315 = vtanh.f32 %v1038_v18 }
 0xe87   :  { %v1046_v19 = vpop.permute.xlu1 %1045 }
 0xe88   :  { %v1048_v24 = vsel %vm335_vm4, %v1042_v20, %v1046_v19 }
 0xe8f   :  { %v3316_v23 = vpop.eup %3315 }
 0xe90   :  { %v3879_v4 = vmul.f32 %v3316_v23, %v1048_v24 }
 0xe92   :  { %v1051_v25 = vrot.slane %v3879_v4, 2  ;;  %v1337_v5 = vsel %vm207_vm1, %v3856_v51, %v3879_v4 }
 0xe94   :  { %2873 = vmatmul.mubr.msk.f32.vlgmr.msra.gmra.mrb[6].mxu1 %vm216_vm5, %v1051_v25 }
 0xe95   :  { %1478 = vmatprep.mubr.f32.mxu1 %v3516_v0 }
 0xf67   :  { %v1120_v26 = vpop.f32.mrb[6].mxu1 }
 0xf68   :  { %v1127_v30 = vrot.slane %v1120_v26, 4  ;;  %v1122_v31 = vpop.f32.mrb[7].mxu1 }
 0xf69   :  { %v1128_v47 = vrot.slane %v1122_v31, 4 }
 0xf6a   :  { %v1131_v54 = vadd.f32 %v1127_v30, %v3712_v44 }
 0xf6b   :  { %v1132_v33 = vadd.f32 %v1128_v47, %v3842_v6 }
 0xf6c   :  { %v2874_v36 = vmul.f32 -1.442695, %v1131_v54 }
 0xf6d   :  { %v2875_v38 = vmul.f32 -1.442695, %v1132_v33 }
 0xf6e   :  { %3317 = vpow2.f32 %v2874_v36 }
 0xf6f   :  { %3319 = vpow2.f32 %v2875_v38  ;;  %v1365_v38 = vld [vmem:[#allocation5 + $0x8] sm:$0xff] }
 0xf78   :  { %v3318_v39 = vpop.eup %3317 }
 0xf79   :  { %v3320_v40 = vpop.eup %3319  ;;  %v1139_v43 = vadd.f32 1.0, %v3318_v39  ;;  %v1367_v39 = vld [vmem:[#allocation5 + $0x18] sm:$0xff] }
 0xf7a   :  { %v1140_v45 = vadd.f32 1.0, %v3320_v40  ;;  %v3086_v40 = vpack.c.bf16 %v1367_v39, %v1365_v38 }
 0xf7b   :  { %3321 = vrcp.f32 %v1139_v43  ;;  %v1364_v43 = vld [vmem:[#allocation5] sm:$0xff] }
 0xf7c   :  { %3323 = vrcp.f32 %v1140_v45  ;;  %v1366_v45 = vld [vmem:[#allocation5 + $0x10] sm:$0xff]  ;;  %3087 = vmatprep.subr.bf16.mxu1 %v3086_v40 }
 0xf85   :  { %v3322_v46 = vpop.eup %3321 }
 0xf86   :  { %v3324_v49 = vpop.eup %3323  ;;  %v1148_v50 = vmul.f32 2.0, %v3322_v46  ;;  %v1147_v16 = vmul.f32 %v3322_v46, %v1145_v57  ;;  %v1368_v57 = vld [vmem:[#allocation5 + $0x20] sm:$0xff] }
 0xf87   :  { %v1164_v42 = vmul.f32 2.0, %v3324_v49  ;;  %v1163_v29 = vmul.f32 %v3324_v49, %v1161_v59 }
 0xf88   :  { %v2876_v48 = vadd.f32 -1.0, %v1148_v50  ;;  %v1383_v50 = vld [vmem:[#allocation7 + $0x18] sm:$0xff] }
 0xf89   :  { %v2877_v52 = vadd.f32 -1.0, %v1164_v42  ;;  %v1380_v42 = vld [vmem:[#allocation7] sm:$0xff] }
 0xf8a   :  { %1151 = vrot.lane.b32.xlu0 %v2876_v48, %s3517_s4  ;;  %v1382_v48 = vld [vmem:[#allocation7 + $0x10] sm:$0xff] }
 0xf8b   :  { %1167 = vrot.lane.b32.xlu1 %v2877_v52, %s3517_s4 }
 0xffc   :  { %v1152_v53 = vpop.permute.xlu0 %1151 }
 0xffd   :  { %v1154_v55 = vmul.f32 %v3322_v46, %v1152_v53  ;;  %v1168_v9 = vpop.permute.xlu1 %1167  ;;  %v3926_v53 = vpack.c.bf16 %v1382_v48, %v1380_v42 }
 0xffe   :  { %v1170_v56 = vmul.f32 %v3324_v49, %v1168_v9  ;;  %v1371_v9 = vld [vmem:[#allocation5 + $0x38] sm:$0xff] }
 0xfff   :  { %1156 = vrot.lane.b32.xlu0 %v1154_v55, %s3518_s20  ;;  %v1369_v55 = vld [vmem:[#allocation5 + $0x28] sm:$0xff] }
0x1000   :  { %1172 = vrot.lane.b32.xlu1 %v1170_v56, %s3518_s20  ;;  %v3090_v56 = vpack.c.bf16 %v1371_v9, %v1369_v55  ;;  %v1354_v9 = vrot.slane %v3732_v28, 2 }
0x1004   :  { %1183 = vrot.lane.b32.xlu1 %v3322_v46, %s3518_s20  ;;  %v1381_v46 = vld [vmem:[#allocation7 + $0x8] sm:$0xff] }
0x1005   :  { %v3924_v52 = vpack.c.bf16 %v1383_v50, %v1381_v46 }
0x1007   :  { %3103 = vmatprep.subr.bf16.mxu0 %v3924_v52 }
0x1071   :  { %v1157_v21 = vpop.permute.xlu0 %1156 }
0x1072   :  { %v3891_v22 = vadd.f32 %v1157_v21, %v1147_v16  ;;  %v1173_v27 = vpop.permute.xlu1 %1172  ;;  %v1370_v16 = vld [vmem:[#allocation5 + $0x30] sm:$0xff]  ;;  %v1385_v21 = vld [vmem:[#allocation7 + $0x28] sm:$0xff] }
0x1073   :  { %v3896_v32 = vadd.f32 %v1173_v27, %v1163_v29  ;;  %v3092_v27 = vpack.c.bf16 %v1370_v16, %v1368_v57  ;;  %v1387_v29 = vld [vmem:[#allocation7 + $0x38] sm:$0xff] }
0x1074   :  { %1177 = vrot.lane.b32.xlu0 %v3891_v22, %s3519_s21  ;;  %v1287_v59 = vrot.slane %v3891_v22, 6  ;;  %v1372_v22 = vld [vmem:[#allocation5 + $0x40] sm:$0xff] }
0x1075   :  { %v1303_v39 = vrot.slane %v3896_v32, 6 }
0x1076   :  { %v1184_v1 = vpop.permute.xlu1 %1183 }
0x1078   :  { %1187 = vrot.lane.b32.xlu0 %v3324_v49, %s3517_s4  ;;  %v3088_v49 = vpack.c.bf16 %v1366_v45, %v1364_v43 }
0x107a   :  { %3089 = vmatpush1.bf16.msra.mxu1 %v3088_v49 }
0x107b   :  { %3091 = vmatprep.subr.bf16.mxu1 %v3090_v56 }
0x107e   :  { %3093 = vmatpush1.bf16.msra.mxu1 %v3092_v27  ;;  %v1347_v27 = vrot.slane %v3856_v51, 2  ;;  %v1396_v51 = vld [vmem:[%s4267_s7] sm:$0x3] }
0x10e6   :  { %v1178_v60 = vpop.permute.xlu0 %1177 }
0x10e7   :  { %v1180_v61 = vsel %vm335_vm4, %v1178_v60, %v3896_v32  ;;  %v1384_v60 = vld [vmem:[#allocation7 + $0x20] sm:$0xff] }
0x10e8   :  { %3325 = vtanh.f32 %v1180_v61  ;;  %v1386_v61 = vld [vmem:[#allocation7 + $0x30] sm:$0xff] }
0x10ea   :  { %v1188_v13 = vpop.permute.xlu0 %1187 }
0x10eb   :  { %v1190_v2 = vsel %vm335_vm4, %v1184_v1, %v1188_v13  ;;  %v3931_v13 = vpack.c.bf16 %v1387_v29, %v1385_v21  ;;  %v3933_v1 = vpack.c.bf16 %v1386_v61, %v1384_v60  ;;  %v1345_v21 = vrot.slane %v3879_v4, 6 }
0x10ec   :  { %v1401_v4 = vrot.slane %v1396_v51, %v105_v37 }
0x10f2   :  { %v3326_v63 = vpop.eup %3325 }
0x10f3   :  { %v3901_v3 = vmul.f32 %v3326_v63, %v1190_v2  ;;  %v1373_v2 = vld [vmem:[#allocation5 + $0x48] sm:$0xff] }
0x10f5   :  { %v1193_v7 = vrot.slane %v3901_v3, 4  ;;  %v3909_v8 = vsel %vm209_vm2, %v1337_v5, %v3901_v3  ;;  %v1375_v5 = vld [vmem:[#allocation5 + $0x58] sm:$0xff]  ;;  %v1343_v57 = vrot.slane %v3901_v3, 2 }
0x10f7   :  { %2878 = vmatmul.mubr.msk.f32.vlgmr.msra.gmra.mrb[10].mxu0 %vm216_vm5, %v1193_v7 }
0x10f8   :  { %1571 = vmatprep.mubr.f32.mxu0 %v3516_v0  ;;  %3105 = vmatpush1.bf16.msra.mxu0 %v3926_v53 }
0x10f9   :  { %3107 = vmatprep.subr.bf16.mxu0 %v3931_v13 }
0x10fc   :  { %3109 = vmatpush1.bf16.msra.mxu0 %v3933_v1 }
0x11ca   :  { %v1262_v10 = vpop.f32.mrb[10].mxu0 }
0x11cb   :  { %v1269_v11 = vrot.slane %v1262_v10, 2  ;;  %v1264_v12 = vpop.f32.mrb[11].mxu0  ;;  %v3094_v10 = vpack.c.bf16 %v1375_v5, %v1373_v2 }
0x11cc   :  { %v1270_v14 = vrot.slane %v1264_v12, 2  ;;  %v1389_v12 = vld [vmem:[#allocation7 + $0x48] sm:$0xff] }
0x11cd   :  { %v1273_v41 = vadd.f32 %v1269_v11, %v3712_v44  ;;  %v1374_v11 = vld [vmem:[#allocation5 + $0x50] sm:$0xff]  ;;  %3095 = vmatprep.subr.bf16.mxu1 %v3094_v10 }
0x11ce   :  { %v1274_v15 = vadd.f32 %v1270_v14, %v3842_v6 }
0x11cf   :  { %v2879_v17 = vmul.f32 -1.442695, %v1273_v41  ;;  %v3096_v41 = vpack.c.bf16 %v1374_v11, %v1372_v22 }
0x11d0   :  { %v2880_v18 = vmul.f32 -1.442695, %v1274_v15  ;;  %v1391_v15 = vld [vmem:[#allocation7 + $0x58] sm:$0xff] }
0x11d1   :  { %3327 = vpow2.f32 %v2879_v17  ;;  %v1388_v17 = vld [vmem:[#allocation7 + $0x40] sm:$0xff]  ;;  %3097 = vmatpush1.bf16.msra.mxu1 %v3096_v41 }
0x11d2   :  { %3329 = vpow2.f32 %v2880_v18  ;;  %v1390_v18 = vld [vmem:[#allocation7 + $0x50] sm:$0xff] }
0x11db   :  { %v3328_v19 = vpop.eup %3327 }
0x11dc   :  { %v3330_v20 = vpop.eup %3329  ;;  %v1281_v23 = vadd.f32 1.0, %v3328_v19  ;;  %v3937_v19 = vpack.c.bf16 %v1391_v15, %v1389_v12 }
0x11dd   :  { %v1282_v24 = vadd.f32 1.0, %v3330_v20  ;;  %v3939_v20 = vpack.c.bf16 %v1390_v18, %v1388_v17 }
0x11de   :  { %3331 = vrcp.f32 %v1281_v23  ;;  %v1377_v23 = vld [vmem:[#allocation5 + $0x68] sm:$0xff]  ;;  %3111 = vmatprep.subr.bf16.mxu0 %v3937_v19 }
0x11df   :  { %3333 = vrcp.f32 %v1282_v24  ;;  %v1379_v24 = vld [vmem:[#allocation5 + $0x78] sm:$0xff]  ;;  %3113 = vmatpush1.bf16.msra.mxu0 %v3939_v20 }
0x11e8   :  { %v3332_v25 = vpop.eup %3331 }
0x11e9   :  { %v3915_v26 = vpop.eup %3333  ;;  %v1290_v30 = vmul.f32 2.0, %v3332_v25  ;;  %v1289_v63 = vmul.f32 %v3332_v25, %v1287_v59 }
0x11ea   :  { %v1306_v31 = vmul.f32 2.0, %v3915_v26  ;;  %v1305_v43 = vmul.f32 %v3915_v26, %v1303_v39 }
0x11eb   :  { %v2881_v47 = vadd.f32 -1.0, %v1290_v30  ;;  %v1376_v30 = vld [vmem:[#allocation5 + $0x60] sm:$0xff] }
0x11ec   :  { %v2882_v44 = vadd.f32 -1.0, %v1306_v31  ;;  %v1378_v31 = vld [vmem:[#allocation5 + $0x70] sm:$0xff] }
0x11ed   :  { %1293 = vrot.lane.b32.xlu1 %v2881_v47, %s3517_s4  ;;  %v1393_v47 = vld [vmem:[#allocation7 + $0x68] sm:$0xff] }
0x11ee   :  { %1309 = vrot.lane.b32.xlu0 %v2882_v44, %s3517_s4  ;;  %v3100_v44 = vpack.c.bf16 %v1378_v31, %v1376_v30 }
0x125f   :  { %v1294_v6 = vpop.permute.xlu1 %1293 }
0x1260   :  { %v1296_v54 = vmul.f32 %v3332_v25, %v1294_v6  ;;  %v1310_v33 = vpop.permute.xlu0 %1309  ;;  %v1395_v6 = vld [vmem:[#allocation7 + $0x78] sm:$0xff] }
0x1261   :  { %v1312_v36 = vmul.f32 %v3915_v26, %v1310_v33  ;;  %v1394_v33 = vld [vmem:[#allocation7 + $0x70] sm:$0xff] }
0x1262   :  { %1298 = vrot.lane.b32.xlu1 %v1296_v54, %s3518_s20  ;;  %v1392_v54 = vld [vmem:[#allocation7 + $0x60] sm:$0xff] }
0x1263   :  { %1314 = vrot.lane.b32.xlu0 %v1312_v36, %s3518_s20  ;;  %v3944_v36 = vpack.c.bf16 %v1395_v6, %v1393_v47  ;;  %v3946_v38 = vpack.c.bf16 %v1394_v33, %v1392_v54 }
0x1265   :  { %3115 = vmatprep.subr.bf16.mxu0 %v3944_v36 }
0x1266   :  { %3117 = vmatpush1.bf16.msra.mxu0 %v3946_v38 }
0x1267   :  { %1325 = vrot.lane.b32.xlu0 %v3332_v25, %s3518_s20  ;;  %v3098_v25 = vpack.c.bf16 %v1379_v24, %v1377_v23  ;;  %3135 = vmatprep.subr.bf16.mxu0 %v3924_v52 }
0x1269   :  { %3099 = vmatprep.subr.bf16.mxu1 %v3098_v25  ;;  %1572 = vmatmul.mubr.f32.vlgmr.msra.gmra.mrb[12].mxu0 %v3516_v0 }
0x126a   :  { %3101 = vmatpush1.bf16.msra.mxu1 %v3100_v44  ;;  %3137 = vmatpush1.bf16.msra.mxu0 %v3926_v53 }
0x126b   :  { %3119 = vmatprep.subr.bf16.mxu1 %v3924_v52  ;;  %1875 = vmatprep.mubr.f32.mxu0 %v3516_v0 }
0x126c   :  { %3139 = vmatprep.subr.bf16.mxu0 %v3931_v13 }
0x126e   :  { %3141 = vmatpush1.bf16.msra.mxu0 %v3933_v1 }
0x126f   :  { %3143 = vmatprep.subr.bf16.mxu0 %v3937_v19 }
0x1272   :  { %3145 = vmatpush1.bf16.msra.mxu0 %v3939_v20 }
0x1273   :  { %3147 = vmatprep.subr.bf16.mxu0 %v3944_v36 }
0x1276   :  { %3149 = vmatpush1.bf16.msra.mxu0 %v3946_v38 }
0x1277   :  { %3167 = vmatprep.subr.bf16.mxu0 %v3924_v52 }
0x12d4   :  { %v1299_v7 = vpop.permute.xlu1 %1298 }
0x12d5   :  { %v1301_v14 = vadd.f32 %v1299_v7, %v1289_v63  ;;  %v1315_v40 = vpop.permute.xlu0 %1314 }
0x12d6   :  { %v1317_v45 = vadd.f32 %v1315_v40, %v1305_v43 }
0x12d7   :  { %1319 = vrot.lane.b32.xlu1 %v1301_v14, %s3519_s21 }
0x12d9   :  { %v1326_v42 = vpop.permute.xlu0 %1325 }
0x12db   :  { %1329 = vrot.lane.b32.xlu1 %v3915_v26, %s3517_s4  ;;  %v1361_v26 = vsel %vm211_vm3, %v3828_v62, %v1354_v9 }
0x1349   :  { %v1320_v46 = vpop.permute.xlu1 %1319 }
0x134a   :  { %v1322_v49 = vsel %vm335_vm4, %v1320_v46, %v1317_v45 }
0x134b   :  { %3335 = vtanh.f32 %v1322_v49 }
0x134d   :  { %v1330_v50 = vpop.permute.xlu1 %1329 }
0x134e   :  { %v1332_v55 = vsel %vm335_vm4, %v1326_v42, %v1330_v50 }
0x1355   :  { %v3336_v48 = vpop.eup %3335 }
0x1356   :  { %v1333_v56 = vmul.f32 %v3336_v48, %v1332_v55 }
0x1358   :  { %v1341_v16 = vrot.slane %v1333_v56, 6  ;;  %v1339_v32 = vsel %vm211_vm3, %v3909_v8, %v1333_v56  ;;  %v1405_v8 = vrot.slane %v1396_v51, %v109_v35 }
0x1359   :  { %v1363_v59 = vsel %vm335_vm4, %v1339_v32, %v1361_v26 }
0x135a   :  { %v1356_v29 = vsel %vm207_vm1, %v1341_v16, %v1343_v57 }
0x135b   :  { %v1357_v28 = vsel %vm209_vm2, %v1356_v29, %v1345_v21 }
0x135c   :  { %v1358_v60 = vsel %vm211_vm3, %v1357_v28, %v1347_v27 }
0x135d   :  { %v1362_v3 = vsel %vm335_vm4, %v3820_v58, %v1358_v60  ;;  %v1573_v58 = vpop.f32.mrb[12].mxu0 }
0x135e   :  { %2883 = vmatmul.mubr.msk.f32.vlgmr.msra.gmra.mrb[8].mxu1 %vm216_vm5, %v1362_v3  ;;  %v1575_v62 = vpop.f32.mrb[13].mxu0 }
0x135f   :  { %1484 = vmatprep.mubr.f32.mxu1 %v3516_v0  ;;  %3121 = vmatpush1.bf16.msra.mxu1 %v3926_v53 }
0x1360   :  { %3123 = vmatprep.subr.bf16.mxu1 %v3931_v13 }
0x1362   :  { %2884 = vmatmul.mubr.msk.f32.gmra.mrb[10].mxu1 %vm216_vm5, %v1363_v59 }
0x1363   :  { %3125 = vmatpush1.bf16.msra.mxu1 %v3933_v1  ;;  %1719 = vmatprep.mubr.f32.mxu1 %v3516_v0 }
0x1364   :  { %3127 = vmatprep.subr.bf16.mxu1 %v3937_v19 }
0x1367   :  { %3129 = vmatpush1.bf16.msra.mxu1 %v3939_v20 }
0x1368   :  { %3131 = vmatprep.subr.bf16.mxu1 %v3944_v36 }
0x136b   :  { %3133 = vmatpush1.bf16.msra.mxu1 %v3946_v38 }
0x136c   :  { %3151 = vmatprep.subr.bf16.mxu1 %v3924_v52 }
0x1431   :  { %v1480_v61 = vpop.f32.mrb[8].mxu1 }
0x1432   :  { %v4001_v63 = vadd.f32 %v1480_v61, %v1401_v4  ;;  %v1482_v2 = vpop.f32.mrb[9].mxu1 }
0x1433   :  { %v4003_v5 = vadd.f32 %v1482_v2, %v1405_v8 }
0x1434   :  { %v1578_v7 = vadd.f32 %v1573_v58, %v4001_v63 }
0x1435   :  { %v1486_v10 = vpop.f32.mrb[10].mxu1 }
0x1436   :  { %v2885_v22 = vmul.f32 -1.442695, %v1578_v7  ;;  %v4006_v11 = vadd.f32 %v1486_v10, %v1401_v4  ;;  %v1488_v12 = vpop.f32.mrb[11].mxu1 }
0x1437   :  { %v1489_v14 = vadd.f32 %v1488_v12, %v1405_v8 }
0x1438   :  { %3337 = vpow2.f32 %v2885_v22 }
0x1439   :  { %v1492_v41 = vrot.slane %v1489_v14, 6  ;;  %v1494_v37 = vrot.slane %v1489_v14, 2 }
0x143b   :  { %v1501_v34 = vsel %vm207_vm1, %v1492_v41, %v1494_v37 }
0x143c   :  { %v1502_v35 = vsel %vm209_vm2, %v1501_v34, %v1492_v41 }
0x143d   :  { %v4011_v15 = vsel %vm211_vm3, %v1502_v35, %v1494_v37 }
0x143e   :  { %v1579_v17 = vadd.f32 %v1575_v62, %v4011_v15 }
0x1440   :  { %v2886_v18 = vmul.f32 -1.442695, %v1579_v17 }
0x1442   :  { %v3338_v23 = vpop.eup %3337  ;;  %3339 = vpow2.f32 %v2886_v18 }
0x1443   :  { %v1586_v24 = vadd.f32 1.0, %v3338_v23 }
0x1445   :  { %3341 = vrcp.f32 %v1586_v24 }
0x144c   :  { %v3340_v25 = vpop.eup %3339 }
0x144d   :  { %v1587_v30 = vadd.f32 1.0, %v3340_v25 }
0x144f   :  { %v3342_v31 = vpop.eup %3341  ;;  %3343 = vrcp.f32 %v1587_v30 }
0x1450   :  { %v1593_v47 = vmul.f32 2.0, %v3342_v31  ;;  %v1592_v46 = vmul.f32 0.0, %v3342_v31 }
0x1452   :  { %v2887_v44 = vadd.f32 -1.0, %v1593_v47 }
0x1454   :  { %1596 = vrot.lane.b32.xlu0 %v2887_v44, %s3517_s4 }
0x1459   :  { %v3344_v6 = vpop.eup %3343 }
0x145a   :  { %v1606_v54 = vmul.f32 2.0, %v3344_v6  ;;  %v1605_v48 = vmul.f32 0.0, %v3344_v6 }
0x145c   :  { %v2888_v33 = vadd.f32 -1.0, %v1606_v54 }
0x145e   :  { %1609 = vrot.lane.b32.xlu1 %v2888_v33, %s3517_s4 }
0x14c6   :  { %v1597_v39 = vpop.permute.xlu0 %1596 }
0x14c7   :  { %v1599_v40 = vmul.f32 %v3342_v31, %v1597_v39 }
0x14c9   :  { %1601 = vrot.lane.b32.xlu0 %v1599_v40, %s3518_s20 }
0x14d0   :  { %v1610_v43 = vpop.permute.xlu1 %1609 }
0x14d1   :  { %v1612_v45 = vmul.f32 %v3344_v6, %v1610_v43 }
0x14d3   :  { %1614 = vrot.lane.b32.xlu1 %v1612_v45, %s3518_s20 }
0x14d7   :  { %1625 = vrot.lane.b32.xlu1 %v3342_v31, %s3518_s20 }
0x153b   :  { %v1602_v49 = vpop.permute.xlu0 %1601 }
0x153c   :  { %v1604_v50 = vadd.f32 %v1602_v49, %v1592_v46 }
0x153e   :  { %1619 = vrot.lane.b32.xlu0 %v1604_v50, %s3519_s21  ;;  %v1746_v17 = vrot.slane %v1604_v50, 6 }
0x1542   :  { %1629 = vrot.lane.b32.xlu0 %v3344_v6, %s3517_s4 }
0x1545   :  { %v1615_v42 = vpop.permute.xlu1 %1614 }
0x1546   :  { %v1617_v55 = vadd.f32 %v1615_v42, %v1605_v48 }
0x1548   :  { %v1762_v25 = vrot.slane %v1617_v55, 6 }
0x1549   :  { %v1626_v16 = vpop.permute.xlu1 %1625 }
0x15b0   :  { %v1620_v9 = vpop.permute.xlu0 %1619 }
0x15b1   :  { %v1622_v56 = vsel %vm335_vm4, %v1620_v9, %v1617_v55 }
0x15b2   :  { %3345 = vtanh.f32 %v1622_v56 }
0x15b4   :  { %v1630_v57 = vpop.permute.xlu0 %1629 }
0x15b5   :  { %v1632_v26 = vsel %vm335_vm4, %v1626_v16, %v1630_v57 }
0x15bc   :  { %v3346_v32 = vpop.eup %3345 }
0x15bd   :  { %v4023_v21 = vmul.f32 %v3346_v32, %v1632_v26 }
0x15bf   :  { %2889 = vmatmul.mubr.msk.f32.vlgmr.msra.gmra.mrb[12].mxu1 %vm216_vm5, %v4023_v21 }
0x15c0   :  { %3153 = vmatpush1.bf16.msra.mxu1 %v3926_v53  ;;  %2031 = vmatprep.mubr.f32.mxu1 %v3516_v0 }
0x15c1   :  { %3155 = vmatprep.subr.bf16.mxu1 %v3931_v13 }
0x15c4   :  { %3157 = vmatpush1.bf16.msra.mxu1 %v3933_v1 }
0x15c5   :  { %3159 = vmatprep.subr.bf16.mxu1 %v3937_v19 }
0x15c8   :  { %3161 = vmatpush1.bf16.msra.mxu1 %v3939_v20 }
0x15c9   :  { %3163 = vmatprep.subr.bf16.mxu1 %v3944_v36 }
0x15cc   :  { %3165 = vmatpush1.bf16.msra.mxu1 %v3946_v38 }
0x15cd   :  { %3183 = vmatprep.subr.bf16.mxu1 %v3924_v52 }
0x1692   :  { %v1721_v59 = vpop.f32.mrb[12].mxu1 }
0x1693   :  { %v1728_v27 = vrot.slane %v1721_v59, 6  ;;  %v1723_v29 = vpop.f32.mrb[13].mxu1 }
0x1694   :  { %v1729_v28 = vrot.slane %v1723_v29, 6 }
0x1695   :  { %v1732_v60 = vadd.f32 %v1728_v27, %v4001_v63 }
0x1696   :  { %v1733_v3 = vadd.f32 %v1729_v28, %v4011_v15 }
0x1697   :  { %v2890_v58 = vmul.f32 -1.442695, %v1732_v60 }
0x1698   :  { %v2891_v62 = vmul.f32 -1.442695, %v1733_v3 }
0x1699   :  { %3347 = vpow2.f32 %v2890_v58 }
0x169a   :  { %3349 = vpow2.f32 %v2891_v62 }
0x16a3   :  { %v3348_v51 = vpop.eup %3347 }
0x16a4   :  { %v3350_v4 = vpop.eup %3349  ;;  %v1740_v8 = vadd.f32 1.0, %v3348_v51 }
0x16a5   :  { %v1741_v61 = vadd.f32 1.0, %v3350_v4 }
0x16a6   :  { %3351 = vrcp.f32 %v1740_v8 }
0x16a7   :  { %3353 = vrcp.f32 %v1741_v61 }
0x16b0   :  { %v3352_v2 = vpop.eup %3351 }
0x16b1   :  { %v3354_v7 = vpop.eup %3353  ;;  %v1749_v10 = vmul.f32 2.0, %v3352_v2  ;;  %v1748_v18 = vmul.f32 %v3352_v2, %v1746_v17 }
0x16b2   :  { %v1765_v22 = vmul.f32 2.0, %v3354_v7  ;;  %v1764_v31 = vmul.f32 %v3354_v7, %v1762_v25 }
0x16b3   :  { %v2892_v12 = vadd.f32 -1.0, %v1749_v10 }
0x16b4   :  { %v2893_v14 = vadd.f32 -1.0, %v1765_v22 }
0x16b5   :  { %1752 = vrot.lane.b32.xlu1 %v2892_v12, %s3517_s4 }
0x16b6   :  { %1768 = vrot.lane.b32.xlu0 %v2893_v14, %s3517_s4 }
0x1727   :  { %v1753_v41 = vpop.permute.xlu1 %1752 }
0x1728   :  { %v1755_v37 = vmul.f32 %v3352_v2, %v1753_v41  ;;  %v1769_v34 = vpop.permute.xlu0 %1768 }
0x1729   :  { %v1771_v35 = vmul.f32 %v3354_v7, %v1769_v34 }
0x172a   :  { %1757 = vrot.lane.b32.xlu1 %v1755_v37, %s3518_s20 }
0x172b   :  { %1773 = vrot.lane.b32.xlu0 %v1771_v35, %s3518_s20 }
0x172f   :  { %1784 = vrot.lane.b32.xlu0 %v3352_v2, %s3518_s20 }
0x179c   :  { %v1758_v23 = vpop.permute.xlu1 %1757 }
0x179d   :  { %v1760_v24 = vadd.f32 %v1758_v23, %v1748_v18  ;;  %v1774_v30 = vpop.permute.xlu0 %1773 }
0x179e   :  { %v1776_v47 = vadd.f32 %v1774_v30, %v1764_v31 }
0x179f   :  { %1778 = vrot.lane.b32.xlu1 %v1760_v24, %s3519_s21  ;;  %v1902_v8 = vrot.slane %v1760_v24, 6 }
0x17a0   :  { %v1918_v10 = vrot.slane %v1776_v47, 6 }
0x17a1   :  { %v1785_v33 = vpop.permute.xlu0 %1784 }
0x17a3   :  { %1788 = vrot.lane.b32.xlu1 %v3354_v7, %s3517_s4 }
0x1811   :  { %v1779_v44 = vpop.permute.xlu1 %1778 }
0x1812   :  { %v1781_v6 = vsel %vm335_vm4, %v1779_v44, %v1776_v47 }
0x1813   :  { %3355 = vtanh.f32 %v1781_v6 }
0x1815   :  { %v1789_v54 = vpop.permute.xlu1 %1788 }
0x1816   :  { %v1791_v40 = vsel %vm335_vm4, %v1785_v33, %v1789_v54 }
0x181d   :  { %v3356_v39 = vpop.eup %3355 }
0x181e   :  { %v4047_v43 = vmul.f32 %v3356_v39, %v1791_v40 }
0x1820   :  { %v1808_v45 = vrot.slane %v4047_v43, 2 }
0x1822   :  { %2894 = vmatmul.mubr.msk.f32.vlgmr.msra.gmra.mrb[14].mxu0 %vm216_vm5, %v1808_v45 }
0x1823   :  { %3169 = vmatpush1.bf16.msra.mxu0 %v3926_v53  ;;  %2186 = vmatprep.mubr.f32.mxu0 %v3516_v0 }
0x1824   :  { %3171 = vmatprep.subr.bf16.mxu0 %v3931_v13 }
0x1827   :  { %3173 = vmatpush1.bf16.msra.mxu0 %v3933_v1 }
0x1828   :  { %3175 = vmatprep.subr.bf16.mxu0 %v3937_v19 }
0x182b   :  { %3177 = vmatpush1.bf16.msra.mxu0 %v3939_v20 }
0x182c   :  { %3179 = vmatprep.subr.bf16.mxu0 %v3944_v36 }
0x182f   :  { %3181 = vmatpush1.bf16.msra.mxu0 %v3946_v38 }
0x1830   :  { %3199 = vmatprep.subr.bf16.mxu0 %v3924_v52 }
0x18f5   :  { %v1877_v46 = vpop.f32.mrb[14].mxu0 }
0x18f6   :  { %v1884_v49 = vrot.slane %v1877_v46, 4  ;;  %v1879_v50 = vpop.f32.mrb[15].mxu0 }
0x18f7   :  { %v1885_v42 = vrot.slane %v1879_v50, 4 }
0x18f8   :  { %v1888_v48 = vadd.f32 %v1884_v49, %v4001_v63 }
0x18f9   :  { %v1889_v55 = vadd.f32 %v1885_v42, %v4011_v15 }
0x18fa   :  { %v2895_v9 = vmul.f32 -1.442695, %v1888_v48 }
0x18fb   :  { %v2896_v56 = vmul.f32 -1.442695, %v1889_v55 }
0x18fc   :  { %3357 = vpow2.f32 %v2895_v9 }
0x18fd   :  { %3359 = vpow2.f32 %v2896_v56 }
0x1906   :  { %v3358_v57 = vpop.eup %3357 }
0x1907   :  { %v3360_v16 = vpop.eup %3359  ;;  %v1896_v32 = vadd.f32 1.0, %v3358_v57 }
0x1908   :  { %v1897_v26 = vadd.f32 1.0, %v3360_v16 }
0x1909   :  { %3361 = vrcp.f32 %v1896_v32 }
0x190a   :  { %3363 = vrcp.f32 %v1897_v26 }
0x1913   :  { %v3362_v59 = vpop.eup %3361 }
0x1914   :  { %v3364_v27 = vpop.eup %3363  ;;  %v1905_v29 = vmul.f32 2.0, %v3362_v59  ;;  %v1904_v61 = vmul.f32 %v3362_v59, %v1902_v8 }
0x1915   :  { %v1921_v28 = vmul.f32 2.0, %v3364_v27  ;;  %v1920_v12 = vmul.f32 %v3364_v27, %v1918_v10 }
0x1916   :  { %v2897_v60 = vadd.f32 -1.0, %v1905_v29 }
0x1917   :  { %v2898_v3 = vadd.f32 -1.0, %v1921_v28 }
0x1918   :  { %1908 = vrot.lane.b32.xlu0 %v2897_v60, %s3517_s4 }
0x1919   :  { %1924 = vrot.lane.b32.xlu1 %v2898_v3, %s3517_s4 }
0x198a   :  { %v1909_v58 = vpop.permute.xlu0 %1908 }
0x198b   :  { %v1911_v62 = vmul.f32 %v3362_v59, %v1909_v58  ;;  %v1925_v51 = vpop.permute.xlu1 %1924 }
0x198c   :  { %v1927_v4 = vmul.f32 %v3364_v27, %v1925_v51 }
0x198d   :  { %1913 = vrot.lane.b32.xlu0 %v1911_v62, %s3518_s20 }
0x198e   :  { %1929 = vrot.lane.b32.xlu1 %v1927_v4, %s3518_s20 }
0x1992   :  { %1940 = vrot.lane.b32.xlu1 %v3362_v59, %s3518_s20 }
0x19ff   :  { %v1914_v2 = vpop.permute.xlu0 %1913 }
0x1a00   :  { %v1916_v7 = vadd.f32 %v1914_v2, %v1904_v61  ;;  %v1930_v22 = vpop.permute.xlu1 %1929  ;;  %v1497_v2 = vrot.slane %v4003_v5, 6 }
0x1a01   :  { %v1932_v14 = vadd.f32 %v1930_v22, %v1920_v12 }
0x1a02   :  { %1934 = vrot.lane.b32.xlu0 %v1916_v7, %s3519_s21  ;;  %v2058_v57 = vrot.slane %v1916_v7, 6  ;;  %v1499_v7 = vrot.slane %v4003_v5, 2 }
0x1a03   :  { %v2074_v59 = vrot.slane %v1932_v14, 6 }
0x1a04   :  { %v1941_v35 = vpop.permute.xlu1 %1940  ;;  %v1504_v10 = vsel %vm207_vm1, %v1497_v2, %v1499_v7 }
0x1a05   :  { %v1505_v22 = vsel %vm209_vm2, %v1504_v10, %v1497_v2 }
0x1a06   :  { %1944 = vrot.lane.b32.xlu0 %v3364_v27, %s3517_s4 }
0x1a74   :  { %v1935_v41 = vpop.permute.xlu0 %1934 }
0x1a75   :  { %v1937_v37 = vsel %vm335_vm4, %v1935_v41, %v1932_v14  ;;  %v4115_v41 = vsel %vm211_vm3, %v1505_v22, %v1499_v7 }
0x1a76   :  { %3365 = vtanh.f32 %v1937_v37 }
0x1a78   :  { %v1945_v34 = vpop.permute.xlu0 %1944 }
0x1a79   :  { %v1947_v18 = vsel %vm335_vm4, %v1941_v35, %v1945_v34 }
0x1a80   :  { %v3366_v17 = vpop.eup %3365 }
0x1a81   :  { %v4071_v23 = vmul.f32 %v3366_v17, %v1947_v18 }
0x1a83   :  { %v1964_v24 = vrot.slane %v4071_v23, 4 }
0x1a85   :  { %2899 = vmatmul.mubr.msk.f32.vlgmr.msra.gmra.mrb[14].mxu1 %vm216_vm5, %v1964_v24 }
0x1a86   :  { %3185 = vmatpush1.bf16.msra.mxu1 %v3926_v53  ;;  %2329 = vmatprep.mubr.f32.mxu1 %v3516_v0 }
0x1a87   :  { %3187 = vmatprep.subr.bf16.mxu1 %v3931_v13 }
0x1a8a   :  { %3189 = vmatpush1.bf16.msra.mxu1 %v3933_v1 }
0x1a8b   :  { %3191 = vmatprep.subr.bf16.mxu1 %v3937_v19 }
0x1a8e   :  { %3193 = vmatpush1.bf16.msra.mxu1 %v3939_v20 }
0x1a8f   :  { %3195 = vmatprep.subr.bf16.mxu1 %v3944_v36 }
0x1a92   :  { %3197 = vmatpush1.bf16.msra.mxu1 %v3946_v38 }
0x1a93   :  { %3215 = vmatprep.subr.bf16.mxu1 %v3924_v52 }
0x1b58   :  { %v2033_v25 = vpop.f32.mrb[14].mxu1 }
0x1b59   :  { %v2040_v30 = vrot.slane %v2033_v25, 2  ;;  %v2035_v31 = vpop.f32.mrb[15].mxu1 }
0x1b5a   :  { %v2041_v47 = vrot.slane %v2035_v31, 2 }
0x1b5b   :  { %v2044_v44 = vadd.f32 %v2040_v30, %v4001_v63 }
0x1b5c   :  { %v2045_v6 = vadd.f32 %v2041_v47, %v4011_v15 }
0x1b5d   :  { %v2900_v54 = vmul.f32 -1.442695, %v2044_v44 }
0x1b5e   :  { %v2901_v33 = vmul.f32 -1.442695, %v2045_v6 }
0x1b5f   :  { %3367 = vpow2.f32 %v2900_v54 }
0x1b60   :  { %3369 = vpow2.f32 %v2901_v33 }
0x1b69   :  { %v3368_v39 = vpop.eup %3367 }
0x1b6a   :  { %v3370_v40 = vpop.eup %3369  ;;  %v2052_v45 = vadd.f32 1.0, %v3368_v39 }
0x1b6b   :  { %v2053_v46 = vadd.f32 1.0, %v3370_v40 }
0x1b6c   :  { %3371 = vrcp.f32 %v2052_v45 }
0x1b6d   :  { %3373 = vrcp.f32 %v2053_v46 }
0x1b76   :  { %v3372_v49 = vpop.eup %3371 }
0x1b77   :  { %v3374_v52 = vpop.eup %3373  ;;  %v2061_v50 = vmul.f32 2.0, %v3372_v49  ;;  %v2060_v16 = vmul.f32 %v3372_v49, %v2058_v57 }
0x1b78   :  { %v2077_v42 = vmul.f32 2.0, %v3374_v52  ;;  %v2076_v29 = vmul.f32 %v3374_v52, %v2074_v59 }
0x1b79   :  { %v2902_v48 = vadd.f32 -1.0, %v2061_v50 }
0x1b7a   :  { %v2903_v55 = vadd.f32 -1.0, %v2077_v42 }
0x1b7b   :  { %2064 = vrot.lane.b32.xlu1 %v2902_v48, %s3517_s4 }
0x1b7c   :  { %2080 = vrot.lane.b32.xlu0 %v2903_v55, %s3517_s4 }
0x1bed   :  { %v2065_v63 = vpop.permute.xlu1 %2064 }
0x1bee   :  { %v2067_v15 = vmul.f32 %v3372_v49, %v2065_v63  ;;  %v2081_v9 = vpop.permute.xlu0 %2080 }
0x1bef   :  { %v2083_v56 = vmul.f32 %v3374_v52, %v2081_v9 }
0x1bf0   :  { %2069 = vrot.lane.b32.xlu1 %v2067_v15, %s3518_s20 }
0x1bf1   :  { %2085 = vrot.lane.b32.xlu0 %v2083_v56, %s3518_s20 }
0x1bf5   :  { %2096 = vrot.lane.b32.xlu0 %v3372_v49, %s3518_s20 }
0x1c62   :  { %v2070_v32 = vpop.permute.xlu1 %2069 }
0x1c63   :  { %v2072_v26 = vadd.f32 %v2070_v32, %v2060_v16  ;;  %v2086_v27 = vpop.permute.xlu0 %2085 }
0x1c64   :  { %v2088_v28 = vadd.f32 %v2086_v27, %v2076_v29 }
0x1c65   :  { %2090 = vrot.lane.b32.xlu1 %v2072_v26, %s3519_s21  ;;  %v2207_v46 = vrot.slane %v2072_v26, 6 }
0x1c66   :  { %v2223_v42 = vrot.slane %v2088_v28, 6 }
0x1c67   :  { %v2097_v62 = vpop.permute.xlu0 %2096 }
0x1c69   :  { %2100 = vrot.lane.b32.xlu1 %v3374_v52, %s3517_s4 }
0x1cd7   :  { %v2091_v60 = vpop.permute.xlu1 %2090 }
0x1cd8   :  { %v2093_v3 = vsel %vm335_vm4, %v2091_v60, %v2088_v28 }
0x1cd9   :  { %3375 = vtanh.f32 %v2093_v3 }
0x1cdb   :  { %v2101_v58 = vpop.permute.xlu1 %2100 }
0x1cdc   :  { %v2103_v4 = vsel %vm335_vm4, %v2097_v62, %v2101_v58 }
0x1ce3   :  { %v3376_v51 = vpop.eup %3375 }
0x1ce4   :  { %v4095_v8 = vmul.f32 %v3376_v51, %v2103_v4 }
0x1ce6   :  { %v2111_v61 = vrot.slane %v4095_v8, 6 }
0x1ce8   :  { %2904 = vmatmul.mubr.msk.f32.vlgmr.msra.gmra.mrb[16].mxu0 %vm216_vm5, %v2111_v61 }
0x1ce9   :  { %3201 = vmatpush1.bf16.msra.mxu0 %v3926_v53  ;;  %2485 = vmatprep.mubr.f32.mxu0 %v3516_v0 }
0x1cea   :  { %3203 = vmatprep.subr.bf16.mxu0 %v3931_v13 }
0x1ced   :  { %3205 = vmatpush1.bf16.msra.mxu0 %v3933_v1 }
0x1cee   :  { %3207 = vmatprep.subr.bf16.mxu0 %v3937_v19 }
0x1cf1   :  { %3209 = vmatpush1.bf16.msra.mxu0 %v3939_v20 }
0x1cf2   :  { %3211 = vmatprep.subr.bf16.mxu0 %v3944_v36 }
0x1cf5   :  { %3213 = vmatpush1.bf16.msra.mxu0 %v3946_v38 }
0x1dbb   :  { %v2188_v12 = vpop.f32.mrb[16].mxu0 }
0x1dbc   :  { %v2193_v14 = vadd.f32 %v2188_v12, %v4006_v11  ;;  %v2190_v37 = vpop.f32.mrb[17].mxu0 }
0x1dbd   :  { %v2194_v34 = vadd.f32 %v2190_v37, %v4115_v41 }
0x1dbe   :  { %v2905_v35 = vmul.f32 -1.442695, %v2193_v14 }
0x1dbf   :  { %v2906_v17 = vmul.f32 -1.442695, %v2194_v34 }
0x1dc0   :  { %3377 = vpow2.f32 %v2905_v35 }
0x1dc1   :  { %3379 = vpow2.f32 %v2906_v17 }
0x1dca   :  { %v3378_v18 = vpop.eup %3377 }
0x1dcb   :  { %v3380_v24 = vpop.eup %3379  ;;  %v2201_v5 = vadd.f32 1.0, %v3378_v18 }
0x1dcc   :  { %v2202_v25 = vadd.f32 1.0, %v3380_v24 }
0x1dcd   :  { %3381 = vrcp.f32 %v2201_v5 }
0x1dce   :  { %3383 = vrcp.f32 %v2202_v25 }
0x1dd7   :  { %v3382_v30 = vpop.eup %3381 }
0x1dd8   :  { %v3384_v31 = vpop.eup %3383  ;;  %v2210_v47 = vmul.f32 2.0, %v3382_v30  ;;  %v2209_v49 = vmul.f32 %v3382_v30, %v2207_v46 }
0x1dd9   :  { %v2226_v44 = vmul.f32 2.0, %v3384_v31  ;;  %v2225_v55 = vmul.f32 %v3384_v31, %v2223_v42 }
0x1dda   :  { %v2907_v6 = vadd.f32 -1.0, %v2210_v47 }
0x1ddb   :  { %v2908_v54 = vadd.f32 -1.0, %v2226_v44 }
0x1ddc   :  { %2213 = vrot.lane.b32.xlu0 %v2907_v6, %s3517_s4 }
0x1ddd   :  { %2229 = vrot.lane.b32.xlu1 %v2908_v54, %s3517_s4 }
0x1e4e   :  { %v2214_v33 = vpop.permute.xlu0 %2213 }
0x1e4f   :  { %v2216_v39 = vmul.f32 %v3382_v30, %v2214_v33  ;;  %v2230_v40 = vpop.permute.xlu1 %2229 }
0x1e50   :  { %v2232_v45 = vmul.f32 %v3384_v31, %v2230_v40 }
0x1e51   :  { %2218 = vrot.lane.b32.xlu0 %v2216_v39, %s3518_s20 }
0x1e52   :  { %2234 = vrot.lane.b32.xlu1 %v2232_v45, %s3518_s20 }
0x1e56   :  { %2245 = vrot.lane.b32.xlu1 %v3382_v30, %s3518_s20 }
0x1ec3   :  { %v2219_v52 = vpop.permute.xlu0 %2218 }
0x1ec4   :  { %v2221_v50 = vadd.f32 %v2219_v52, %v2209_v49  ;;  %v2235_v48 = vpop.permute.xlu1 %2234 }
0x1ec5   :  { %v2237_v63 = vadd.f32 %v2235_v48, %v2225_v55 }
0x1ec6   :  { %2239 = vrot.lane.b32.xlu0 %v2221_v50, %s3519_s21  ;;  %v2356_v14 = vrot.slane %v2221_v50, 6 }
0x1ec7   :  { %v2372_v17 = vrot.slane %v2237_v63, 6 }
0x1ec8   :  { %v2246_v57 = vpop.permute.xlu1 %2245 }
0x1eca   :  { %2249 = vrot.lane.b32.xlu0 %v3384_v31, %s3517_s4 }
0x1f38   :  { %v2240_v15 = vpop.permute.xlu0 %2239 }
0x1f39   :  { %v2242_v9 = vsel %vm335_vm4, %v2240_v15, %v2237_v63 }
0x1f3a   :  { %3385 = vtanh.f32 %v2242_v9 }
0x1f3c   :  { %v2250_v56 = vpop.permute.xlu0 %2249 }
0x1f3d   :  { %v2252_v32 = vsel %vm335_vm4, %v2246_v57, %v2250_v56 }
0x1f44   :  { %v3386_v16 = vpop.eup %3385 }
0x1f45   :  { %v4127_v26 = vmul.f32 %v3386_v16, %v2252_v32 }
0x1f47   :  { %2909 = vmatmul.mubr.msk.f32.vlgmr.msra.gmra.mrb[16].mxu1 %vm216_vm5, %v4127_v26 }
0x1f48   :  { %3217 = vmatpush1.bf16.msra.mxu1 %v3926_v53  ;;  %2641 = vmatprep.mubr.f32.mxu1 %v3516_v0 }
0x1f49   :  { %3219 = vmatprep.subr.bf16.mxu1 %v3931_v13 }
0x1f4c   :  { %3221 = vmatpush1.bf16.msra.mxu1 %v3933_v1 }
0x1f4d   :  { %3223 = vmatprep.subr.bf16.mxu1 %v3937_v19 }
0x1f50   :  { %3225 = vmatpush1.bf16.msra.mxu1 %v3939_v20 }
0x1f51   :  { %3227 = vmatprep.subr.bf16.mxu1 %v3944_v36 }
0x1f54   :  { %3229 = vmatpush1.bf16.msra.mxu1 %v3946_v38 }
0x201a   :  { %v2331_v59 = vpop.f32.mrb[16].mxu1 }
0x201b   :  { %v2338_v27 = vrot.slane %v2331_v59, 6  ;;  %v2333_v29 = vpop.f32.mrb[17].mxu1 }
0x201c   :  { %v2339_v28 = vrot.slane %v2333_v29, 6 }
0x201d   :  { %v2342_v53 = vadd.f32 %v2338_v27, %v4006_v11 }
0x201e   :  { %v2343_v60 = vadd.f32 %v2339_v28, %v4115_v41 }
0x201f   :  { %v2910_v3 = vmul.f32 -1.442695, %v2342_v53 }
0x2020   :  { %v2911_v13 = vmul.f32 -1.442695, %v2343_v60 }
0x2021   :  { %3387 = vpow2.f32 %v2910_v3 }
0x2022   :  { %3389 = vpow2.f32 %v2911_v13 }
0x202b   :  { %v3388_v1 = vpop.eup %3387 }
0x202c   :  { %v3390_v19 = vpop.eup %3389  ;;  %v2350_v58 = vadd.f32 1.0, %v3388_v1 }
0x202d   :  { %v2351_v20 = vadd.f32 1.0, %v3390_v19 }
0x202e   :  { %3391 = vrcp.f32 %v2350_v58 }
0x202f   :  { %3393 = vrcp.f32 %v2351_v20 }
0x2038   :  { %v3392_v36 = vpop.eup %3391 }
0x2039   :  { %v3394_v38 = vpop.eup %3393  ;;  %v2359_v62 = vmul.f32 2.0, %v3392_v36  ;;  %v2358_v37 = vmul.f32 %v3392_v36, %v2356_v14 }
0x203a   :  { %v2375_v51 = vmul.f32 2.0, %v3394_v38  ;;  %v2374_v24 = vmul.f32 %v3394_v38, %v2372_v17 }
0x203b   :  { %v2912_v4 = vadd.f32 -1.0, %v2359_v62 }
0x203c   :  { %v2913_v2 = vadd.f32 -1.0, %v2375_v51 }
0x203d   :  { %2362 = vrot.lane.b32.xlu1 %v2912_v4, %s3517_s4 }
0x203e   :  { %2378 = vrot.lane.b32.xlu0 %v2913_v2, %s3517_s4 }
0x20af   :  { %v2363_v7 = vpop.permute.xlu1 %2362 }
0x20b0   :  { %v2365_v10 = vmul.f32 %v3392_v36, %v2363_v7  ;;  %v2379_v22 = vpop.permute.xlu0 %2378 }
0x20b1   :  { %v2381_v12 = vmul.f32 %v3394_v38, %v2379_v22 }
0x20b2   :  { %2367 = vrot.lane.b32.xlu1 %v2365_v10, %s3518_s20 }
0x20b3   :  { %2383 = vrot.lane.b32.xlu0 %v2381_v12, %s3518_s20 }
0x20b7   :  { %2394 = vrot.lane.b32.xlu0 %v3392_v36, %s3518_s20 }
0x2124   :  { %v2368_v34 = vpop.permute.xlu1 %2367 }
0x2125   :  { %v2370_v35 = vadd.f32 %v2368_v34, %v2358_v37  ;;  %v2384_v18 = vpop.permute.xlu0 %2383 }
0x2126   :  { %v2386_v5 = vadd.f32 %v2384_v18, %v2374_v24 }
0x2127   :  { %2388 = vrot.lane.b32.xlu1 %v2370_v35, %s3519_s21  ;;  %v2512_v60 = vrot.slane %v2370_v35, 6 }
0x2128   :  { %v2528_v19 = vrot.slane %v2386_v5, 6 }
0x2129   :  { %v2395_v47 = vpop.permute.xlu0 %2394 }
0x212b   :  { %2398 = vrot.lane.b32.xlu1 %v3394_v38, %s3517_s4 }
0x2199   :  { %v2389_v25 = vpop.permute.xlu1 %2388 }
0x219a   :  { %v2391_v30 = vsel %vm335_vm4, %v2389_v25, %v2386_v5 }
0x219b   :  { %3395 = vtanh.f32 %v2391_v30 }
0x219d   :  { %v2399_v31 = vpop.permute.xlu1 %2398 }
0x219e   :  { %v2401_v6 = vsel %vm335_vm4, %v2395_v47, %v2399_v31 }
0x21a5   :  { %v3396_v44 = vpop.eup %3395 }
0x21a6   :  { %v4150_v54 = vmul.f32 %v3396_v44, %v2401_v6  ;;  %v3520_v44 = vmov 0  }
0x21a7   :  { %3255 = vset.pattern.permute.xlu0 %v3520_v44  ;;  %3256 = vset.pattern.permute.xlu1 %v3520_v44 }
0x21a8   :  { %v2418_v33 = vrot.slane %v4150_v54, 2 }
0x21aa   :  { %2914 = vmatmul.mubr.msk.f32.vlgmr.msra.gmra.mrb[18].mxu0 %vm216_vm5, %v2418_v33 }
0x21ab   :  { %2951 = vmatprep.mubr.msk.f32.mxu0 %vm3522_vm6, %v3516_v0 }
0x227d   :  { %v2487_v39 = vpop.f32.mrb[18].mxu0 }
0x227e   :  { %v2494_v40 = vrot.slane %v2487_v39, 4  ;;  %v2489_v45 = vpop.f32.mrb[19].mxu0 }
0x227f   :  { %v2495_v46 = vrot.slane %v2489_v45, 4 }
0x2280   :  { %v2498_v49 = vadd.f32 %v2494_v40, %v4006_v11 }
0x2281   :  { %v2499_v52 = vadd.f32 %v2495_v46, %v4115_v41 }
0x2282   :  { %v2915_v50 = vmul.f32 -1.442695, %v2498_v49 }
0x2283   :  { %v2916_v42 = vmul.f32 -1.442695, %v2499_v52  ;;  %v78_v52 = vld [vmem:[%s4261_s1 + $0x8] sm:$0xff] }
0x2284   :  { %3397 = vpow2.f32 %v2915_v50  ;;  %v1647_v50 = vrot.slane %v4023_v21, 2 }
0x2285   :  { %3399 = vpow2.f32 %v2916_v42  ;;  %v2409_v42 = vrot.slane %v4150_v54, 6 }
0x228e   :  { %v3398_v48 = vpop.eup %3397 }
0x228f   :  { %v3400_v55 = vpop.eup %3399  ;;  %v2506_v63 = vadd.f32 1.0, %v3398_v48 }
0x2290   :  { %v2507_v15 = vadd.f32 1.0, %v3400_v55 }
0x2291   :  { %3401 = vrcp.f32 %v2506_v63 }
0x2292   :  { %3403 = vrcp.f32 %v2507_v15 }
0x229b   :  { %v3402_v9 = vpop.eup %3401 }
0x229c   :  { %v3404_v56 = vpop.eup %3403  ;;  %v2515_v57 = vmul.f32 2.0, %v3402_v9  ;;  %v2514_v3 = vmul.f32 %v3402_v9, %v2512_v60 }
0x229d   :  { %v2531_v16 = vmul.f32 2.0, %v3404_v56  ;;  %v2530_v20 = vmul.f32 %v3404_v56, %v2528_v19  ;;  %v2736_v19 = vld [vmem:[%s4268_s8] sm:$0xff] }
0x229e   :  { %v2917_v32 = vadd.f32 -1.0, %v2515_v57  ;;  %v2257_v57 = vrot.slane %v4127_v26, 2 }
0x229f   :  { %v2918_v59 = vadd.f32 -1.0, %v2531_v16 }
0x22a0   :  { %2518 = vrot.lane.b32.xlu0 %v2917_v32, %s3517_s4 }
0x22a1   :  { %2534 = vrot.lane.b32.xlu1 %v2918_v59, %s3517_s4 }
0x2312   :  { %v2519_v27 = vpop.permute.xlu0 %2518 }
0x2313   :  { %v2521_v29 = vmul.f32 %v3402_v9, %v2519_v27  ;;  %v2535_v28 = vpop.permute.xlu1 %2534 }
0x2314   :  { %v2537_v53 = vmul.f32 %v3404_v56, %v2535_v28 }
0x2315   :  { %2523 = vrot.lane.b32.xlu0 %v2521_v29, %s3518_s20 }
0x2316   :  { %2539 = vrot.lane.b32.xlu1 %v2537_v53, %s3518_s20 }
0x231a   :  { %2550 = vrot.lane.b32.xlu1 %v3402_v9, %s3518_s20  ;;  %v1799_v9 = vrot.slane %v4047_v43, 6 }
0x2387   :  { %v2524_v13 = vpop.permute.xlu0 %2523 }
0x2388   :  { %v2526_v1 = vadd.f32 %v2524_v13, %v2514_v3  ;;  %v2540_v58 = vpop.permute.xlu1 %2539 }
0x2389   :  { %v4163_v36 = vadd.f32 %v2540_v58, %v2530_v20  ;;  %v2737_v58 = vld [vmem:[%s4268_s8 + $0x8] sm:$0xff]  ;;  %v2738_v20 = vld [vmem:[%s4268_s8 + $0x10] sm:$0xff] }
0x238a   :  { %2544 = vrot.lane.b32.xlu0 %v2526_v1, %s3519_s21  ;;  %v2668_v48 = vrot.slane %v2526_v1, 6 }
0x238b   :  { %v2684_v32 = vrot.slane %v4163_v36, 6 }
0x238c   :  { %v2551_v4 = vpop.permute.xlu1 %2550 }
0x238e   :  { %2554 = vrot.lane.b32.xlu0 %v3404_v56, %s3517_s4  ;;  %v1955_v56 = vrot.slane %v4071_v23, 2 }
0x23fc   :  { %v2545_v38 = vpop.permute.xlu0 %2544 }
0x23fd   :  { %v2547_v62 = vsel %vm335_vm4, %v2545_v38, %v4163_v36  ;;  %v3521_v38 = vmov 0.0|0.0  }
0x23fe   :  { %3405 = vtanh.f32 %v2547_v62  ;;  %3230 = vmatprep.subr.bf16.mxu0 %v3521_v38  ;;  %v3231_v62 = vpack.c.bf16 %v2737_v58, %v2736_v19 }
0x2400   :  { %v2555_v51 = vpop.permute.xlu0 %2554  ;;  %3232 = vmatpush3.bf16.msra.mxu0 %v3231_v62 }
0x2401   :  { %v2557_v7 = vsel %vm335_vm4, %v2551_v4, %v2555_v51  ;;  %v2739_v51 = vld [vmem:[%s4268_s8 + $0x18] sm:$0xff]  ;;  %3233 = vmatprep.subr.bf16.mxu0 %v3521_v38 }
0x2408   :  { %v3406_v2 = vpop.eup %3405 }
0x2409   :  { %v4168_v10 = vmul.f32 %v3406_v2, %v2557_v7  ;;  %v3234_v2 = vpack.c.bf16 %v2739_v51, %v2738_v20  ;;  %v2740_v7 = vld [vmem:[%s4268_s8 + $0x20] sm:$0xff] }
0x240b   :  { %v2574_v22 = vrot.slane %v4168_v10, 4  ;;  %v2565_v16 = vrot.slane %v4168_v10, 2  ;;  %3235 = vmatpush3.bf16.msra.mxu0 %v3234_v2 }
0x240c   :  { %3236 = vmatprep.subr.bf16.mxu0 %v3521_v38 }
0x240d   :  { %2919 = vmatmul.mubr.msk.f32.vlgmr.msra.gmra.mrb[18].mxu1 %vm216_vm5, %v2574_v22  ;;  %v2741_v22 = vld [vmem:[%s4268_s8 + $0x28] sm:$0xff] }
0x24e0   :  { %v2643_v12 = vpop.f32.mrb[18].mxu1 }
0x24e1   :  { %v2650_v14 = vrot.slane %v2643_v12, 2  ;;  %v2645_v37 = vpop.f32.mrb[19].mxu1  ;;  %v3237_v12 = vpack.c.bf16 %v2741_v22, %v2740_v7 }
0x24e2   :  { %v2651_v34 = vrot.slane %v2645_v37, 2  ;;  %v2743_v37 = vld [vmem:[%s4268_s8 + $0x38] sm:$0xff] }
0x24e3   :  { %v2654_v35 = vadd.f32 %v2650_v14, %v4006_v11  ;;  %v2742_v14 = vld [vmem:[%s4268_s8 + $0x30] sm:$0xff]  ;;  %3238 = vmatpush3.bf16.msra.mxu0 %v3237_v12 }
0x24e4   :  { %v2655_v17 = vadd.f32 %v2651_v34, %v4115_v41  ;;  %v3240_v34 = vpack.c.bf16 %v2743_v37, %v2742_v14  ;;  %3239 = vmatprep.subr.bf16.mxu0 %v3521_v38 }
0x24e5   :  { %v2920_v18 = vmul.f32 -1.442695, %v2654_v35 }
0x24e6   :  { %v2921_v24 = vmul.f32 -1.442695, %v2655_v17 }
0x24e7   :  { %3407 = vpow2.f32 %v2920_v18  ;;  %3241 = vmatpush3.bf16.msra.mxu0 %v3240_v34 }
0x24e8   :  { %3409 = vpow2.f32 %v2921_v24 }
0x24f1   :  { %v3408_v5 = vpop.eup %3407 }
0x24f2   :  { %v3410_v25 = vpop.eup %3409  ;;  %v2662_v30 = vadd.f32 1.0, %v3408_v5 }
0x24f3   :  { %v2663_v31 = vadd.f32 1.0, %v3410_v25 }
0x24f4   :  { %3411 = vrcp.f32 %v2662_v30 }
0x24f5   :  { %3413 = vrcp.f32 %v2663_v31 }
0x24fe   :  { %v3412_v47 = vpop.eup %3411 }
0x24ff   :  { %v3414_v6 = vpop.eup %3413  ;;  %v2671_v33 = vmul.f32 2.0, %v3412_v47  ;;  %v2670_v55 = vmul.f32 %v3412_v47, %v2668_v48 }
0x2500   :  { %v2687_v39 = vmul.f32 2.0, %v3414_v6  ;;  %v2686_v27 = vmul.f32 %v3414_v6, %v2684_v32 }
0x2501   :  { %v2922_v11 = vadd.f32 -1.0, %v2671_v33 }
0x2502   :  { %v2923_v40 = vadd.f32 -1.0, %v2687_v39 }
0x2503   :  { %2674 = vrot.lane.b32.xlu1 %v2922_v11, %s3517_s4 }
0x2504   :  { %2690 = vrot.lane.b32.xlu0 %v2923_v40, %s3517_s4 }
0x2575   :  { %v2675_v41 = vpop.permute.xlu1 %2674 }
0x2576   :  { %v2677_v45 = vmul.f32 %v3412_v47, %v2675_v41  ;;  %v2691_v46 = vpop.permute.xlu0 %2690 }
0x2577   :  { %v2693_v49 = vmul.f32 %v3414_v6, %v2691_v46 }
0x2578   :  { %2679 = vrot.lane.b32.xlu1 %v2677_v45, %s3518_s20 }
0x2579   :  { %2695 = vrot.lane.b32.xlu0 %v2693_v49, %s3518_s20 }
0x257d   :  { %2706 = vrot.lane.b32.xlu0 %v3412_v47, %s3518_s20 }
0x2581   :  { %1643 = vperm.xlu0 %3255, %v78_v52  }
0x2585   :  { %1648 = vrot.lane.b32.xlu0 %v1647_v50, %s3519_s21 }
0x2589   :  { %2112 = vrot.lane.b32.xlu0 %v2111_v61, %s3519_s21  ;;  %v77_v61 = vld [vmem:[%s4261_s1] sm:$0xff] }
0x258d   :  { %2410 = vrot.lane.b32.xlu0 %v2409_v42, %s3519_s21 }
0x25ea   :  { %v2680_v63 = vpop.permute.xlu1 %2679 }
0x25eb   :  { %v2682_v15 = vadd.f32 %v2680_v63, %v2670_v55  ;;  %v2696_v59 = vpop.permute.xlu0 %2695 }
0x25ec   :  { %v2698_v29 = vadd.f32 %v2696_v59, %v2686_v27 }
0x25ed   :  { %2700 = vrot.lane.b32.xlu1 %v2682_v15, %s3519_s21 }
0x25ef   :  { %v2707_v3 = vpop.permute.xlu0 %2706 }
0x25f1   :  { %2710 = vrot.lane.b32.xlu1 %v3414_v6, %s3517_s4  ;;  %s3483_s4 = scalar_lea.vmem %s2833_s19, 32 }
0x25f2   :  { %p3484_p10 = scmp.ne.s32.totalorder %s2833_s19, %s3483_s4  ;;  %p3489_p12 = scmp.lt.s32.totalorder %s3483_s4, %s3483_s4 }
0x25f4   :  { %p3490_p13 = por %p3489_p12, %p3488_p11 }
0x25f5   :  { %1800 = vrot.lane.b32.xlu1 %v1799_v9, %s3519_s21 }
0x25f6   :  { %p3491_p0 = pnand %p3490_p13, %p3484_p10 }
0x25f9   :  { %1636 = vperm.xlu1 %3256, %v77_v61  }
0x25fd   :  { %1956 = vrot.lane.b32.xlu1 %v1955_v56, %s3519_s21 }
0x2600   :  { %v1644_v17 = vpop.permute.xlu0 %1643 }
0x2601   :  { %2258 = vrot.lane.b32.xlu1 %v2257_v57, %s3519_s21  ;;  %v2254_v19 = vmul.f32 %v4127_v26, %v1644_v17  ;;  %v2403_v58 = vmul.f32 %v4150_v54, %v1644_v17  ;;  %v2924_v26 = vld [vmem:[%s4269_s9] ss:$0 sm:$0xff] }
0x2603   :  { %v2405_v38 = vrot.slane %v2403_v58, 2 }
0x2604   :  { %v1649_v24 = vpop.permute.xlu0 %1648 }
0x2605   :  { %2566 = vrot.lane.b32.xlu1 %v2565_v16, %s3519_s21  ;;  %v1651_v44 = vmul.f32 %v1649_v24, %v1644_v17 }
0x2608   :  { %v2113_v47 = vpop.permute.xlu0 %2112 }
0x2609   :  { %v2115_v33 = vmul.f32 %v2113_v47, %v1644_v17 }
0x260b   :  { %v2117_v41 = vrot.slane %v2115_v33, 2 }
0x260c   :  { %v2411_v46 = vpop.permute.xlu0 %2410 }
0x265f   :  { %v2701_v28 = vpop.permute.xlu1 %2700 }
0x2660   :  { %v2703_v53 = vsel %vm335_vm4, %v2701_v28, %v2698_v29 }
0x2661   :  { %3415 = vtanh.f32 %v2703_v53 }
0x2663   :  { %v2711_v60 = vpop.permute.xlu1 %2710 }
0x2664   :  { %v2713_v1 = vsel %vm335_vm4, %v2707_v3, %v2711_v60 }
0x2667   :  { %v1801_v35 = vpop.permute.xlu1 %1800 }
0x2668   :  { %v1803_v25 = vmul.f32 %v1801_v35, %v1644_v17 }
0x266a   :  { %v1805_v31 = vrot.slane %v1803_v25, 6 }
0x266b   :  { %v3416_v13 = vpop.eup %3415 }
0x266c   :  { %v4214_v36 = vmul.f32 %v3416_v13, %v2713_v1  ;;  %v1807_v39 = vadd.f32 %v1805_v31, %v1651_v44 }
0x266e   :  { %v2721_v4 = vrot.slane %v4214_v36, 6 }
0x2670   :  { %2722 = vrot.lane.b32.xlu0 %v2721_v4, %s3519_s21 }
0x2678   :  { %v1637_v18 = vpop.permute.xlu1 %1636 }
0x2679   :  { %v2413_v52 = vmul.f32 %v2411_v46, %v1637_v18  ;;  %v1793_v59 = vmul.f32 %v4047_v43, %v1637_v18  ;;  %v1639_v29 = vmul.f32 %v1637_v18, %v4023_v21  ;;  %v1949_v28 = vmul.f32 %v4071_v23, %v1637_v18 }
0x267a   :  { %v2105_v0 = vmul.f32 %v4095_v8, %v1637_v18  ;;  %v2559_v43 = vmul.f32 %v4168_v10, %v1644_v17  ;;  %v2715_v21 = vmul.f32 %v4214_v36, %v1644_v17 }
0x267b   :  { %v2415_v55 = vrot.slane %v2413_v52, 6  ;;  %v1795_v27 = vrot.slane %v1793_v59, 2  ;;  %v1951_v60 = vrot.slane %v1949_v28, 4 }
0x267c   :  { %v1957_v5 = vpop.permute.xlu1 %1956  ;;  %v2107_v13 = vrot.slane %v2105_v0, 6  ;;  %v2561_v51 = vrot.slane %v2559_v43, 4  ;;  %v2717_v4 = vrot.slane %v2715_v21, 6 }
0x267d   :  { %v1959_v30 = vmul.f32 %v1957_v5, %v1644_v17  ;;  %v1797_v53 = vadd.f32 %v1795_v27, %v1639_v29 }
0x267f   :  { %v1961_v6 = vrot.slane %v1959_v30, 4  ;;  %v1953_v3 = vadd.f32 %v1951_v60, %v1797_v53 }
0x2680   :  { %v2259_v11 = vpop.permute.xlu1 %2258 }
0x2681   :  { %v1963_v40 = vadd.f32 %v1961_v6, %v1807_v39  ;;  %v2261_v50 = vmul.f32 %v2259_v11, %v1637_v18  ;;  %v2109_v1 = vadd.f32 %v2107_v13, %v1953_v3 }
0x2683   :  { %v2119_v45 = vadd.f32 %v2117_v41, %v1963_v40  ;;  %v2255_v20 = vadd.f32 %v2254_v19, %v2109_v1 }
0x2684   :  { %v2567_v49 = vpop.permute.xlu1 %2566 }
0x2685   :  { %v2262_v42 = vadd.f32 %v2261_v50, %v2119_v45  ;;  %v2569_v48 = vmul.f32 %v2567_v49, %v1637_v18  ;;  %v2407_v62 = vadd.f32 %v2405_v38, %v2255_v20 }
0x2687   :  { %v2417_v63 = vadd.f32 %v2415_v55, %v2262_v42  ;;  %v2571_v15 = vrot.slane %v2569_v48, 4  ;;  %v2563_v23 = vadd.f32 %v2561_v51, %v2407_v62 }
0x2689   :  { %v2573_v56 = vadd.f32 %v2571_v15, %v2417_v63  ;;  %v2719_v2 = vadd.f32 %v2717_v4, %v2563_v23 }
0x26e2   :  { %v2723_v9 = vpop.permute.xlu0 %2722 }
0x26e3   :  { %v2725_v61 = vmul.f32 %v2723_v9, %v1637_v18 }
0x26e5   :  { %v2727_v57 = vrot.slane %v2725_v61, 2 }
0x26e7   :  { %v2729_v16 = vadd.f32 %v2727_v57, %v2573_v56 }
0x26e9   :  { %v2731_v32 = vrot.slane %v2729_v16, 6 }
0x26eb   :  { %2732 = vrot.lane.b32.xlu1 %v2731_v32, %s3518_s20 }
0x275d   :  { %v2733_v7 = vpop.permute.xlu1 %2732 }
0x275e   :  { %v2735_v8 = vsel %vm335_vm4, %v2719_v2, %v2733_v7 }
0x275f   :  { %2952 = vmatmul.mubr.msk.f32.vlgmr.msra.gmra.mrb[20].mxu0 %vm216_vm5, %v2735_v8 }
0x2832   :  { %v2820_v54 = vpop.f32.mrb[20].mxu0 }
0x2833   :  { %v2821_v10 = vadd.f32 %v2924_v26, %v2820_v54  ;;  %v2953_v22 = vpop.f32.mrb[21].mxu0 }
0x2835   :  { %2825 = vst.msk [vmem:[#allocation8] sm:$0x3] %vm2824_vm7, %v2821_v10 }
0x2836   :  { %3494 = shalt.err (!%p3491_p0)
}
0x2837   :  { %s3495_s22 = scalar_lea.hbm %s4270_s10, 32 }
0x2838   :  { %p3496_p1 = scmp.ne.s32.totalorder %s4270_s10, %s3495_s22  ;;  %p3499_p2 = scmp.lt.u32.totalorder %s3495_s22, %s4270_s10 }
0x283a   :  { %p3501_p3 = pnand %p3499_p2, %p3496_p1 }
0x283c   :  { %3504 = shalt.err (!%p3501_p3)
}
0x283d   :  { %2835 = dma.vmem_to_hbm [thread:$0]  %s2833_s19, 32, %s4270_s10, [#allocation4]  }
0x283e   :  { %3509 = dma.done.wait [#allocation4], 32  }
0x283f   :  { %3510 = vsyncadd [#allocation4], 4294967264 }
0x2840   :  { %2839 = vsyncpa [#allocation3], 1 }
0x2841   :  { %2840 = vsyncpa [#allocation6], 1 }
0x2842   :  { %2841 = vsyncpa [#allocation4], 1 }

</bundles_post_ra>
